<compile_context>
chip_gen: v7x
topology: tpu7x:2x2x1
jax: 0.10.0
libtpu: 0.0.40
codegen_flags: <defaults>
</compile_context>

<pallas_src>
import functools
import math

import jax
import jax.numpy as jnp
from jax.experimental import pallas as pl
from jax.experimental.pallas import tpu as pltpu

_VMEM_LIMIT = 48 * 1024 * 1024  # < v7x 64 MiB physical, > default scoped 32 MiB


def _pick_tile(dim, target, align):
    """Largest multiple of `align` <= target dividing dim; else the full dim."""
    if dim <= target:
        return dim
    t = (target // align) * align
    while t >= align:
        if dim % t == 0:
            return t
        t -= align
    return dim


# --------------------------- fused linear kernel ---------------------------- #

def _fused_linear_kernel(*refs, activation, transpose_rhs, has_gamma,
                         has_residual, eps):
    refs = list(refs)
    x_ref, w_ref = refs[0], refs[1]
    pos = 2
    gamma_ref = None
    res_ref = None
    if has_gamma:
        gamma_ref = refs[pos]
        pos += 1
    if has_residual:
        res_ref = refs[pos]
        pos += 1
    o_ref, acc_ref = refs[pos], refs[pos + 1]

    k_idx = pl.program_id(2)

    @pl.when(k_idx == 0)
    def _():
        acc_ref[...] = jnp.zeros_like(acc_ref)

    x = x_ref[...]
    if has_gamma:
        # RMSNorm fused into the consuming matmul (requires the full K row).
        xf = x.astype(jnp.float32)
        var = jnp.mean(xf * xf, axis=-1, keepdims=True)
        xf = xf * jax.lax.rsqrt(var + eps)
        x = (xf * gamma_ref[...].astype(jnp.float32)).astype(x_ref.dtype)

    w = w_ref[...]
    if transpose_rhs:
        acc_ref[...] += jax.lax.dot_general(
            x, w, (((1,), (1,)), ((), ())), preferred_element_type=jnp.float32)
    else:
        acc_ref[...] += jnp.dot(x, w, preferred_element_type=jnp.float32)

    @pl.when(k_idx == pl.num_programs(2) - 1)
    def _():
        y = acc_ref[...]
        if activation == "gelu":
            # TODO(synk): PyTorch nn.GELU defaults to exact erf GELU; tanh-approx
            # is used here for guaranteed Mosaic lowering (tiny numeric delta).
            y = jax.nn.gelu(y)
        if has_residual:
            y = y + res_ref[...].astype(jnp.float32)
        o_ref[...] = y.astype(o_ref.dtype)


def fused_linear(x, w, *, gamma=None, activation=None, residual=None,
                 transpose_rhs=False, out_dtype=None, eps=1e-6,
                 tm_target=256, tn_target=256, tk_target=512):
    """x: [M, K] @ (w [K, N] or w [N, K] if transpose_rhs) -> [M, N].

    Optional fused pre-RMSNorm (gamma [K]), GELU, residual add ([M, N]).
    """
    M, K = x.shape
    N = w.shape[0] if transpose_rhs else w.shape[1]
    out_dtype = out_dtype or x.dtype

    tm = _pick_tile(M, tm_target, 8)
    tn = _pick_tile(N, tn_target, 128)
    tk = K if gamma is not None else _pick_tile(K, tk_target, 128)
    grid = (M // tm, N // tn, K // tk)

    in_specs = [pl.BlockSpec((tm, tk), lambda i, j, k: (i, k))]
    if transpose_rhs:
        in_specs.append(pl.BlockSpec((tn, tk), lambda i, j, k: (j, k)))
    else:
        in_specs.append(pl.BlockSpec((tk, tn), lambda i, j, k: (k, j)))
    inputs = [x, w]
    if gamma is not None:
        in_specs.append(pl.BlockSpec((1, K), lambda i, j, k: (0, 0)))
        inputs.append(gamma.reshape(1, K).astype(jnp.float32))
    if residual is not None:
        in_specs.append(pl.BlockSpec((tm, tn), lambda i, j, k: (i, j)))
        inputs.append(residual)

    kernel = functools.partial(
        _fused_linear_kernel, activation=activation, transpose_rhs=transpose_rhs,
        has_gamma=gamma is not None, has_residual=residual is not None, eps=eps)

    return pl.pallas_call(
        kernel,
        out_shape=jax.ShapeDtypeStruct((M, N), out_dtype),
        grid=grid,
        in_specs=in_specs,
        out_specs=pl.BlockSpec((tm, tn), lambda i, j, k: (i, j)),
        scratch_shapes=[pltpu.VMEM((tm, tn), jnp.float32)],
        compiler_params=pltpu.CompilerParams(
            dimension_semantics=("parallel", "parallel", "arbitrary"),
            vmem_limit_bytes=_VMEM_LIMIT),
    )(*inputs)


# ------------------------------ RMSNorm kernel ------------------------------ #

def _rmsnorm_kernel(x_ref, w_ref, o_ref, *, eps):
    x = x_ref[...].astype(jnp.float32)
    var = jnp.mean(x * x, axis=-1, keepdims=True)
    y = x * jax.lax.rsqrt(var + eps)
    o_ref[...] = (y * w_ref[...]).astype(o_ref.dtype)


def rmsnorm(x, w, eps=1e-6):
    """x: [M, D], w: [D] -> [M, D]. (Only used where no consuming matmul exists.)"""
    M, D = x.shape
    bm = _pick_tile(M, 1024, 8)
    return pl.pallas_call(
        functools.partial(_rmsnorm_kernel, eps=eps),
        out_shape=jax.ShapeDtypeStruct((M, D), x.dtype),
        grid=(M // bm,),
        in_specs=[pl.BlockSpec((bm, D), lambda i: (i, 0)),
                  pl.BlockSpec((1, D), lambda i: (0, 0))],
        out_specs=pl.BlockSpec((bm, D), lambda i: (i, 0)),
        compiler_params=pltpu.CompilerParams(
            dimension_semantics=("parallel",),
            vmem_limit_bytes=_VMEM_LIMIT),
    )(x, w.reshape(1, D).astype(jnp.float32))


# ----------------------------- attention kernels ---------------------------- #

def _build_keep(m_row, tq, causal):
    """m_row: [1, Tk] f32 (1=keep).  Returns [Tq, Tk] bool mask."""
    tk = m_row.shape[-1]
    keep = jnp.broadcast_to(m_row > 0.0, (tq, tk))
    if causal:
        rows = jax.lax.broadcasted_iota(jnp.int32, (tq, tk), 0)
        cols = jax.lax.broadcasted_iota(jnp.int32, (tq, tk), 1)
        keep = jnp.logical_and(keep, rows >= cols)
    return keep


def _mha_core(q, k, v, keep, n_head, scale, out_dtype):
    """q: [Tq, D], k/v: [Tk, D] (bf16), keep: [Tq, Tk] bool -> [Tq, D]."""
    tq, d = q.shape
    hd = d // n_head
    outs = []
    for h in range(n_head):
        sl = slice(h * hd, (h + 1) * hd)
        s = jax.lax.dot_general(q[:, sl], k[:, sl], (((1,), (1,)), ((), ())),
                                preferred_element_type=jnp.float32)
        s = s * scale                      # f32 scores
        s = jnp.where(keep, s, -1e9)       # mask add stays in f32
        m = jnp.max(s, axis=-1, keepdims=True)
        p = jnp.exp(s - m)
        l = jnp.sum(p, axis=-1, keepdims=True)
        p = p * pl.reciprocal(l, approx=True)
        o_h = jax.lax.dot_general(p.astype(v.dtype), v[:, sl],
                                  (((1,), (0,)), ((), ())),
                                  preferred_element_type=jnp.float32)
        outs.append(o_h)
    return jnp.concatenate(outs, axis=-1).astype(out_dtype)


def _self_attn_kernel(qkv_ref, m_ref, o_ref, *, n_head, scale, causal):
    qkv = qkv_ref[0]                       # [T, 3D]
    d = qkv.shape[-1] // 3
    q, k, v = qkv[:, :d], qkv[:, d:2 * d], qkv[:, 2 * d:]
    keep = _build_keep(m_ref[0], q.shape[0], causal)
    o_ref[0] = _mha_core(q, k, v, keep, n_head, scale, o_ref.dtype)


def _cross_attn_kernel(q_ref, kv_ref, m_ref, o_ref, *, n_head, scale):
    q = q_ref[0]                           # [Tq, D]
    kv = kv_ref[0]                         # [Tk, 2D]
    d = q.shape[-1]
    k, v = kv[:, :d], kv[:, d:]
    keep = _build_keep(m_ref[0], q.shape[0], causal=False)
    o_ref[0] = _mha_core(q, k, v, keep, n_head, scale, o_ref.dtype)


def self_attention(qkv, key_mask, n_head, causal):
    """qkv: [B, T, 3D] packed, key_mask: [B, T] bool -> [B, T, D]."""
    B, T, D3 = qkv.shape
    D = D3 // 3
    hd = D // n_head
    km = key_mask.astype(jnp.float32).reshape(B, 1, T)
    kernel = functools.partial(_self_attn_kernel, n_head=n_head,
                               scale=1.0 / math.sqrt(hd), causal=causal)
    return pl.pallas_call(
        kernel,
        out_shape=jax.ShapeDtypeStruct((B, T, D), qkv.dtype),
        grid=(B,),
        in_specs=[pl.BlockSpec((1, T, D3), lambda b: (b, 0, 0)),
                  pl.BlockSpec((1, 1, T), lambda b: (b, 0, 0))],
        out_specs=pl.BlockSpec((1, T, D), lambda b: (b, 0, 0)),
        compiler_params=pltpu.CompilerParams(
            dimension_semantics=("parallel",),
            vmem_limit_bytes=_VMEM_LIMIT),
    )(qkv, km)


def cross_attention(q, kv, key_mask, n_head):
    """q: [B, Tq, D], kv: [B, Tk, 2D] packed, key_mask: [B, Tk] bool -> [B, Tq, D]."""
    B, Tq, D = q.shape
    Tk = kv.shape[1]
    hd = D // n_head
    km = key_mask.astype(jnp.float32).reshape(B, 1, Tk)
    kernel = functools.partial(_cross_attn_kernel, n_head=n_head,
                               scale=1.0 / math.sqrt(hd))
    return pl.pallas_call(
        kernel,
        out_shape=jax.ShapeDtypeStruct((B, Tq, D), q.dtype),
        grid=(B,),
        in_specs=[pl.BlockSpec((1, Tq, D), lambda b: (b, 0, 0)),
                  pl.BlockSpec((1, Tk, 2 * D), lambda b: (b, 0, 0)),
                  pl.BlockSpec((1, 1, Tk), lambda b: (b, 0, 0))],
        out_specs=pl.BlockSpec((1, Tq, D), lambda b: (b, 0, 0)),
        compiler_params=pltpu.CompilerParams(
            dimension_semantics=("parallel",),
            vmem_limit_bytes=_VMEM_LIMIT),
    )(q, kv, km)


# ------------------------------ Model glue --------------------------------- #

def encoder_block(x, lp, n_head, key_mask):
    B, T, D = x.shape
    x2 = x.reshape(B * T, D)
    # pre-norm + fused QKV projection
    qkv = fused_linear(x2, lp["w_qkv"], gamma=lp["ln1"])
    o = self_attention(qkv.reshape(B, T, 3 * D), key_mask, n_head, causal=False)
    # output projection with fused residual
    x2 = fused_linear(o.reshape(B * T, D), lp["wo"], residual=x2)
    # pre-norm + MLP (GELU fused), projection with fused residual
    h = fused_linear(x2, lp["w_fc"], gamma=lp["ln2"], activation="gelu")
    x2 = fused_linear(h, lp["w_proj"], residual=x2)
    return x2.reshape(B, T, D)


def decoder_block(x, enc_out, lp, n_head, dec_mask, enc_mask):
    B, T, D = x.shape
    S = enc_out.shape[1]
    x2 = x.reshape(B * T, D)
    # causal self-attention
    qkv = fused_linear(x2, lp["w_qkv"], gamma=lp["ln1"])
    o = self_attention(qkv.reshape(B, T, 3 * D), dec_mask, n_head, causal=True)
    x2 = fused_linear(o.reshape(B * T, D), lp["wo_self"], residual=x2)
    # cross-attention over encoder outputs (fused KV projection)
    q = fused_linear(x2, lp["wq_cross"], gamma=lp["ln2"])
    kv = fused_linear(enc_out.reshape(B * S, D), lp["w_kv_cross"])
    o = cross_attention(q.reshape(B, T, D), kv.reshape(B, S, 2 * D), enc_mask, n_head)
    x2 = fused_linear(o.reshape(B * T, D), lp["wo_cross"], residual=x2)
    # MLP
    h = fused_linear(x2, lp["w_fc"], gamma=lp["ln3"], activation="gelu")
    x2 = fused_linear(h, lp["w_proj"], residual=x2)
    return x2.reshape(B, T, D)


def encode(params, cfg, enc_ids):
    B, T = enc_ids.shape
    D, H = cfg["n_embd"], cfg["n_head"]
    enc_mask = enc_ids != cfg["pad_token_id"]
    e = jnp.take(params["wte"], enc_ids, axis=0)                # [B, T, D] bf16
    for lp in params["enc"]:
        e = encoder_block(e, lp, H, enc_mask)
    e = rmsnorm(e.reshape(B * T, D), params["ln_e"]).reshape(B, T, D)
    return e, enc_mask


def decode(params, cfg, dec_ids, enc_out, enc_mask):
    B, T = dec_ids.shape
    D, H, V = cfg["n_embd"], cfg["n_head"], cfg["vocab_size"]
    dec_mask = dec_ids != cfg["pad_token_id"]
    x = jnp.take(params["wte"], dec_ids, axis=0)                # [B, T, D] bf16
    for lp in params["dec"]:
        x = decoder_block(x, enc_out, lp, H, dec_mask, enc_mask)
    # ln_f fused into the tied lm_head matmul: logits = RMSNorm(x) @ wte^T
    logits = fused_linear(x.reshape(B * T, D), params["wte"],
                          gamma=params["ln_f"], transpose_rhs=True,
                          out_dtype=jnp.float32)
    return logits.reshape(B, T, V)


def mu_forward(params, cfg, encoder_input_ids, decoder_input_ids):
    enc_out, enc_mask = encode(params, cfg, encoder_input_ids)
    return decode(params, cfg, decoder_input_ids, enc_out, enc_mask)


# --------------------------- Parameter creation ---------------------------- #

def init_params(key, cfg):
    V, D = cfg["vocab_size"], cfg["n_embd"]
    hidden = 4 * D
    keys = iter(jax.random.split(key, 1024))

    def nrm(shape):
        # Matches reference init: normal(mean=0, std=0.02); stored in bf16.
        return (0.02 * jax.random.normal(next(keys), shape, jnp.float32)
                ).astype(jnp.bfloat16)

    def gamma():
        return jnp.ones((D,), jnp.float32)

    def enc_layer():
        return {"ln1": gamma(), "w_qkv": nrm((D, 3 * D)), "wo": nrm((D, D)),
                "ln2": gamma(), "w_fc": nrm((D, hidden)), "w_proj": nrm((hidden, D))}

    def dec_layer():
        return {"ln1": gamma(), "w_qkv": nrm((D, 3 * D)), "wo_self": nrm((D, D)),
                "ln2": gamma(), "wq_cross": nrm((D, D)),
                "w_kv_cross": nrm((D, 2 * D)), "wo_cross": nrm((D, D)),
                "ln3": gamma(), "w_fc": nrm((D, hidden)), "w_proj": nrm((hidden, D))}

    return {
        "wte": nrm((V, D)),
        "ln_e": gamma(),
        "ln_f": gamma(),
        "enc": [enc_layer() for _ in range(cfg["n_encoder_layer"])],
        "dec": [dec_layer() for _ in range(cfg["n_decoder_layer"])],
    }


# ---------------------------------- Main ------------------------------------ #

if __name__ == "__main__":
    cfg = dict(vocab_size=64, n_embd=32, n_head=4,
               n_encoder_layer=2, n_decoder_layer=2, pad_token_id=0)

    key = jax.random.PRNGKey(0)
    pkey, ekey, dkey = jax.random.split(key, 3)
    params = init_params(pkey, cfg)

    B, T_enc, T_dec = 2, 8, 8
    enc_ids = jax.random.randint(ekey, (B, T_enc), 1, cfg["vocab_size"], dtype=jnp.int32)
    dec_ids = jax.random.randint(dkey, (B, T_dec), 1, cfg["vocab_size"], dtype=jnp.int32)
    # introduce some padding so the masks are exercised
    enc_ids = enc_ids.at[0, -2:].set(cfg["pad_token_id"])
    dec_ids = dec_ids.at[1, -3:].set(cfg["pad_token_id"])

    fwd = jax.jit(lambda p, e, d: mu_forward(p, cfg, e, d))
    logits = fwd(params, enc_ids, dec_ids)
    jax.block_until_ready(logits)

    assert logits.shape == (B, T_dec, cfg["vocab_size"])
    assert bool(jnp.all(jnp.isfinite(logits)))
    print("KERNEL_OK")
</pallas_src>

<mosaic_0001>
module attributes {stable_mosaic.version = 11 : i64} {
  func.func @_fused_linear_kernel(%arg0: i32, %arg1: i32, %arg2: i32, %arg3: memref<16x32xbf16, #tpu.memory_space<vmem>>, %arg4: memref<32x32xbf16, #tpu.memory_space<vmem>>, %arg5: memref<16x32xbf16, #tpu.memory_space<vmem>>, %arg6: memref<16x32xbf16, #tpu.memory_space<vmem>>, %arg7: memref<16x32xf32, #tpu.memory_space<vmem>>) attributes {dimension_semantics = [#tpu.dimension_semantics<parallel>, #tpu.dimension_semantics<parallel>, #tpu.dimension_semantics<arbitrary>], iteration_bounds = array<i64: 1, 1, 1>, scalar_prefetch = 0 : i64, scratch_operands = 1 : i64, tpu.core_type = #tpu.core_type<tc>, window_params = [{transform_indices = @transform_0, window_bounds = array<i64: 16, 32>}, {transform_indices = @transform_1, window_bounds = array<i64: 32, 32>}, {transform_indices = @transform_2, window_bounds = array<i64: 16, 32>}, {transform_indices = @transform_3, window_bounds = array<i64: 16, 32>}]} {
    %c0_i32 = arith.constant 0 : i32
    %0 = arith.cmpi eq, %arg2, %c0_i32 : i32
    %1 = arith.extui %0 : i1 to i32
    %c0_i32_0 = arith.constant 0 : i32
    %2 = arith.cmpi ne, %1, %c0_i32_0 : i32
    scf.if %2 {
      %cst_10 = arith.constant 0.000000e+00 : f32
      %12 = vector.broadcast %cst_10 : f32 to vector<16x32xf32>
      %c0_11 = arith.constant 0 : index
      %c0_12 = arith.constant 0 : index
      %13 = vector.load %arg7[%c0_11, %c0_12] : memref<16x32xf32, #tpu.memory_space<vmem>>, vector<16x32xf32>
      tpu.vector_store %arg7[%c0_11, %c0_12], %12 {strides = array<i32>} : memref<16x32xf32, #tpu.memory_space<vmem>>, vector<16x32xf32>,
    } else {
    }
    %c0 = arith.constant 0 : index
    %c0_1 = arith.constant 0 : index
    %3 = vector.load %arg3[%c0, %c0_1] : memref<16x32xbf16, #tpu.memory_space<vmem>>, vector<16x32xbf16>
    %c0_2 = arith.constant 0 : index
    %c0_3 = arith.constant 0 : index
    %4 = vector.load %arg4[%c0_2, %c0_3] : memref<32x32xbf16, #tpu.memory_space<vmem>>, vector<32x32xbf16>
    %c0_4 = arith.constant 0 : index
    %c0_5 = arith.constant 0 : index
    %5 = vector.load %arg7[%c0_4, %c0_5] : memref<16x32xf32, #tpu.memory_space<vmem>>, vector<16x32xf32>
    %cst = arith.constant dense<0.000000e+00> : vector<16x32xf32>
    %6 = tpu.matmul %3, %4, %cst {dimension_numbers = #tpu.dot_dimension_numbers<[1], [0], [0], [1], [0, 0, 1, 1], [], []>} : vector<16x32xbf16>, vector<32x32xbf16>, vector<16x32xf32> -> vector<16x32xf32>
    %7 = arith.addf %5, %6 : vector<16x32xf32>
    %c0_6 = arith.constant 0 : index
    %c0_7 = arith.constant 0 : index
    %8 = vector.load %arg7[%c0_6, %c0_7] : memref<16x32xf32, #tpu.memory_space<vmem>>, vector<16x32xf32>
    tpu.vector_store %arg7[%c0_6, %c0_7], %7 {strides = array<i32>} : memref<16x32xf32, #tpu.memory_space<vmem>>, vector<16x32xf32>,
    %c0_i32_8 = arith.constant 0 : i32
    %9 = arith.cmpi eq, %arg2, %c0_i32_8 : i32
    %10 = arith.extui %9 : i1 to i32
    %c0_i32_9 = arith.constant 0 : i32
    %11 = arith.cmpi ne, %10, %c0_i32_9 : i32
    scf.if %11 {
      %c0_10 = arith.constant 0 : index
      %c0_11 = arith.constant 0 : index
      %12 = vector.load %arg7[%c0_10, %c0_11] : memref<16x32xf32, #tpu.memory_space<vmem>>, vector<16x32xf32>
      %c0_12 = arith.constant 0 : index
      %c0_13 = arith.constant 0 : index
      %13 = vector.load %arg5[%c0_12, %c0_13] : memref<16x32xbf16, #tpu.memory_space<vmem>>, vector<16x32xbf16>
      %14 = arith.extf %13 : vector<16x32xbf16> to vector<16x32xf32>
      %15 = arith.addf %12, %14 : vector<16x32xf32>
      %16 = arith.truncf %15 : vector<16x32xf32> to vector<16x32xbf16>
      %c0_14 = arith.constant 0 : index
      %c0_15 = arith.constant 0 : index
      %17 = vector.load %arg6[%c0_14, %c0_15] : memref<16x32xbf16, #tpu.memory_space<vmem>>, vector<16x32xbf16>
      tpu.vector_store %arg6[%c0_14, %c0_15], %16 {strides = array<i32>} : memref<16x32xbf16, #tpu.memory_space<vmem>>, vector<16x32xbf16>,
    } else {
    }
    return
  }
  func.func @transform_0(%arg0: i32, %arg1: i32, %arg2: i32) -> (i32, i32) {
    %c0_i32 = arith.constant 0 : i32
    return %arg0, %arg2 : i32, i32
  }
  func.func @transform_1(%arg0: i32, %arg1: i32, %arg2: i32) -> (i32, i32) {
    %c0_i32 = arith.constant 0 : i32
    return %arg2, %arg1 : i32, i32
  }
  func.func @transform_2(%arg0: i32, %arg1: i32, %arg2: i32) -> (i32, i32) {
    %c0_i32 = arith.constant 0 : i32
    return %arg0, %arg1 : i32, i32
  }
  func.func @transform_3(%arg0: i32, %arg1: i32, %arg2: i32) -> (i32, i32) {
    %c0_i32 = arith.constant 0 : i32
    return %arg0, %arg1 : i32, i32
  }
}

module attributes {stable_mosaic.version = 11 : i64} {
  func.func @_self_attn_kernel(%arg0: i32, %arg1: memref<1x8x96xbf16, #tpu.memory_space<vmem>>, %arg2: memref<1x1x8xf32, #tpu.memory_space<vmem>>, %arg3: memref<1x8x32xbf16, #tpu.memory_space<vmem>>) attributes {dimension_semantics = [#tpu.dimension_semantics<parallel>], iteration_bounds = array<i64: 2>, scalar_prefetch = 0 : i64, scratch_operands = 0 : i64, tpu.core_type = #tpu.core_type<tc>, window_params = [{transform_indices = @transform_0, window_bounds = array<i64: 1, 8, 96>}, {transform_indices = @transform_1, window_bounds = array<i64: 1, 1, 8>}, {transform_indices = @transform_2, window_bounds = array<i64: 1, 8, 32>}]} {
    %c0 = arith.constant 0 : index
    %c0_0 = arith.constant 0 : index
    %c0_1 = arith.constant 0 : index
    %0 = vector.load %arg1[%c0, %c0_0, %c0_1] : memref<1x8x96xbf16, #tpu.memory_space<vmem>>, vector<1x8x96xbf16>
    %1 = vector.shape_cast %0 : vector<1x8x96xbf16> to vector<8x96xbf16>
    %2 = vector.extract_strided_slice %1 {offsets = [0, 0], sizes = [8, 32], strides = [1, 1]} : vector<8x96xbf16> to vector<8x32xbf16>
    %3 = vector.extract_strided_slice %1 {offsets = [0, 32], sizes = [8, 32], strides = [1, 1]} : vector<8x96xbf16> to vector<8x32xbf16>
    %4 = vector.extract_strided_slice %1 {offsets = [0, 64], sizes = [8, 32], strides = [1, 1]} : vector<8x96xbf16> to vector<8x32xbf16>
    %c0_2 = arith.constant 0 : index
    %c0_3 = arith.constant 0 : index
    %c0_4 = arith.constant 0 : index
    %5 = vector.load %arg2[%c0_2, %c0_3, %c0_4] : memref<1x1x8xf32, #tpu.memory_space<vmem>>, vector<1x1x8xf32>
    %6 = vector.shape_cast %5 : vector<1x1x8xf32> to vector<1x8xf32>
    %cst = arith.constant 0.000000e+00 : f32
    %7 = vector.broadcast %cst : f32 to vector<1x8xf32>
    %8 = arith.cmpf ogt, %6, %7 : vector<1x8xf32>
    %9 = vector.shape_cast %8 : vector<1x8xi1> to vector<1x8xi1>
    %10 = vector.broadcast %9 : vector<1x8xi1> to vector<8x8xi1>
    %11 = vector.extract_strided_slice %2 {offsets = [0, 0], sizes = [8, 8], strides = [1, 1]} : vector<8x32xbf16> to vector<8x8xbf16>
    %12 = vector.extract_strided_slice %3 {offsets = [0, 0], sizes = [8, 8], strides = [1, 1]} : vector<8x32xbf16> to vector<8x8xbf16>
    %cst_5 = arith.constant dense<0.000000e+00> : vector<8x8xf32>
    %13 = tpu.matmul %11, %12, %cst_5 {dimension_numbers = #tpu.dot_dimension_numbers<[1], [1], [0], [0], [0, 0, 1, 0], [], []>} : vector<8x8xbf16>, vector<8x8xbf16>, vector<8x8xf32> -> vector<8x8xf32>
    %cst_6 = arith.constant 0.353553385 : f32
    %14 = vector.broadcast %cst_6 : f32 to vector<8x8xf32>
    %15 = arith.mulf %13, %14 : vector<8x8xf32>
    %cst_7 = arith.constant -1.000000e+09 : f32
    %16 = vector.broadcast %cst_7 : f32 to vector<8x8xf32>
    %17 = arith.select %10, %15, %16 : vector<8x8xi1>, vector<8x8xf32>
    %cst_8 = arith.constant dense<0xFF800000> : vector<8xf32>
    %18 = vector.multi_reduction <maximumf>, %17, %cst_8 [1] : vector<8x8xf32> to vector<8xf32>
    %19 = vector.shape_cast %18 : vector<8xf32> to vector<8x1xf32>
    %20 = vector.broadcast %19 : vector<8x1xf32> to vector<8x8xf32>
    %21 = arith.subf %17, %20 : vector<8x8xf32>
    %22 = math.exp %21 : vector<8x8xf32>
    %cst_9 = arith.constant dense<0.000000e+00> : vector<8xf32>
    %23 = vector.multi_reduction <add>, %22, %cst_9 [1] : vector<8x8xf32> to vector<8xf32>
    %24 = vector.shape_cast %23 : vector<8xf32> to vector<8x1xf32>
    %25 = tpu.reciprocal %24 {approx = true} : vector<8x1xf32> -> vector<8x1xf32>
    %26 = vector.broadcast %25 : vector<8x1xf32> to vector<8x8xf32>
    %27 = arith.mulf %22, %26 : vector<8x8xf32>
    %28 = arith.truncf %27 : vector<8x8xf32> to vector<8x8xbf16>
    %29 = vector.extract_strided_slice %4 {offsets = [0, 0], sizes = [8, 8], strides = [1, 1]} : vector<8x32xbf16> to vector<8x8xbf16>
    %cst_10 = arith.constant dense<0.000000e+00> : vector<8x8xf32>
    %30 = tpu.matmul %28, %29, %cst_10 {dimension_numbers = #tpu.dot_dimension_numbers<[1], [0], [0], [1], [0, 0, 1, 1], [], []>} : vector<8x8xbf16>, vector<8x8xbf16>, vector<8x8xf32> -> vector<8x8xf32>
    %31 = vector.extract_strided_slice %2 {offsets = [0, 8], sizes = [8, 8], strides = [1, 1]} : vector<8x32xbf16> to vector<8x8xbf16>
    %32 = vector.extract_strided_slice %3 {offsets = [0, 8], sizes = [8, 8], strides = [1, 1]} : vector<8x32xbf16> to vector<8x8xbf16>
    %cst_11 = arith.constant dense<0.000000e+00> : vector<8x8xf32>
    %33 = tpu.matmul %31, %32, %cst_11 {dimension_numbers = #tpu.dot_dimension_numbers<[1], [1], [0], [0], [0, 0, 1, 0], [], []>} : vector<8x8xbf16>, vector<8x8xbf16>, vector<8x8xf32> -> vector<8x8xf32>
    %cst_12 = arith.constant 0.353553385 : f32
    %34 = vector.broadcast %cst_12 : f32 to vector<8x8xf32>
    %35 = arith.mulf %33, %34 : vector<8x8xf32>
    %cst_13 = arith.constant -1.000000e+09 : f32
    %36 = vector.broadcast %cst_13 : f32 to vector<8x8xf32>
    %37 = arith.select %10, %35, %36 : vector<8x8xi1>, vector<8x8xf32>
    %cst_14 = arith.constant dense<0xFF800000> : vector<8xf32>
    %38 = vector.multi_reduction <maximumf>, %37, %cst_14 [1] : vector<8x8xf32> to vector<8xf32>
    %39 = vector.shape_cast %38 : vector<8xf32> to vector<8x1xf32>
    %40 = vector.broadcast %39 : vector<8x1xf32> to vector<8x8xf32>
    %41 = arith.subf %37, %40 : vector<8x8xf32>
    %42 = math.exp %41 : vector<8x8xf32>
    %cst_15 = arith.constant dense<0.000000e+00> : vector<8xf32>
    %43 = vector.multi_reduction <add>, %42, %cst_15 [1] : vector<8x8xf32> to vector<8xf32>
    %44 = vector.shape_cast %43 : vector<8xf32> to vector<8x1xf32>
    %45 = tpu.reciprocal %44 {approx = true} : vector<8x1xf32> -> vector<8x1xf32>
    %46 = vector.broadcast %45 : vector<8x1xf32> to vector<8x8xf32>
    %47 = arith.mulf %42, %46 : vector<8x8xf32>
    %48 = arith.truncf %47 : vector<8x8xf32> to vector<8x8xbf16>
    %49 = vector.extract_strided_slice %4 {offsets = [0, 8], sizes = [8, 8], strides = [1, 1]} : vector<8x32xbf16> to vector<8x8xbf16>
    %cst_16 = arith.constant dense<0.000000e+00> : vector<8x8xf32>
    %50 = tpu.matmul %48, %49, %cst_16 {dimension_numbers = #tpu.dot_dimension_numbers<[1], [0], [0], [1], [0, 0, 1, 1], [], []>} : vector<8x8xbf16>, vector<8x8xbf16>, vector<8x8xf32> -> vector<8x8xf32>
    %51 = vector.extract_strided_slice %2 {offsets = [0, 16], sizes = [8, 8], strides = [1, 1]} : vector<8x32xbf16> to vector<8x8xbf16>
    %52 = vector.extract_strided_slice %3 {offsets = [0, 16], sizes = [8, 8], strides = [1, 1]} : vector<8x32xbf16> to vector<8x8xbf16>
    %cst_17 = arith.constant dense<0.000000e+00> : vector<8x8xf32>
    %53 = tpu.matmul %51, %52, %cst_17 {dimension_numbers = #tpu.dot_dimension_numbers<[1], [1], [0], [0], [0, 0, 1, 0], [], []>} : vector<8x8xbf16>, vector<8x8xbf16>, vector<8x8xf32> -> vector<8x8xf32>
    %cst_18 = arith.constant 0.353553385 : f32
    %54 = vector.broadcast %cst_18 : f32 to vector<8x8xf32>
    %55 = arith.mulf %53, %54 : vector<8x8xf32>
    %cst_19 = arith.constant -1.000000e+09 : f32
    %56 = vector.broadcast %cst_19 : f32 to vector<8x8xf32>
    %57 = arith.select %10, %55, %56 : vector<8x8xi1>, vector<8x8xf32>
    %cst_20 = arith.constant dense<0xFF800000> : vector<8xf32>
    %58 = vector.multi_reduction <maximumf>, %57, %cst_20 [1] : vector<8x8xf32> to vector<8xf32>
    %59 = vector.shape_cast %58 : vector<8xf32> to vector<8x1xf32>
    %60 = vector.broadcast %59 : vector<8x1xf32> to vector<8x8xf32>
    %61 = arith.subf %57, %60 : vector<8x8xf32>
    %62 = math.exp %61 : vector<8x8xf32>
    %cst_21 = arith.constant dense<0.000000e+00> : vector<8xf32>
    %63 = vector.multi_reduction <add>, %62, %cst_21 [1] : vector<8x8xf32> to vector<8xf32>
    %64 = vector.shape_cast %63 : vector<8xf32> to vector<8x1xf32>
    %65 = tpu.reciprocal %64 {approx = true} : vector<8x1xf32> -> vector<8x1xf32>
    %66 = vector.broadcast %65 : vector<8x1xf32> to vector<8x8xf32>
    %67 = arith.mulf %62, %66 : vector<8x8xf32>
    %68 = arith.truncf %67 : vector<8x8xf32> to vector<8x8xbf16>
    %69 = vector.extract_strided_slice %4 {offsets = [0, 16], sizes = [8, 8], strides = [1, 1]} : vector<8x32xbf16> to vector<8x8xbf16>
    %cst_22 = arith.constant dense<0.000000e+00> : vector<8x8xf32>
    %70 = tpu.matmul %68, %69, %cst_22 {dimension_numbers = #tpu.dot_dimension_numbers<[1], [0], [0], [1], [0, 0, 1, 1], [], []>} : vector<8x8xbf16>, vector<8x8xbf16>, vector<8x8xf32> -> vector<8x8xf32>
    %71 = vector.extract_strided_slice %2 {offsets = [0, 24], sizes = [8, 8], strides = [1, 1]} : vector<8x32xbf16> to vector<8x8xbf16>
    %72 = vector.extract_strided_slice %3 {offsets = [0, 24], sizes = [8, 8], strides = [1, 1]} : vector<8x32xbf16> to vector<8x8xbf16>
    %cst_23 = arith.constant dense<0.000000e+00> : vector<8x8xf32>
    %73 = tpu.matmul %71, %72, %cst_23 {dimension_numbers = #tpu.dot_dimension_numbers<[1], [1], [0], [0], [0, 0, 1, 0], [], []>} : vector<8x8xbf16>, vector<8x8xbf16>, vector<8x8xf32> -> vector<8x8xf32>
    %cst_24 = arith.constant 0.353553385 : f32
    %74 = vector.broadcast %cst_24 : f32 to vector<8x8xf32>
    %75 = arith.mulf %73, %74 : vector<8x8xf32>
    %cst_25 = arith.constant -1.000000e+09 : f32
    %76 = vector.broadcast %cst_25 : f32 to vector<8x8xf32>
    %77 = arith.select %10, %75, %76 : vector<8x8xi1>, vector<8x8xf32>
    %cst_26 = arith.constant dense<0xFF800000> : vector<8xf32>
    %78 = vector.multi_reduction <maximumf>, %77, %cst_26 [1] : vector<8x8xf32> to vector<8xf32>
    %79 = vector.shape_cast %78 : vector<8xf32> to vector<8x1xf32>
    %80 = vector.broadcast %79 : vector<8x1xf32> to vector<8x8xf32>
    %81 = arith.subf %77, %80 : vector<8x8xf32>
    %82 = math.exp %81 : vector<8x8xf32>
    %cst_27 = arith.constant dense<0.000000e+00> : vector<8xf32>
    %83 = vector.multi_reduction <add>, %82, %cst_27 [1] : vector<8x8xf32> to vector<8xf32>
    %84 = vector.shape_cast %83 : vector<8xf32> to vector<8x1xf32>
    %85 = tpu.reciprocal %84 {approx = true} : vector<8x1xf32> -> vector<8x1xf32>
    %86 = vector.broadcast %85 : vector<8x1xf32> to vector<8x8xf32>
    %87 = arith.mulf %82, %86 : vector<8x8xf32>
    %88 = arith.truncf %87 : vector<8x8xf32> to vector<8x8xbf16>
    %89 = vector.extract_strided_slice %4 {offsets = [0, 24], sizes = [8, 8], strides = [1, 1]} : vector<8x32xbf16> to vector<8x8xbf16>
    %cst_28 = arith.constant dense<0.000000e+00> : vector<8x8xf32>
    %90 = tpu.matmul %88, %89, %cst_28 {dimension_numbers = #tpu.dot_dimension_numbers<[1], [0], [0], [1], [0, 0, 1, 1], [], []>} : vector<8x8xbf16>, vector<8x8xbf16>, vector<8x8xf32> -> vector<8x8xf32>
    %91 = tpu.concatenate %30, %50, %70, %90 in 1 : vector<8x8xf32>, vector<8x8xf32>, vector<8x8xf32>, vector<8x8xf32> -> vector<8x32xf32>
    %92 = arith.truncf %91 : vector<8x32xf32> to vector<8x32xbf16>
    %c0_29 = arith.constant 0 : index
    %c0_30 = arith.constant 0 : index
    %c0_31 = arith.constant 0 : index
    %93 = vector.load %arg3[%c0_29, %c0_30, %c0_31] : memref<1x8x32xbf16, #tpu.memory_space<vmem>>, vector<1x8x32xbf16>
    %94 = vector.shape_cast %93 : vector<1x8x32xbf16> to vector<8x32xbf16>
    %95 = vector.shape_cast %92 : vector<8x32xbf16> to vector<1x8x32xbf16>
    tpu.vector_store %arg3[%c0_29, %c0_30, %c0_31], %95 {strides = array<i32>} : memref<1x8x32xbf16, #tpu.memory_space<vmem>>, vector<1x8x32xbf16>,
    return
  }
  func.func @transform_0(%arg0: i32) -> (i32, i32, i32) {
    %c0_i32 = arith.constant 0 : i32
    %c0_i32_0 = arith.constant 0 : i32
    %c0_i32_1 = arith.constant 0 : i32
    return %arg0, %c0_i32, %c0_i32_0 : i32, i32, i32
  }
  func.func @transform_1(%arg0: i32) -> (i32, i32, i32) {
    %c0_i32 = arith.constant 0 : i32
    %c0_i32_0 = arith.constant 0 : i32
    %c0_i32_1 = arith.constant 0 : i32
    return %arg0, %c0_i32, %c0_i32_0 : i32, i32, i32
  }
  func.func @transform_2(%arg0: i32) -> (i32, i32, i32) {
    %c0_i32 = arith.constant 0 : i32
    %c0_i32_0 = arith.constant 0 : i32
    %c0_i32_1 = arith.constant 0 : i32
    return %arg0, %c0_i32, %c0_i32_0 : i32, i32, i32
  }
}

module attributes {stable_mosaic.version = 11 : i64} {
  func.func @_fused_linear_kernel(%arg0: i32, %arg1: i32, %arg2: i32, %arg3: memref<16x32xbf16, #tpu.memory_space<vmem>>, %arg4: memref<32x96xbf16, #tpu.memory_space<vmem>>, %arg5: memref<1x32xf32, #tpu.memory_space<vmem>>, %arg6: memref<16x96xbf16, #tpu.memory_space<vmem>>, %arg7: memref<16x96xf32, #tpu.memory_space<vmem>>) attributes {dimension_semantics = [#tpu.dimension_semantics<parallel>, #tpu.dimension_semantics<parallel>, #tpu.dimension_semantics<arbitrary>], iteration_bounds = array<i64: 1, 1, 1>, scalar_prefetch = 0 : i64, scratch_operands = 1 : i64, tpu.core_type = #tpu.core_type<tc>, window_params = [{transform_indices = @transform_0, window_bounds = array<i64: 16, 32>}, {transform_indices = @transform_1, window_bounds = array<i64: 32, 96>}, {pipeline_mode = #tpu.pipeline_mode<synchronous>, transform_indices = @transform_2, window_bounds = array<i64: 1, 32>}, {transform_indices = @transform_3, window_bounds = array<i64: 16, 96>}]} {
    %c0_i32 = arith.constant 0 : i32
    %0 = arith.cmpi eq, %arg2, %c0_i32 : i32
    %1 = arith.extui %0 : i1 to i32
    %c0_i32_0 = arith.constant 0 : i32
    %2 = arith.cmpi ne, %1, %c0_i32_0 : i32
    scf.if %2 {
      %cst_15 = arith.constant 0.000000e+00 : f32
      %27 = vector.broadcast %cst_15 : f32 to vector<16x96xf32>
      %c0_16 = arith.constant 0 : index
      %c0_17 = arith.constant 0 : index
      %28 = vector.load %arg7[%c0_16, %c0_17] : memref<16x96xf32, #tpu.memory_space<vmem>>, vector<16x96xf32>
      tpu.vector_store %arg7[%c0_16, %c0_17], %27 {strides = array<i32>} : memref<16x96xf32, #tpu.memory_space<vmem>>, vector<16x96xf32>,
    } else {
    }
    %c0 = arith.constant 0 : index
    %c0_1 = arith.constant 0 : index
    %3 = vector.load %arg3[%c0, %c0_1] : memref<16x32xbf16, #tpu.memory_space<vmem>>, vector<16x32xbf16>
    %4 = arith.extf %3 : vector<16x32xbf16> to vector<16x32xf32>
    %5 = arith.mulf %4, %4 : vector<16x32xf32>
    %cst = arith.constant dense<0.000000e+00> : vector<16xf32>
    %6 = vector.multi_reduction <add>, %5, %cst [1] : vector<16x32xf32> to vector<16xf32>
    %7 = vector.shape_cast %6 : vector<16xf32> to vector<16x1xf32>
    %cst_2 = arith.constant 3.200000e+01 : f32
    %8 = vector.broadcast %cst_2 : f32 to vector<16x1xf32>
    %9 = arith.divf %7, %8 : vector<16x1xf32>
    %cst_3 = arith.constant 9.99999997E-7 : f32
    %10 = vector.broadcast %cst_3 : f32 to vector<16x1xf32>
    %11 = arith.addf %9, %10 : vector<16x1xf32>
    %12 = math.rsqrt %11 : vector<16x1xf32>
    %13 = vector.broadcast %12 : vector<16x1xf32> to vector<16x32xf32>
    %14 = arith.mulf %4, %13 : vector<16x32xf32>
    %c0_4 = arith.constant 0 : index
    %c0_5 = arith.constant 0 : index
    %15 = vector.load %arg5[%c0_4, %c0_5] : memref<1x32xf32, #tpu.memory_space<vmem>>, vector<1x32xf32>
    %16 = vector.broadcast %15 : vector<1x32xf32> to vector<16x32xf32>
    %17 = arith.mulf %14, %16 : vector<16x32xf32>
    %18 = arith.truncf %17 : vector<16x32xf32> to vector<16x32xbf16>
    %c0_6 = arith.constant 0 : index
    %c0_7 = arith.constant 0 : index
    %19 = vector.load %arg4[%c0_6, %c0_7] : memref<32x96xbf16, #tpu.memory_space<vmem>>, vector<32x96xbf16>
    %c0_8 = arith.constant 0 : index
    %c0_9 = arith.constant 0 : index
    %20 = vector.load %arg7[%c0_8, %c0_9] : memref<16x96xf32, #tpu.memory_space<vmem>>, vector<16x96xf32>
    %cst_10 = arith.constant dense<0.000000e+00> : vector<16x96xf32>
    %21 = tpu.matmul %18, %19, %cst_10 {dimension_numbers = #tpu.dot_dimension_numbers<[1], [0], [0], [1], [0, 0, 1, 1], [], []>} : vector<16x32xbf16>, vector<32x96xbf16>, vector<16x96xf32> -> vector<16x96xf32>
    %22 = arith.addf %20, %21 : vector<16x96xf32>
    %c0_11 = arith.constant 0 : index
    %c0_12 = arith.constant 0 : index
    %23 = vector.load %arg7[%c0_11, %c0_12] : memref<16x96xf32, #tpu.memory_space<vmem>>, vector<16x96xf32>
    tpu.vector_store %arg7[%c0_11, %c0_12], %22 {strides = array<i32>} : memref<16x96xf32, #tpu.memory_space<vmem>>, vector<16x96xf32>,
    %c0_i32_13 = arith.constant 0 : i32
    %24 = arith.cmpi eq, %arg2, %c0_i32_13 : i32
    %25 = arith.extui %24 : i1 to i32
    %c0_i32_14 = arith.constant 0 : i32
    %26 = arith.cmpi ne, %25, %c0_i32_14 : i32
    scf.if %26 {
      %c0_15 = arith.constant 0 : index
      %c0_16 = arith.constant 0 : index
      %27 = vector.load %arg7[%c0_15, %c0_16] : memref<16x96xf32, #tpu.memory_space<vmem>>, vector<16x96xf32>
      %28 = arith.truncf %27 : vector<16x96xf32> to vector<16x96xbf16>
      %c0_17 = arith.constant 0 : index
      %c0_18 = arith.constant 0 : index
      %29 = vector.load %arg6[%c0_17, %c0_18] : memref<16x96xbf16, #tpu.memory_space<vmem>>, vector<16x96xbf16>
      tpu.vector_store %arg6[%c0_17, %c0_18], %28 {strides = array<i32>} : memref<16x96xbf16, #tpu.memory_space<vmem>>, vector<16x96xbf16>,
    } else {
    }
    return
  }
  func.func @transform_0(%arg0: i32, %arg1: i32, %arg2: i32) -> (i32, i32) {
    %c0_i32 = arith.constant 0 : i32
    return %arg0, %arg2 : i32, i32
  }
  func.func @transform_1(%arg0: i32, %arg1: i32, %arg2: i32) -> (i32, i32) {
    %c0_i32 = arith.constant 0 : i32
    return %arg2, %arg1 : i32, i32
  }
  func.func @transform_2(%arg0: i32, %arg1: i32, %arg2: i32) -> (i32, i32) {
    %c0_i32 = arith.constant 0 : i32
    %c0_i32_0 = arith.constant 0 : i32
    %c0_i32_1 = arith.constant 0 : i32
    return %c0_i32, %c0_i32_0 : i32, i32
  }
  func.func @transform_3(%arg0: i32, %arg1: i32, %arg2: i32) -> (i32, i32) {
    %c0_i32 = arith.constant 0 : i32
    return %arg0, %arg1 : i32, i32
  }
}

module attributes {stable_mosaic.version = 11 : i64} {
  func.func @_fused_linear_kernel(%arg0: i32, %arg1: i32, %arg2: i32, %arg3: memref<16x32xbf16, #tpu.memory_space<vmem>>, %arg4: memref<32x128xbf16, #tpu.memory_space<vmem>>, %arg5: memref<1x32xf32, #tpu.memory_space<vmem>>, %arg6: memref<16x128xbf16, #tpu.memory_space<vmem>>, %arg7: memref<16x128xf32, #tpu.memory_space<vmem>>) attributes {dimension_semantics = [#tpu.dimension_semantics<parallel>, #tpu.dimension_semantics<parallel>, #tpu.dimension_semantics<arbitrary>], iteration_bounds = array<i64: 1, 1, 1>, scalar_prefetch = 0 : i64, scratch_operands = 1 : i64, tpu.core_type = #tpu.core_type<tc>, window_params = [{transform_indices = @transform_0, window_bounds = array<i64: 16, 32>}, {transform_indices = @transform_1, window_bounds = array<i64: 32, 128>}, {pipeline_mode = #tpu.pipeline_mode<synchronous>, transform_indices = @transform_2, window_bounds = array<i64: 1, 32>}, {transform_indices = @transform_3, window_bounds = array<i64: 16, 128>}]} {
    %c0_i32 = arith.constant 0 : i32
    %0 = arith.cmpi eq, %arg2, %c0_i32 : i32
    %1 = arith.extui %0 : i1 to i32
    %c0_i32_0 = arith.constant 0 : i32
    %2 = arith.cmpi ne, %1, %c0_i32_0 : i32
    scf.if %2 {
      %cst_15 = arith.constant 0.000000e+00 : f32
      %27 = vector.broadcast %cst_15 : f32 to vector<16x128xf32>
      %c0_16 = arith.constant 0 : index
      %c0_17 = arith.constant 0 : index
      %28 = vector.load %arg7[%c0_16, %c0_17] : memref<16x128xf32, #tpu.memory_space<vmem>>, vector<16x128xf32>
      tpu.vector_store %arg7[%c0_16, %c0_17], %27 {strides = array<i32>} : memref<16x128xf32, #tpu.memory_space<vmem>>, vector<16x128xf32>,
    } else {
    }
    %c0 = arith.constant 0 : index
    %c0_1 = arith.constant 0 : index
    %3 = vector.load %arg3[%c0, %c0_1] : memref<16x32xbf16, #tpu.memory_space<vmem>>, vector<16x32xbf16>
    %4 = arith.extf %3 : vector<16x32xbf16> to vector<16x32xf32>
    %5 = arith.mulf %4, %4 : vector<16x32xf32>
    %cst = arith.constant dense<0.000000e+00> : vector<16xf32>
    %6 = vector.multi_reduction <add>, %5, %cst [1] : vector<16x32xf32> to vector<16xf32>
    %7 = vector.shape_cast %6 : vector<16xf32> to vector<16x1xf32>
    %cst_2 = arith.constant 3.200000e+01 : f32
    %8 = vector.broadcast %cst_2 : f32 to vector<16x1xf32>
    %9 = arith.divf %7, %8 : vector<16x1xf32>
    %cst_3 = arith.constant 9.99999997E-7 : f32
    %10 = vector.broadcast %cst_3 : f32 to vector<16x1xf32>
    %11 = arith.addf %9, %10 : vector<16x1xf32>
    %12 = math.rsqrt %11 : vector<16x1xf32>
    %13 = vector.broadcast %12 : vector<16x1xf32> to vector<16x32xf32>
    %14 = arith.mulf %4, %13 : vector<16x32xf32>
    %c0_4 = arith.constant 0 : index
    %c0_5 = arith.constant 0 : index
    %15 = vector.load %arg5[%c0_4, %c0_5] : memref<1x32xf32, #tpu.memory_space<vmem>>, vector<1x32xf32>
    %16 = vector.broadcast %15 : vector<1x32xf32> to vector<16x32xf32>
    %17 = arith.mulf %14, %16 : vector<16x32xf32>
    %18 = arith.truncf %17 : vector<16x32xf32> to vector<16x32xbf16>
    %c0_6 = arith.constant 0 : index
    %c0_7 = arith.constant 0 : index
    %19 = vector.load %arg4[%c0_6, %c0_7] : memref<32x128xbf16, #tpu.memory_space<vmem>>, vector<32x128xbf16>
    %c0_8 = arith.constant 0 : index
    %c0_9 = arith.constant 0 : index
    %20 = vector.load %arg7[%c0_8, %c0_9] : memref<16x128xf32, #tpu.memory_space<vmem>>, vector<16x128xf32>
    %cst_10 = arith.constant dense<0.000000e+00> : vector<16x128xf32>
    %21 = tpu.matmul %18, %19, %cst_10 {dimension_numbers = #tpu.dot_dimension_numbers<[1], [0], [0], [1], [0, 0, 1, 1], [], []>} : vector<16x32xbf16>, vector<32x128xbf16>, vector<16x128xf32> -> vector<16x128xf32>
    %22 = arith.addf %20, %21 : vector<16x128xf32>
    %c0_11 = arith.constant 0 : index
    %c0_12 = arith.constant 0 : index
    %23 = vector.load %arg7[%c0_11, %c0_12] : memref<16x128xf32, #tpu.memory_space<vmem>>, vector<16x128xf32>
    tpu.vector_store %arg7[%c0_11, %c0_12], %22 {strides = array<i32>} : memref<16x128xf32, #tpu.memory_space<vmem>>, vector<16x128xf32>,
    %c0_i32_13 = arith.constant 0 : i32
    %24 = arith.cmpi eq, %arg2, %c0_i32_13 : i32
    %25 = arith.extui %24 : i1 to i32
    %c0_i32_14 = arith.constant 0 : i32
    %26 = arith.cmpi ne, %25, %c0_i32_14 : i32
    scf.if %26 {
      %c0_15 = arith.constant 0 : index
      %c0_16 = arith.constant 0 : index
      %27 = vector.load %arg7[%c0_15, %c0_16] : memref<16x128xf32, #tpu.memory_space<vmem>>, vector<16x128xf32>
      %28 = arith.mulf %27, %27 : vector<16x128xf32>
      %29 = arith.mulf %27, %28 : vector<16x128xf32>
      %cst_17 = arith.constant 4.471500e-02 : f32
      %30 = vector.broadcast %cst_17 : f32 to vector<16x128xf32>
      %31 = arith.mulf %30, %29 : vector<16x128xf32>
      %32 = arith.addf %27, %31 : vector<16x128xf32>
      %cst_18 = arith.constant 0.797884583 : f32
      %33 = vector.broadcast %cst_18 : f32 to vector<16x128xf32>
      %34 = arith.mulf %33, %32 : vector<16x128xf32>
      %35 = math.tanh %34 : vector<16x128xf32>
      %cst_19 = arith.constant 1.000000e+00 : f32
      %36 = vector.broadcast %cst_19 : f32 to vector<16x128xf32>
      %37 = arith.addf %36, %35 : vector<16x128xf32>
      %cst_20 = arith.constant 5.000000e-01 : f32
      %38 = vector.broadcast %cst_20 : f32 to vector<16x128xf32>
      %39 = arith.mulf %38, %37 : vector<16x128xf32>
      %40 = arith.mulf %27, %39 : vector<16x128xf32>
      %41 = arith.truncf %40 : vector<16x128xf32> to vector<16x128xbf16>
      %c0_21 = arith.constant 0 : index
      %c0_22 = arith.constant 0 : index
      %42 = vector.load %arg6[%c0_21, %c0_22] : memref<16x128xbf16, #tpu.memory_space<vmem>>, vector<16x128xbf16>
      tpu.vector_store %arg6[%c0_21, %c0_22], %41 {strides = array<i32>} : memref<16x128xbf16, #tpu.memory_space<vmem>>, vector<16x128xbf16>,
    } else {
    }
    return
  }
  func.func @transform_0(%arg0: i32, %arg1: i32, %arg2: i32) -> (i32, i32) {
    %c0_i32 = arith.constant 0 : i32
    return %arg0, %arg2 : i32, i32
  }
  func.func @transform_1(%arg0: i32, %arg1: i32, %arg2: i32) -> (i32, i32) {
    %c0_i32 = arith.constant 0 : i32
    return %arg2, %arg1 : i32, i32
  }
  func.func @transform_2(%arg0: i32, %arg1: i32, %arg2: i32) -> (i32, i32) {
    %c0_i32 = arith.constant 0 : i32
    %c0_i32_0 = arith.constant 0 : i32
    %c0_i32_1 = arith.constant 0 : i32
    return %c0_i32, %c0_i32_0 : i32, i32
  }
  func.func @transform_3(%arg0: i32, %arg1: i32, %arg2: i32) -> (i32, i32) {
    %c0_i32 = arith.constant 0 : i32
    return %arg0, %arg1 : i32, i32
  }
}

module attributes {stable_mosaic.version = 11 : i64} {
  func.func @_rmsnorm_kernel(%arg0: i32, %arg1: memref<16x32xbf16, #tpu.memory_space<vmem>>, %arg2: memref<1x32xf32, #tpu.memory_space<vmem>>, %arg3: memref<16x32xbf16, #tpu.memory_space<vmem>>) attributes {dimension_semantics = [#tpu.dimension_semantics<parallel>], iteration_bounds = array<i64: 1>, scalar_prefetch = 0 : i64, scratch_operands = 0 : i64, tpu.core_type = #tpu.core_type<tc>, window_params = [{transform_indices = @transform_0, window_bounds = array<i64: 16, 32>}, {pipeline_mode = #tpu.pipeline_mode<synchronous>, transform_indices = @transform_1, window_bounds = array<i64: 1, 32>}, {transform_indices = @transform_2, window_bounds = array<i64: 16, 32>}]} {
    %c0 = arith.constant 0 : index
    %c0_0 = arith.constant 0 : index
    %0 = vector.load %arg1[%c0, %c0_0] : memref<16x32xbf16, #tpu.memory_space<vmem>>, vector<16x32xbf16>
    %1 = arith.extf %0 : vector<16x32xbf16> to vector<16x32xf32>
    %2 = arith.mulf %1, %1 : vector<16x32xf32>
    %cst = arith.constant dense<0.000000e+00> : vector<16xf32>
    %3 = vector.multi_reduction <add>, %2, %cst [1] : vector<16x32xf32> to vector<16xf32>
    %4 = vector.shape_cast %3 : vector<16xf32> to vector<16x1xf32>
    %cst_1 = arith.constant 3.200000e+01 : f32
    %5 = vector.broadcast %cst_1 : f32 to vector<16x1xf32>
    %6 = arith.divf %4, %5 : vector<16x1xf32>
    %cst_2 = arith.constant 9.99999997E-7 : f32
    %7 = vector.broadcast %cst_2 : f32 to vector<16x1xf32>
    %8 = arith.addf %6, %7 : vector<16x1xf32>
    %9 = math.rsqrt %8 : vector<16x1xf32>
    %10 = vector.broadcast %9 : vector<16x1xf32> to vector<16x32xf32>
    %11 = arith.mulf %1, %10 : vector<16x32xf32>
    %c0_3 = arith.constant 0 : index
    %c0_4 = arith.constant 0 : index
    %12 = vector.load %arg2[%c0_3, %c0_4] : memref<1x32xf32, #tpu.memory_space<vmem>>, vector<1x32xf32>
    %13 = vector.broadcast %12 : vector<1x32xf32> to vector<16x32xf32>
    %14 = arith.mulf %11, %13 : vector<16x32xf32>
    %15 = arith.truncf %14 : vector<16x32xf32> to vector<16x32xbf16>
    %c0_5 = arith.constant 0 : index
    %c0_6 = arith.constant 0 : index
    %16 = vector.load %arg3[%c0_5, %c0_6] : memref<16x32xbf16, #tpu.memory_space<vmem>>, vector<16x32xbf16>
    tpu.vector_store %arg3[%c0_5, %c0_6], %15 {strides = array<i32>} : memref<16x32xbf16, #tpu.memory_space<vmem>>, vector<16x32xbf16>,
    return
  }
  func.func @transform_0(%arg0: i32) -> (i32, i32) {
    %c0_i32 = arith.constant 0 : i32
    %c0_i32_0 = arith.constant 0 : i32
    return %arg0, %c0_i32 : i32, i32
  }
  func.func @transform_1(%arg0: i32) -> (i32, i32) {
    %c0_i32 = arith.constant 0 : i32
    %c0_i32_0 = arith.constant 0 : i32
    %c0_i32_1 = arith.constant 0 : i32
    return %c0_i32, %c0_i32_0 : i32, i32
  }
  func.func @transform_2(%arg0: i32) -> (i32, i32) {
    %c0_i32 = arith.constant 0 : i32
    %c0_i32_0 = arith.constant 0 : i32
    return %arg0, %c0_i32 : i32, i32
  }
}

module attributes {stable_mosaic.version = 11 : i64} {
  func.func @_fused_linear_kernel(%arg0: i32, %arg1: i32, %arg2: i32, %arg3: memref<16x128xbf16, #tpu.memory_space<vmem>>, %arg4: memref<128x32xbf16, #tpu.memory_space<vmem>>, %arg5: memref<16x32xbf16, #tpu.memory_space<vmem>>, %arg6: memref<16x32xbf16, #tpu.memory_space<vmem>>, %arg7: memref<16x32xf32, #tpu.memory_space<vmem>>) attributes {dimension_semantics = [#tpu.dimension_semantics<parallel>, #tpu.dimension_semantics<parallel>, #tpu.dimension_semantics<arbitrary>], iteration_bounds = array<i64: 1, 1, 1>, scalar_prefetch = 0 : i64, scratch_operands = 1 : i64, tpu.core_type = #tpu.core_type<tc>, window_params = [{transform_indices = @transform_0, window_bounds = array<i64: 16, 128>}, {transform_indices = @transform_1, window_bounds = array<i64: 128, 32>}, {transform_indices = @transform_2, window_bounds = array<i64: 16, 32>}, {transform_indices = @transform_3, window_bounds = array<i64: 16, 32>}]} {
    %c0_i32 = arith.constant 0 : i32
    %0 = arith.cmpi eq, %arg2, %c0_i32 : i32
    %1 = arith.extui %0 : i1 to i32
    %c0_i32_0 = arith.constant 0 : i32
    %2 = arith.cmpi ne, %1, %c0_i32_0 : i32
    scf.if %2 {
      %cst_10 = arith.constant 0.000000e+00 : f32
      %12 = vector.broadcast %cst_10 : f32 to vector<16x32xf32>
      %c0_11 = arith.constant 0 : index
      %c0_12 = arith.constant 0 : index
      %13 = vector.load %arg7[%c0_11, %c0_12] : memref<16x32xf32, #tpu.memory_space<vmem>>, vector<16x32xf32>
      tpu.vector_store %arg7[%c0_11, %c0_12], %12 {strides = array<i32>} : memref<16x32xf32, #tpu.memory_space<vmem>>, vector<16x32xf32>,
    } else {
    }
    %c0 = arith.constant 0 : index
    %c0_1 = arith.constant 0 : index
    %3 = vector.load %arg3[%c0, %c0_1] : memref<16x128xbf16, #tpu.memory_space<vmem>>, vector<16x128xbf16>
    %c0_2 = arith.constant 0 : index
    %c0_3 = arith.constant 0 : index
    %4 = vector.load %arg4[%c0_2, %c0_3] : memref<128x32xbf16, #tpu.memory_space<vmem>>, vector<128x32xbf16>
    %c0_4 = arith.constant 0 : index
    %c0_5 = arith.constant 0 : index
    %5 = vector.load %arg7[%c0_4, %c0_5] : memref<16x32xf32, #tpu.memory_space<vmem>>, vector<16x32xf32>
    %cst = arith.constant dense<0.000000e+00> : vector<16x32xf32>
    %6 = tpu.matmul %3, %4, %cst {dimension_numbers = #tpu.dot_dimension_numbers<[1], [0], [0], [1], [0, 0, 1, 1], [], []>} : vector<16x128xbf16>, vector<128x32xbf16>, vector<16x32xf32> -> vector<16x32xf32>
    %7 = arith.addf %5, %6 : vector<16x32xf32>
    %c0_6 = arith.constant 0 : index
    %c0_7 = arith.constant 0 : index
    %8 = vector.load %arg7[%c0_6, %c0_7] : memref<16x32xf32, #tpu.memory_space<vmem>>, vector<16x32xf32>
    tpu.vector_store %arg7[%c0_6, %c0_7], %7 {strides = array<i32>} : memref<16x32xf32, #tpu.memory_space<vmem>>, vector<16x32xf32>,
    %c0_i32_8 = arith.constant 0 : i32
    %9 = arith.cmpi eq, %arg2, %c0_i32_8 : i32
    %10 = arith.extui %9 : i1 to i32
    %c0_i32_9 = arith.constant 0 : i32
    %11 = arith.cmpi ne, %10, %c0_i32_9 : i32
    scf.if %11 {
      %c0_10 = arith.constant 0 : index
      %c0_11 = arith.constant 0 : index
      %12 = vector.load %arg7[%c0_10, %c0_11] : memref<16x32xf32, #tpu.memory_space<vmem>>, vector<16x32xf32>
      %c0_12 = arith.constant 0 : index
      %c0_13 = arith.constant 0 : index
      %13 = vector.load %arg5[%c0_12, %c0_13] : memref<16x32xbf16, #tpu.memory_space<vmem>>, vector<16x32xbf16>
      %14 = arith.extf %13 : vector<16x32xbf16> to vector<16x32xf32>
      %15 = arith.addf %12, %14 : vector<16x32xf32>
      %16 = arith.truncf %15 : vector<16x32xf32> to vector<16x32xbf16>
      %c0_14 = arith.constant 0 : index
      %c0_15 = arith.constant 0 : index
      %17 = vector.load %arg6[%c0_14, %c0_15] : memref<16x32xbf16, #tpu.memory_space<vmem>>, vector<16x32xbf16>
      tpu.vector_store %arg6[%c0_14, %c0_15], %16 {strides = array<i32>} : memref<16x32xbf16, #tpu.memory_space<vmem>>, vector<16x32xbf16>,
    } else {
    }
    return
  }
  func.func @transform_0(%arg0: i32, %arg1: i32, %arg2: i32) -> (i32, i32) {
    %c0_i32 = arith.constant 0 : i32
    return %arg0, %arg2 : i32, i32
  }
  func.func @transform_1(%arg0: i32, %arg1: i32, %arg2: i32) -> (i32, i32) {
    %c0_i32 = arith.constant 0 : i32
    return %arg2, %arg1 : i32, i32
  }
  func.func @transform_2(%arg0: i32, %arg1: i32, %arg2: i32) -> (i32, i32) {
    %c0_i32 = arith.constant 0 : i32
    return %arg0, %arg1 : i32, i32
  }
  func.func @transform_3(%arg0: i32, %arg1: i32, %arg2: i32) -> (i32, i32) {
    %c0_i32 = arith.constant 0 : i32
    return %arg0, %arg1 : i32, i32
  }
}

module attributes {stable_mosaic.version = 11 : i64} {
  func.func @_fused_linear_kernel(%arg0: i32, %arg1: i32, %arg2: i32, %arg3: memref<16x32xbf16, #tpu.memory_space<vmem>>, %arg4: memref<32x64xbf16, #tpu.memory_space<vmem>>, %arg5: memref<16x64xbf16, #tpu.memory_space<vmem>>, %arg6: memref<16x64xf32, #tpu.memory_space<vmem>>) attributes {dimension_semantics = [#tpu.dimension_semantics<parallel>, #tpu.dimension_semantics<parallel>, #tpu.dimension_semantics<arbitrary>], iteration_bounds = array<i64: 1, 1, 1>, scalar_prefetch = 0 : i64, scratch_operands = 1 : i64, tpu.core_type = #tpu.core_type<tc>, window_params = [{transform_indices = @transform_0, window_bounds = array<i64: 16, 32>}, {transform_indices = @transform_1, window_bounds = array<i64: 32, 64>}, {transform_indices = @transform_2, window_bounds = array<i64: 16, 64>}]} {
    %c0_i32 = arith.constant 0 : i32
    %0 = arith.cmpi eq, %arg2, %c0_i32 : i32
    %1 = arith.extui %0 : i1 to i32
    %c0_i32_0 = arith.constant 0 : i32
    %2 = arith.cmpi ne, %1, %c0_i32_0 : i32
    scf.if %2 {
      %cst_10 = arith.constant 0.000000e+00 : f32
      %12 = vector.broadcast %cst_10 : f32 to vector<16x64xf32>
      %c0_11 = arith.constant 0 : index
      %c0_12 = arith.constant 0 : index
      %13 = vector.load %arg6[%c0_11, %c0_12] : memref<16x64xf32, #tpu.memory_space<vmem>>, vector<16x64xf32>
      tpu.vector_store %arg6[%c0_11, %c0_12], %12 {strides = array<i32>} : memref<16x64xf32, #tpu.memory_space<vmem>>, vector<16x64xf32>,
    } else {
    }
    %c0 = arith.constant 0 : index
    %c0_1 = arith.constant 0 : index
    %3 = vector.load %arg3[%c0, %c0_1] : memref<16x32xbf16, #tpu.memory_space<vmem>>, vector<16x32xbf16>
    %c0_2 = arith.constant 0 : index
    %c0_3 = arith.constant 0 : index
    %4 = vector.load %arg4[%c0_2, %c0_3] : memref<32x64xbf16, #tpu.memory_space<vmem>>, vector<32x64xbf16>
    %c0_4 = arith.constant 0 : index
    %c0_5 = arith.constant 0 : index
    %5 = vector.load %arg6[%c0_4, %c0_5] : memref<16x64xf32, #tpu.memory_space<vmem>>, vector<16x64xf32>
    %cst = arith.constant dense<0.000000e+00> : vector<16x64xf32>
    %6 = tpu.matmul %3, %4, %cst {dimension_numbers = #tpu.dot_dimension_numbers<[1], [0], [0], [1], [0, 0, 1, 1], [], []>} : vector<16x32xbf16>, vector<32x64xbf16>, vector<16x64xf32> -> vector<16x64xf32>
    %7 = arith.addf %5, %6 : vector<16x64xf32>
    %c0_6 = arith.constant 0 : index
    %c0_7 = arith.constant 0 : index
    %8 = vector.load %arg6[%c0_6, %c0_7] : memref<16x64xf32, #tpu.memory_space<vmem>>, vector<16x64xf32>
    tpu.vector_store %arg6[%c0_6, %c0_7], %7 {strides = array<i32>} : memref<16x64xf32, #tpu.memory_space<vmem>>, vector<16x64xf32>,
    %c0_i32_8 = arith.constant 0 : i32
    %9 = arith.cmpi eq, %arg2, %c0_i32_8 : i32
    %10 = arith.extui %9 : i1 to i32
    %c0_i32_9 = arith.constant 0 : i32
    %11 = arith.cmpi ne, %10, %c0_i32_9 : i32
    scf.if %11 {
      %c0_10 = arith.constant 0 : index
      %c0_11 = arith.constant 0 : index
      %12 = vector.load %arg6[%c0_10, %c0_11] : memref<16x64xf32, #tpu.memory_space<vmem>>, vector<16x64xf32>
      %13 = arith.truncf %12 : vector<16x64xf32> to vector<16x64xbf16>
      %c0_12 = arith.constant 0 : index
      %c0_13 = arith.constant 0 : index
      %14 = vector.load %arg5[%c0_12, %c0_13] : memref<16x64xbf16, #tpu.memory_space<vmem>>, vector<16x64xbf16>
      tpu.vector_store %arg5[%c0_12, %c0_13], %13 {strides = array<i32>} : memref<16x64xbf16, #tpu.memory_space<vmem>>, vector<16x64xbf16>,
    } else {
    }
    return
  }
  func.func @transform_0(%arg0: i32, %arg1: i32, %arg2: i32) -> (i32, i32) {
    %c0_i32 = arith.constant 0 : i32
    return %arg0, %arg2 : i32, i32
  }
  func.func @transform_1(%arg0: i32, %arg1: i32, %arg2: i32) -> (i32, i32) {
    %c0_i32 = arith.constant 0 : i32
    return %arg2, %arg1 : i32, i32
  }
  func.func @transform_2(%arg0: i32, %arg1: i32, %arg2: i32) -> (i32, i32) {
    %c0_i32 = arith.constant 0 : i32
    return %arg0, %arg1 : i32, i32
  }
}

module attributes {stable_mosaic.version = 11 : i64} {
  func.func @_self_attn_kernel(%arg0: i32, %arg1: memref<1x8x96xbf16, #tpu.memory_space<vmem>>, %arg2: memref<1x1x8xf32, #tpu.memory_space<vmem>>, %arg3: memref<1x8x32xbf16, #tpu.memory_space<vmem>>) attributes {dimension_semantics = [#tpu.dimension_semantics<parallel>], iteration_bounds = array<i64: 2>, scalar_prefetch = 0 : i64, scratch_operands = 0 : i64, tpu.core_type = #tpu.core_type<tc>, window_params = [{transform_indices = @transform_0, window_bounds = array<i64: 1, 8, 96>}, {transform_indices = @transform_1, window_bounds = array<i64: 1, 1, 8>}, {transform_indices = @transform_2, window_bounds = array<i64: 1, 8, 32>}]} {
    %c0 = arith.constant 0 : index
    %c0_0 = arith.constant 0 : index
    %c0_1 = arith.constant 0 : index
    %0 = vector.load %arg1[%c0, %c0_0, %c0_1] : memref<1x8x96xbf16, #tpu.memory_space<vmem>>, vector<1x8x96xbf16>
    %1 = vector.shape_cast %0 : vector<1x8x96xbf16> to vector<8x96xbf16>
    %2 = vector.extract_strided_slice %1 {offsets = [0, 0], sizes = [8, 32], strides = [1, 1]} : vector<8x96xbf16> to vector<8x32xbf16>
    %3 = vector.extract_strided_slice %1 {offsets = [0, 32], sizes = [8, 32], strides = [1, 1]} : vector<8x96xbf16> to vector<8x32xbf16>
    %4 = vector.extract_strided_slice %1 {offsets = [0, 64], sizes = [8, 32], strides = [1, 1]} : vector<8x96xbf16> to vector<8x32xbf16>
    %c0_2 = arith.constant 0 : index
    %c0_3 = arith.constant 0 : index
    %c0_4 = arith.constant 0 : index
    %5 = vector.load %arg2[%c0_2, %c0_3, %c0_4] : memref<1x1x8xf32, #tpu.memory_space<vmem>>, vector<1x1x8xf32>
    %6 = vector.shape_cast %5 : vector<1x1x8xf32> to vector<1x8xf32>
    %cst = arith.constant 0.000000e+00 : f32
    %7 = vector.broadcast %cst : f32 to vector<1x8xf32>
    %8 = arith.cmpf ogt, %6, %7 : vector<1x8xf32>
    %9 = vector.shape_cast %8 : vector<1x8xi1> to vector<1x8xi1>
    %10 = vector.broadcast %9 : vector<1x8xi1> to vector<8x8xi1>
    %11 = tpu.iota {dimensions = array<i32: 0>} : vector<8x8xi32>
    %12 = tpu.iota {dimensions = array<i32: 1>} : vector<8x8xi32>
    %13 = arith.cmpi sge, %11, %12 : vector<8x8xi32>
    %14 = arith.andi %10, %13 : vector<8x8xi1>
    %15 = vector.extract_strided_slice %2 {offsets = [0, 0], sizes = [8, 8], strides = [1, 1]} : vector<8x32xbf16> to vector<8x8xbf16>
    %16 = vector.extract_strided_slice %3 {offsets = [0, 0], sizes = [8, 8], strides = [1, 1]} : vector<8x32xbf16> to vector<8x8xbf16>
    %cst_5 = arith.constant dense<0.000000e+00> : vector<8x8xf32>
    %17 = tpu.matmul %15, %16, %cst_5 {dimension_numbers = #tpu.dot_dimension_numbers<[1], [1], [0], [0], [0, 0, 1, 0], [], []>} : vector<8x8xbf16>, vector<8x8xbf16>, vector<8x8xf32> -> vector<8x8xf32>
    %cst_6 = arith.constant 0.353553385 : f32
    %18 = vector.broadcast %cst_6 : f32 to vector<8x8xf32>
    %19 = arith.mulf %17, %18 : vector<8x8xf32>
    %cst_7 = arith.constant -1.000000e+09 : f32
    %20 = vector.broadcast %cst_7 : f32 to vector<8x8xf32>
    %21 = arith.select %14, %19, %20 : vector<8x8xi1>, vector<8x8xf32>
    %cst_8 = arith.constant dense<0xFF800000> : vector<8xf32>
    %22 = vector.multi_reduction <maximumf>, %21, %cst_8 [1] : vector<8x8xf32> to vector<8xf32>
    %23 = vector.shape_cast %22 : vector<8xf32> to vector<8x1xf32>
    %24 = vector.broadcast %23 : vector<8x1xf32> to vector<8x8xf32>
    %25 = arith.subf %21, %24 : vector<8x8xf32>
    %26 = math.exp %25 : vector<8x8xf32>
    %cst_9 = arith.constant dense<0.000000e+00> : vector<8xf32>
    %27 = vector.multi_reduction <add>, %26, %cst_9 [1] : vector<8x8xf32> to vector<8xf32>
    %28 = vector.shape_cast %27 : vector<8xf32> to vector<8x1xf32>
    %29 = tpu.reciprocal %28 {approx = true} : vector<8x1xf32> -> vector<8x1xf32>
    %30 = vector.broadcast %29 : vector<8x1xf32> to vector<8x8xf32>
    %31 = arith.mulf %26, %30 : vector<8x8xf32>
    %32 = arith.truncf %31 : vector<8x8xf32> to vector<8x8xbf16>
    %33 = vector.extract_strided_slice %4 {offsets = [0, 0], sizes = [8, 8], strides = [1, 1]} : vector<8x32xbf16> to vector<8x8xbf16>
    %cst_10 = arith.constant dense<0.000000e+00> : vector<8x8xf32>
    %34 = tpu.matmul %32, %33, %cst_10 {dimension_numbers = #tpu.dot_dimension_numbers<[1], [0], [0], [1], [0, 0, 1, 1], [], []>} : vector<8x8xbf16>, vector<8x8xbf16>, vector<8x8xf32> -> vector<8x8xf32>
    %35 = vector.extract_strided_slice %2 {offsets = [0, 8], sizes = [8, 8], strides = [1, 1]} : vector<8x32xbf16> to vector<8x8xbf16>
    %36 = vector.extract_strided_slice %3 {offsets = [0, 8], sizes = [8, 8], strides = [1, 1]} : vector<8x32xbf16> to vector<8x8xbf16>
    %cst_11 = arith.constant dense<0.000000e+00> : vector<8x8xf32>
    %37 = tpu.matmul %35, %36, %cst_11 {dimension_numbers = #tpu.dot_dimension_numbers<[1], [1], [0], [0], [0, 0, 1, 0], [], []>} : vector<8x8xbf16>, vector<8x8xbf16>, vector<8x8xf32> -> vector<8x8xf32>
    %cst_12 = arith.constant 0.353553385 : f32
    %38 = vector.broadcast %cst_12 : f32 to vector<8x8xf32>
    %39 = arith.mulf %37, %38 : vector<8x8xf32>
    %cst_13 = arith.constant -1.000000e+09 : f32
    %40 = vector.broadcast %cst_13 : f32 to vector<8x8xf32>
    %41 = arith.select %14, %39, %40 : vector<8x8xi1>, vector<8x8xf32>
    %cst_14 = arith.constant dense<0xFF800000> : vector<8xf32>
    %42 = vector.multi_reduction <maximumf>, %41, %cst_14 [1] : vector<8x8xf32> to vector<8xf32>
    %43 = vector.shape_cast %42 : vector<8xf32> to vector<8x1xf32>
    %44 = vector.broadcast %43 : vector<8x1xf32> to vector<8x8xf32>
    %45 = arith.subf %41, %44 : vector<8x8xf32>
    %46 = math.exp %45 : vector<8x8xf32>
    %cst_15 = arith.constant dense<0.000000e+00> : vector<8xf32>
    %47 = vector.multi_reduction <add>, %46, %cst_15 [1] : vector<8x8xf32> to vector<8xf32>
    %48 = vector.shape_cast %47 : vector<8xf32> to vector<8x1xf32>
    %49 = tpu.reciprocal %48 {approx = true} : vector<8x1xf32> -> vector<8x1xf32>
    %50 = vector.broadcast %49 : vector<8x1xf32> to vector<8x8xf32>
    %51 = arith.mulf %46, %50 : vector<8x8xf32>
    %52 = arith.truncf %51 : vector<8x8xf32> to vector<8x8xbf16>
    %53 = vector.extract_strided_slice %4 {offsets = [0, 8], sizes = [8, 8], strides = [1, 1]} : vector<8x32xbf16> to vector<8x8xbf16>
    %cst_16 = arith.constant dense<0.000000e+00> : vector<8x8xf32>
    %54 = tpu.matmul %52, %53, %cst_16 {dimension_numbers = #tpu.dot_dimension_numbers<[1], [0], [0], [1], [0, 0, 1, 1], [], []>} : vector<8x8xbf16>, vector<8x8xbf16>, vector<8x8xf32> -> vector<8x8xf32>
    %55 = vector.extract_strided_slice %2 {offsets = [0, 16], sizes = [8, 8], strides = [1, 1]} : vector<8x32xbf16> to vector<8x8xbf16>
    %56 = vector.extract_strided_slice %3 {offsets = [0, 16], sizes = [8, 8], strides = [1, 1]} : vector<8x32xbf16> to vector<8x8xbf16>
    %cst_17 = arith.constant dense<0.000000e+00> : vector<8x8xf32>
    %57 = tpu.matmul %55, %56, %cst_17 {dimension_numbers = #tpu.dot_dimension_numbers<[1], [1], [0], [0], [0, 0, 1, 0], [], []>} : vector<8x8xbf16>, vector<8x8xbf16>, vector<8x8xf32> -> vector<8x8xf32>
    %cst_18 = arith.constant 0.353553385 : f32
    %58 = vector.broadcast %cst_18 : f32 to vector<8x8xf32>
    %59 = arith.mulf %57, %58 : vector<8x8xf32>
    %cst_19 = arith.constant -1.000000e+09 : f32
    %60 = vector.broadcast %cst_19 : f32 to vector<8x8xf32>
    %61 = arith.select %14, %59, %60 : vector<8x8xi1>, vector<8x8xf32>
    %cst_20 = arith.constant dense<0xFF800000> : vector<8xf32>
    %62 = vector.multi_reduction <maximumf>, %61, %cst_20 [1] : vector<8x8xf32> to vector<8xf32>
    %63 = vector.shape_cast %62 : vector<8xf32> to vector<8x1xf32>
    %64 = vector.broadcast %63 : vector<8x1xf32> to vector<8x8xf32>
    %65 = arith.subf %61, %64 : vector<8x8xf32>
    %66 = math.exp %65 : vector<8x8xf32>
    %cst_21 = arith.constant dense<0.000000e+00> : vector<8xf32>
    %67 = vector.multi_reduction <add>, %66, %cst_21 [1] : vector<8x8xf32> to vector<8xf32>
    %68 = vector.shape_cast %67 : vector<8xf32> to vector<8x1xf32>
    %69 = tpu.reciprocal %68 {approx = true} : vector<8x1xf32> -> vector<8x1xf32>
    %70 = vector.broadcast %69 : vector<8x1xf32> to vector<8x8xf32>
    %71 = arith.mulf %66, %70 : vector<8x8xf32>
    %72 = arith.truncf %71 : vector<8x8xf32> to vector<8x8xbf16>
    %73 = vector.extract_strided_slice %4 {offsets = [0, 16], sizes = [8, 8], strides = [1, 1]} : vector<8x32xbf16> to vector<8x8xbf16>
    %cst_22 = arith.constant dense<0.000000e+00> : vector<8x8xf32>
    %74 = tpu.matmul %72, %73, %cst_22 {dimension_numbers = #tpu.dot_dimension_numbers<[1], [0], [0], [1], [0, 0, 1, 1], [], []>} : vector<8x8xbf16>, vector<8x8xbf16>, vector<8x8xf32> -> vector<8x8xf32>
    %75 = vector.extract_strided_slice %2 {offsets = [0, 24], sizes = [8, 8], strides = [1, 1]} : vector<8x32xbf16> to vector<8x8xbf16>
    %76 = vector.extract_strided_slice %3 {offsets = [0, 24], sizes = [8, 8], strides = [1, 1]} : vector<8x32xbf16> to vector<8x8xbf16>
    %cst_23 = arith.constant dense<0.000000e+00> : vector<8x8xf32>
    %77 = tpu.matmul %75, %76, %cst_23 {dimension_numbers = #tpu.dot_dimension_numbers<[1], [1], [0], [0], [0, 0, 1, 0], [], []>} : vector<8x8xbf16>, vector<8x8xbf16>, vector<8x8xf32> -> vector<8x8xf32>
    %cst_24 = arith.constant 0.353553385 : f32
    %78 = vector.broadcast %cst_24 : f32 to vector<8x8xf32>
    %79 = arith.mulf %77, %78 : vector<8x8xf32>
    %cst_25 = arith.constant -1.000000e+09 : f32
    %80 = vector.broadcast %cst_25 : f32 to vector<8x8xf32>
    %81 = arith.select %14, %79, %80 : vector<8x8xi1>, vector<8x8xf32>
    %cst_26 = arith.constant dense<0xFF800000> : vector<8xf32>
    %82 = vector.multi_reduction <maximumf>, %81, %cst_26 [1] : vector<8x8xf32> to vector<8xf32>
    %83 = vector.shape_cast %82 : vector<8xf32> to vector<8x1xf32>
    %84 = vector.broadcast %83 : vector<8x1xf32> to vector<8x8xf32>
    %85 = arith.subf %81, %84 : vector<8x8xf32>
    %86 = math.exp %85 : vector<8x8xf32>
    %cst_27 = arith.constant dense<0.000000e+00> : vector<8xf32>
    %87 = vector.multi_reduction <add>, %86, %cst_27 [1] : vector<8x8xf32> to vector<8xf32>
    %88 = vector.shape_cast %87 : vector<8xf32> to vector<8x1xf32>
    %89 = tpu.reciprocal %88 {approx = true} : vector<8x1xf32> -> vector<8x1xf32>
    %90 = vector.broadcast %89 : vector<8x1xf32> to vector<8x8xf32>
    %91 = arith.mulf %86, %90 : vector<8x8xf32>
    %92 = arith.truncf %91 : vector<8x8xf32> to vector<8x8xbf16>
    %93 = vector.extract_strided_slice %4 {offsets = [0, 24], sizes = [8, 8], strides = [1, 1]} : vector<8x32xbf16> to vector<8x8xbf16>
    %cst_28 = arith.constant dense<0.000000e+00> : vector<8x8xf32>
    %94 = tpu.matmul %92, %93, %cst_28 {dimension_numbers = #tpu.dot_dimension_numbers<[1], [0], [0], [1], [0, 0, 1, 1], [], []>} : vector<8x8xbf16>, vector<8x8xbf16>, vector<8x8xf32> -> vector<8x8xf32>
    %95 = tpu.concatenate %34, %54, %74, %94 in 1 : vector<8x8xf32>, vector<8x8xf32>, vector<8x8xf32>, vector<8x8xf32> -> vector<8x32xf32>
    %96 = arith.truncf %95 : vector<8x32xf32> to vector<8x32xbf16>
    %c0_29 = arith.constant 0 : index
    %c0_30 = arith.constant 0 : index
    %c0_31 = arith.constant 0 : index
    %97 = vector.load %arg3[%c0_29, %c0_30, %c0_31] : memref<1x8x32xbf16, #tpu.memory_space<vmem>>, vector<1x8x32xbf16>
    %98 = vector.shape_cast %97 : vector<1x8x32xbf16> to vector<8x32xbf16>
    %99 = vector.shape_cast %96 : vector<8x32xbf16> to vector<1x8x32xbf16>
    tpu.vector_store %arg3[%c0_29, %c0_30, %c0_31], %99 {strides = array<i32>} : memref<1x8x32xbf16, #tpu.memory_space<vmem>>, vector<1x8x32xbf16>,
    return
  }
  func.func @transform_0(%arg0: i32) -> (i32, i32, i32) {
    %c0_i32 = arith.constant 0 : i32
    %c0_i32_0 = arith.constant 0 : i32
    %c0_i32_1 = arith.constant 0 : i32
    return %arg0, %c0_i32, %c0_i32_0 : i32, i32, i32
  }
  func.func @transform_1(%arg0: i32) -> (i32, i32, i32) {
    %c0_i32 = arith.constant 0 : i32
    %c0_i32_0 = arith.constant 0 : i32
    %c0_i32_1 = arith.constant 0 : i32
    return %arg0, %c0_i32, %c0_i32_0 : i32, i32, i32
  }
  func.func @transform_2(%arg0: i32) -> (i32, i32, i32) {
    %c0_i32 = arith.constant 0 : i32
    %c0_i32_0 = arith.constant 0 : i32
    %c0_i32_1 = arith.constant 0 : i32
    return %arg0, %c0_i32, %c0_i32_0 : i32, i32, i32
  }
}

module attributes {stable_mosaic.version = 11 : i64} {
  func.func @_fused_linear_kernel(%arg0: i32, %arg1: i32, %arg2: i32, %arg3: memref<16x32xbf16, #tpu.memory_space<vmem>>, %arg4: memref<32x32xbf16, #tpu.memory_space<vmem>>, %arg5: memref<1x32xf32, #tpu.memory_space<vmem>>, %arg6: memref<16x32xbf16, #tpu.memory_space<vmem>>, %arg7: memref<16x32xf32, #tpu.memory_space<vmem>>) attributes {dimension_semantics = [#tpu.dimension_semantics<parallel>, #tpu.dimension_semantics<parallel>, #tpu.dimension_semantics<arbitrary>], iteration_bounds = array<i64: 1, 1, 1>, scalar_prefetch = 0 : i64, scratch_operands = 1 : i64, tpu.core_type = #tpu.core_type<tc>, window_params = [{transform_indices = @transform_0, window_bounds = array<i64: 16, 32>}, {transform_indices = @transform_1, window_bounds = array<i64: 32, 32>}, {pipeline_mode = #tpu.pipeline_mode<synchronous>, transform_indices = @transform_2, window_bounds = array<i64: 1, 32>}, {transform_indices = @transform_3, window_bounds = array<i64: 16, 32>}]} {
    %c0_i32 = arith.constant 0 : i32
    %0 = arith.cmpi eq, %arg2, %c0_i32 : i32
    %1 = arith.extui %0 : i1 to i32
    %c0_i32_0 = arith.constant 0 : i32
    %2 = arith.cmpi ne, %1, %c0_i32_0 : i32
    scf.if %2 {
      %cst_15 = arith.constant 0.000000e+00 : f32
      %27 = vector.broadcast %cst_15 : f32 to vector<16x32xf32>
      %c0_16 = arith.constant 0 : index
      %c0_17 = arith.constant 0 : index
      %28 = vector.load %arg7[%c0_16, %c0_17] : memref<16x32xf32, #tpu.memory_space<vmem>>, vector<16x32xf32>
      tpu.vector_store %arg7[%c0_16, %c0_17], %27 {strides = array<i32>} : memref<16x32xf32, #tpu.memory_space<vmem>>, vector<16x32xf32>,
    } else {
    }
    %c0 = arith.constant 0 : index
    %c0_1 = arith.constant 0 : index
    %3 = vector.load %arg3[%c0, %c0_1] : memref<16x32xbf16, #tpu.memory_space<vmem>>, vector<16x32xbf16>
    %4 = arith.extf %3 : vector<16x32xbf16> to vector<16x32xf32>
    %5 = arith.mulf %4, %4 : vector<16x32xf32>
    %cst = arith.constant dense<0.000000e+00> : vector<16xf32>
    %6 = vector.multi_reduction <add>, %5, %cst [1] : vector<16x32xf32> to vector<16xf32>
    %7 = vector.shape_cast %6 : vector<16xf32> to vector<16x1xf32>
    %cst_2 = arith.constant 3.200000e+01 : f32
    %8 = vector.broadcast %cst_2 : f32 to vector<16x1xf32>
    %9 = arith.divf %7, %8 : vector<16x1xf32>
    %cst_3 = arith.constant 9.99999997E-7 : f32
    %10 = vector.broadcast %cst_3 : f32 to vector<16x1xf32>
    %11 = arith.addf %9, %10 : vector<16x1xf32>
    %12 = math.rsqrt %11 : vector<16x1xf32>
    %13 = vector.broadcast %12 : vector<16x1xf32> to vector<16x32xf32>
    %14 = arith.mulf %4, %13 : vector<16x32xf32>
    %c0_4 = arith.constant 0 : index
    %c0_5 = arith.constant 0 : index
    %15 = vector.load %arg5[%c0_4, %c0_5] : memref<1x32xf32, #tpu.memory_space<vmem>>, vector<1x32xf32>
    %16 = vector.broadcast %15 : vector<1x32xf32> to vector<16x32xf32>
    %17 = arith.mulf %14, %16 : vector<16x32xf32>
    %18 = arith.truncf %17 : vector<16x32xf32> to vector<16x32xbf16>
    %c0_6 = arith.constant 0 : index
    %c0_7 = arith.constant 0 : index
    %19 = vector.load %arg4[%c0_6, %c0_7] : memref<32x32xbf16, #tpu.memory_space<vmem>>, vector<32x32xbf16>
    %c0_8 = arith.constant 0 : index
    %c0_9 = arith.constant 0 : index
    %20 = vector.load %arg7[%c0_8, %c0_9] : memref<16x32xf32, #tpu.memory_space<vmem>>, vector<16x32xf32>
    %cst_10 = arith.constant dense<0.000000e+00> : vector<16x32xf32>
    %21 = tpu.matmul %18, %19, %cst_10 {dimension_numbers = #tpu.dot_dimension_numbers<[1], [0], [0], [1], [0, 0, 1, 1], [], []>} : vector<16x32xbf16>, vector<32x32xbf16>, vector<16x32xf32> -> vector<16x32xf32>
    %22 = arith.addf %20, %21 : vector<16x32xf32>
    %c0_11 = arith.constant 0 : index
    %c0_12 = arith.constant 0 : index
    %23 = vector.load %arg7[%c0_11, %c0_12] : memref<16x32xf32, #tpu.memory_space<vmem>>, vector<16x32xf32>
    tpu.vector_store %arg7[%c0_11, %c0_12], %22 {strides = array<i32>} : memref<16x32xf32, #tpu.memory_space<vmem>>, vector<16x32xf32>,
    %c0_i32_13 = arith.constant 0 : i32
    %24 = arith.cmpi eq, %arg2, %c0_i32_13 : i32
    %25 = arith.extui %24 : i1 to i32
    %c0_i32_14 = arith.constant 0 : i32
    %26 = arith.cmpi ne, %25, %c0_i32_14 : i32
    scf.if %26 {
      %c0_15 = arith.constant 0 : index
      %c0_16 = arith.constant 0 : index
      %27 = vector.load %arg7[%c0_15, %c0_16] : memref<16x32xf32, #tpu.memory_space<vmem>>, vector<16x32xf32>
      %28 = arith.truncf %27 : vector<16x32xf32> to vector<16x32xbf16>
      %c0_17 = arith.constant 0 : index
      %c0_18 = arith.constant 0 : index
      %29 = vector.load %arg6[%c0_17, %c0_18] : memref<16x32xbf16, #tpu.memory_space<vmem>>, vector<16x32xbf16>
      tpu.vector_store %arg6[%c0_17, %c0_18], %28 {strides = array<i32>} : memref<16x32xbf16, #tpu.memory_space<vmem>>, vector<16x32xbf16>,
    } else {
    }
    return
  }
  func.func @transform_0(%arg0: i32, %arg1: i32, %arg2: i32) -> (i32, i32) {
    %c0_i32 = arith.constant 0 : i32
    return %arg0, %arg2 : i32, i32
  }
  func.func @transform_1(%arg0: i32, %arg1: i32, %arg2: i32) -> (i32, i32) {
    %c0_i32 = arith.constant 0 : i32
    return %arg2, %arg1 : i32, i32
  }
  func.func @transform_2(%arg0: i32, %arg1: i32, %arg2: i32) -> (i32, i32) {
    %c0_i32 = arith.constant 0 : i32
    %c0_i32_0 = arith.constant 0 : i32
    %c0_i32_1 = arith.constant 0 : i32
    return %c0_i32, %c0_i32_0 : i32, i32
  }
  func.func @transform_3(%arg0: i32, %arg1: i32, %arg2: i32) -> (i32, i32) {
    %c0_i32 = arith.constant 0 : i32
    return %arg0, %arg1 : i32, i32
  }
}

module attributes {stable_mosaic.version = 11 : i64} {
  func.func @_fused_linear_kernel(%arg0: i32, %arg1: i32, %arg2: i32, %arg3: memref<16x32xbf16, #tpu.memory_space<vmem>>, %arg4: memref<64x32xbf16, #tpu.memory_space<vmem>>, %arg5: memref<1x32xf32, #tpu.memory_space<vmem>>, %arg6: memref<16x64xf32, #tpu.memory_space<vmem>>, %arg7: memref<16x64xf32, #tpu.memory_space<vmem>>) attributes {dimension_semantics = [#tpu.dimension_semantics<parallel>, #tpu.dimension_semantics<parallel>, #tpu.dimension_semantics<arbitrary>], iteration_bounds = array<i64: 1, 1, 1>, scalar_prefetch = 0 : i64, scratch_operands = 1 : i64, tpu.core_type = #tpu.core_type<tc>, window_params = [{transform_indices = @transform_0, window_bounds = array<i64: 16, 32>}, {transform_indices = @transform_1, window_bounds = array<i64: 64, 32>}, {pipeline_mode = #tpu.pipeline_mode<synchronous>, transform_indices = @transform_2, window_bounds = array<i64: 1, 32>}, {transform_indices = @transform_3, window_bounds = array<i64: 16, 64>}]} {
    %c0_i32 = arith.constant 0 : i32
    %0 = arith.cmpi eq, %arg2, %c0_i32 : i32
    %1 = arith.extui %0 : i1 to i32
    %c0_i32_0 = arith.constant 0 : i32
    %2 = arith.cmpi ne, %1, %c0_i32_0 : i32
    scf.if %2 {
      %cst_15 = arith.constant 0.000000e+00 : f32
      %27 = vector.broadcast %cst_15 : f32 to vector<16x64xf32>
      %c0_16 = arith.constant 0 : index
      %c0_17 = arith.constant 0 : index
      %28 = vector.load %arg7[%c0_16, %c0_17] : memref<16x64xf32, #tpu.memory_space<vmem>>, vector<16x64xf32>
      tpu.vector_store %arg7[%c0_16, %c0_17], %27 {strides = array<i32>} : memref<16x64xf32, #tpu.memory_space<vmem>>, vector<16x64xf32>,
    } else {
    }
    %c0 = arith.constant 0 : index
    %c0_1 = arith.constant 0 : index
    %3 = vector.load %arg3[%c0, %c0_1] : memref<16x32xbf16, #tpu.memory_space<vmem>>, vector<16x32xbf16>
    %4 = arith.extf %3 : vector<16x32xbf16> to vector<16x32xf32>
    %5 = arith.mulf %4, %4 : vector<16x32xf32>
    %cst = arith.constant dense<0.000000e+00> : vector<16xf32>
    %6 = vector.multi_reduction <add>, %5, %cst [1] : vector<16x32xf32> to vector<16xf32>
    %7 = vector.shape_cast %6 : vector<16xf32> to vector<16x1xf32>
    %cst_2 = arith.constant 3.200000e+01 : f32
    %8 = vector.broadcast %cst_2 : f32 to vector<16x1xf32>
    %9 = arith.divf %7, %8 : vector<16x1xf32>
    %cst_3 = arith.constant 9.99999997E-7 : f32
    %10 = vector.broadcast %cst_3 : f32 to vector<16x1xf32>
    %11 = arith.addf %9, %10 : vector<16x1xf32>
    %12 = math.rsqrt %11 : vector<16x1xf32>
    %13 = vector.broadcast %12 : vector<16x1xf32> to vector<16x32xf32>
    %14 = arith.mulf %4, %13 : vector<16x32xf32>
    %c0_4 = arith.constant 0 : index
    %c0_5 = arith.constant 0 : index
    %15 = vector.load %arg5[%c0_4, %c0_5] : memref<1x32xf32, #tpu.memory_space<vmem>>, vector<1x32xf32>
    %16 = vector.broadcast %15 : vector<1x32xf32> to vector<16x32xf32>
    %17 = arith.mulf %14, %16 : vector<16x32xf32>
    %18 = arith.truncf %17 : vector<16x32xf32> to vector<16x32xbf16>
    %c0_6 = arith.constant 0 : index
    %c0_7 = arith.constant 0 : index
    %19 = vector.load %arg4[%c0_6, %c0_7] : memref<64x32xbf16, #tpu.memory_space<vmem>>, vector<64x32xbf16>
    %c0_8 = arith.constant 0 : index
    %c0_9 = arith.constant 0 : index
    %20 = vector.load %arg7[%c0_8, %c0_9] : memref<16x64xf32, #tpu.memory_space<vmem>>, vector<16x64xf32>
    %cst_10 = arith.constant dense<0.000000e+00> : vector<16x64xf32>
    %21 = tpu.matmul %18, %19, %cst_10 {dimension_numbers = #tpu.dot_dimension_numbers<[1], [1], [0], [0], [0, 0, 1, 0], [], []>} : vector<16x32xbf16>, vector<64x32xbf16>, vector<16x64xf32> -> vector<16x64xf32>
    %22 = arith.addf %20, %21 : vector<16x64xf32>
    %c0_11 = arith.constant 0 : index
    %c0_12 = arith.constant 0 : index
    %23 = vector.load %arg7[%c0_11, %c0_12] : memref<16x64xf32, #tpu.memory_space<vmem>>, vector<16x64xf32>
    tpu.vector_store %arg7[%c0_11, %c0_12], %22 {strides = array<i32>} : memref<16x64xf32, #tpu.memory_space<vmem>>, vector<16x64xf32>,
    %c0_i32_13 = arith.constant 0 : i32
    %24 = arith.cmpi eq, %arg2, %c0_i32_13 : i32
    %25 = arith.extui %24 : i1 to i32
    %c0_i32_14 = arith.constant 0 : i32
    %26 = arith.cmpi ne, %25, %c0_i32_14 : i32
    scf.if %26 {
      %c0_15 = arith.constant 0 : index
      %c0_16 = arith.constant 0 : index
      %27 = vector.load %arg7[%c0_15, %c0_16] : memref<16x64xf32, #tpu.memory_space<vmem>>, vector<16x64xf32>
      %c0_17 = arith.constant 0 : index
      %c0_18 = arith.constant 0 : index
      %28 = vector.load %arg6[%c0_17, %c0_18] : memref<16x64xf32, #tpu.memory_space<vmem>>, vector<16x64xf32>
      tpu.vector_store %arg6[%c0_17, %c0_18], %27 {strides = array<i32>} : memref<16x64xf32, #tpu.memory_space<vmem>>, vector<16x64xf32>,
    } else {
    }
    return
  }
  func.func @transform_0(%arg0: i32, %arg1: i32, %arg2: i32) -> (i32, i32) {
    %c0_i32 = arith.constant 0 : i32
    return %arg0, %arg2 : i32, i32
  }
  func.func @transform_1(%arg0: i32, %arg1: i32, %arg2: i32) -> (i32, i32) {
    %c0_i32 = arith.constant 0 : i32
    return %arg1, %arg2 : i32, i32
  }
  func.func @transform_2(%arg0: i32, %arg1: i32, %arg2: i32) -> (i32, i32) {
    %c0_i32 = arith.constant 0 : i32
    %c0_i32_0 = arith.constant 0 : i32
    %c0_i32_1 = arith.constant 0 : i32
    return %c0_i32, %c0_i32_0 : i32, i32
  }
  func.func @transform_3(%arg0: i32, %arg1: i32, %arg2: i32) -> (i32, i32) {
    %c0_i32 = arith.constant 0 : i32
    return %arg0, %arg1 : i32, i32
  }
}

module attributes {stable_mosaic.version = 11 : i64} {
  func.func @_cross_attn_kernel(%arg0: i32, %arg1: memref<1x8x32xbf16, #tpu.memory_space<vmem>>, %arg2: memref<1x8x64xbf16, #tpu.memory_space<vmem>>, %arg3: memref<1x1x8xf32, #tpu.memory_space<vmem>>, %arg4: memref<1x8x32xbf16, #tpu.memory_space<vmem>>) attributes {dimension_semantics = [#tpu.dimension_semantics<parallel>], iteration_bounds = array<i64: 2>, scalar_prefetch = 0 : i64, scratch_operands = 0 : i64, tpu.core_type = #tpu.core_type<tc>, window_params = [{transform_indices = @transform_0, window_bounds = array<i64: 1, 8, 32>}, {transform_indices = @transform_1, window_bounds = array<i64: 1, 8, 64>}, {transform_indices = @transform_2, window_bounds = array<i64: 1, 1, 8>}, {transform_indices = @transform_3, window_bounds = array<i64: 1, 8, 32>}]} {
    %c0 = arith.constant 0 : index
    %c0_0 = arith.constant 0 : index
    %c0_1 = arith.constant 0 : index
    %0 = vector.load %arg1[%c0, %c0_0, %c0_1] : memref<1x8x32xbf16, #tpu.memory_space<vmem>>, vector<1x8x32xbf16>
    %1 = vector.shape_cast %0 : vector<1x8x32xbf16> to vector<8x32xbf16>
    %c0_2 = arith.constant 0 : index
    %c0_3 = arith.constant 0 : index
    %c0_4 = arith.constant 0 : index
    %2 = vector.load %arg2[%c0_2, %c0_3, %c0_4] : memref<1x8x64xbf16, #tpu.memory_space<vmem>>, vector<1x8x64xbf16>
    %3 = vector.shape_cast %2 : vector<1x8x64xbf16> to vector<8x64xbf16>
    %4 = vector.extract_strided_slice %3 {offsets = [0, 0], sizes = [8, 32], strides = [1, 1]} : vector<8x64xbf16> to vector<8x32xbf16>
    %5 = vector.extract_strided_slice %3 {offsets = [0, 32], sizes = [8, 32], strides = [1, 1]} : vector<8x64xbf16> to vector<8x32xbf16>
    %c0_5 = arith.constant 0 : index
    %c0_6 = arith.constant 0 : index
    %c0_7 = arith.constant 0 : index
    %6 = vector.load %arg3[%c0_5, %c0_6, %c0_7] : memref<1x1x8xf32, #tpu.memory_space<vmem>>, vector<1x1x8xf32>
    %7 = vector.shape_cast %6 : vector<1x1x8xf32> to vector<1x8xf32>
    %cst = arith.constant 0.000000e+00 : f32
    %8 = vector.broadcast %cst : f32 to vector<1x8xf32>
    %9 = arith.cmpf ogt, %7, %8 : vector<1x8xf32>
    %10 = vector.shape_cast %9 : vector<1x8xi1> to vector<1x8xi1>
    %11 = vector.broadcast %10 : vector<1x8xi1> to vector<8x8xi1>
    %12 = vector.extract_strided_slice %1 {offsets = [0, 0], sizes = [8, 8], strides = [1, 1]} : vector<8x32xbf16> to vector<8x8xbf16>
    %13 = vector.extract_strided_slice %4 {offsets = [0, 0], sizes = [8, 8], strides = [1, 1]} : vector<8x32xbf16> to vector<8x8xbf16>
    %cst_8 = arith.constant dense<0.000000e+00> : vector<8x8xf32>
    %14 = tpu.matmul %12, %13, %cst_8 {dimension_numbers = #tpu.dot_dimension_numbers<[1], [1], [0], [0], [0, 0, 1, 0], [], []>} : vector<8x8xbf16>, vector<8x8xbf16>, vector<8x8xf32> -> vector<8x8xf32>
    %cst_9 = arith.constant 0.353553385 : f32
    %15 = vector.broadcast %cst_9 : f32 to vector<8x8xf32>
    %16 = arith.mulf %14, %15 : vector<8x8xf32>
    %cst_10 = arith.constant -1.000000e+09 : f32
    %17 = vector.broadcast %cst_10 : f32 to vector<8x8xf32>
    %18 = arith.select %11, %16, %17 : vector<8x8xi1>, vector<8x8xf32>
    %cst_11 = arith.constant dense<0xFF800000> : vector<8xf32>
    %19 = vector.multi_reduction <maximumf>, %18, %cst_11 [1] : vector<8x8xf32> to vector<8xf32>
    %20 = vector.shape_cast %19 : vector<8xf32> to vector<8x1xf32>
    %21 = vector.broadcast %20 : vector<8x1xf32> to vector<8x8xf32>
    %22 = arith.subf %18, %21 : vector<8x8xf32>
    %23 = math.exp %22 : vector<8x8xf32>
    %cst_12 = arith.constant dense<0.000000e+00> : vector<8xf32>
    %24 = vector.multi_reduction <add>, %23, %cst_12 [1] : vector<8x8xf32> to vector<8xf32>
    %25 = vector.shape_cast %24 : vector<8xf32> to vector<8x1xf32>
    %26 = tpu.reciprocal %25 {approx = true} : vector<8x1xf32> -> vector<8x1xf32>
    %27 = vector.broadcast %26 : vector<8x1xf32> to vector<8x8xf32>
    %28 = arith.mulf %23, %27 : vector<8x8xf32>
    %29 = arith.truncf %28 : vector<8x8xf32> to vector<8x8xbf16>
    %30 = vector.extract_strided_slice %5 {offsets = [0, 0], sizes = [8, 8], strides = [1, 1]} : vector<8x32xbf16> to vector<8x8xbf16>
    %cst_13 = arith.constant dense<0.000000e+00> : vector<8x8xf32>
    %31 = tpu.matmul %29, %30, %cst_13 {dimension_numbers = #tpu.dot_dimension_numbers<[1], [0], [0], [1], [0, 0, 1, 1], [], []>} : vector<8x8xbf16>, vector<8x8xbf16>, vector<8x8xf32> -> vector<8x8xf32>
    %32 = vector.extract_strided_slice %1 {offsets = [0, 8], sizes = [8, 8], strides = [1, 1]} : vector<8x32xbf16> to vector<8x8xbf16>
    %33 = vector.extract_strided_slice %4 {offsets = [0, 8], sizes = [8, 8], strides = [1, 1]} : vector<8x32xbf16> to vector<8x8xbf16>
    %cst_14 = arith.constant dense<0.000000e+00> : vector<8x8xf32>
    %34 = tpu.matmul %32, %33, %cst_14 {dimension_numbers = #tpu.dot_dimension_numbers<[1], [1], [0], [0], [0, 0, 1, 0], [], []>} : vector<8x8xbf16>, vector<8x8xbf16>, vector<8x8xf32> -> vector<8x8xf32>
    %cst_15 = arith.constant 0.353553385 : f32
    %35 = vector.broadcast %cst_15 : f32 to vector<8x8xf32>
    %36 = arith.mulf %34, %35 : vector<8x8xf32>
    %cst_16 = arith.constant -1.000000e+09 : f32
    %37 = vector.broadcast %cst_16 : f32 to vector<8x8xf32>
    %38 = arith.select %11, %36, %37 : vector<8x8xi1>, vector<8x8xf32>
    %cst_17 = arith.constant dense<0xFF800000> : vector<8xf32>
    %39 = vector.multi_reduction <maximumf>, %38, %cst_17 [1] : vector<8x8xf32> to vector<8xf32>
    %40 = vector.shape_cast %39 : vector<8xf32> to vector<8x1xf32>
    %41 = vector.broadcast %40 : vector<8x1xf32> to vector<8x8xf32>
    %42 = arith.subf %38, %41 : vector<8x8xf32>
    %43 = math.exp %42 : vector<8x8xf32>
    %cst_18 = arith.constant dense<0.000000e+00> : vector<8xf32>
    %44 = vector.multi_reduction <add>, %43, %cst_18 [1] : vector<8x8xf32> to vector<8xf32>
    %45 = vector.shape_cast %44 : vector<8xf32> to vector<8x1xf32>
    %46 = tpu.reciprocal %45 {approx = true} : vector<8x1xf32> -> vector<8x1xf32>
    %47 = vector.broadcast %46 : vector<8x1xf32> to vector<8x8xf32>
    %48 = arith.mulf %43, %47 : vector<8x8xf32>
    %49 = arith.truncf %48 : vector<8x8xf32> to vector<8x8xbf16>
    %50 = vector.extract_strided_slice %5 {offsets = [0, 8], sizes = [8, 8], strides = [1, 1]} : vector<8x32xbf16> to vector<8x8xbf16>
    %cst_19 = arith.constant dense<0.000000e+00> : vector<8x8xf32>
    %51 = tpu.matmul %49, %50, %cst_19 {dimension_numbers = #tpu.dot_dimension_numbers<[1], [0], [0], [1], [0, 0, 1, 1], [], []>} : vector<8x8xbf16>, vector<8x8xbf16>, vector<8x8xf32> -> vector<8x8xf32>
    %52 = vector.extract_strided_slice %1 {offsets = [0, 16], sizes = [8, 8], strides = [1, 1]} : vector<8x32xbf16> to vector<8x8xbf16>
    %53 = vector.extract_strided_slice %4 {offsets = [0, 16], sizes = [8, 8], strides = [1, 1]} : vector<8x32xbf16> to vector<8x8xbf16>
    %cst_20 = arith.constant dense<0.000000e+00> : vector<8x8xf32>
    %54 = tpu.matmul %52, %53, %cst_20 {dimension_numbers = #tpu.dot_dimension_numbers<[1], [1], [0], [0], [0, 0, 1, 0], [], []>} : vector<8x8xbf16>, vector<8x8xbf16>, vector<8x8xf32> -> vector<8x8xf32>
    %cst_21 = arith.constant 0.353553385 : f32
    %55 = vector.broadcast %cst_21 : f32 to vector<8x8xf32>
    %56 = arith.mulf %54, %55 : vector<8x8xf32>
    %cst_22 = arith.constant -1.000000e+09 : f32
    %57 = vector.broadcast %cst_22 : f32 to vector<8x8xf32>
    %58 = arith.select %11, %56, %57 : vector<8x8xi1>, vector<8x8xf32>
    %cst_23 = arith.constant dense<0xFF800000> : vector<8xf32>
    %59 = vector.multi_reduction <maximumf>, %58, %cst_23 [1] : vector<8x8xf32> to vector<8xf32>
    %60 = vector.shape_cast %59 : vector<8xf32> to vector<8x1xf32>
    %61 = vector.broadcast %60 : vector<8x1xf32> to vector<8x8xf32>
    %62 = arith.subf %58, %61 : vector<8x8xf32>
    %63 = math.exp %62 : vector<8x8xf32>
    %cst_24 = arith.constant dense<0.000000e+00> : vector<8xf32>
    %64 = vector.multi_reduction <add>, %63, %cst_24 [1] : vector<8x8xf32> to vector<8xf32>
    %65 = vector.shape_cast %64 : vector<8xf32> to vector<8x1xf32>
    %66 = tpu.reciprocal %65 {approx = true} : vector<8x1xf32> -> vector<8x1xf32>
    %67 = vector.broadcast %66 : vector<8x1xf32> to vector<8x8xf32>
    %68 = arith.mulf %63, %67 : vector<8x8xf32>
    %69 = arith.truncf %68 : vector<8x8xf32> to vector<8x8xbf16>
    %70 = vector.extract_strided_slice %5 {offsets = [0, 16], sizes = [8, 8], strides = [1, 1]} : vector<8x32xbf16> to vector<8x8xbf16>
    %cst_25 = arith.constant dense<0.000000e+00> : vector<8x8xf32>
    %71 = tpu.matmul %69, %70, %cst_25 {dimension_numbers = #tpu.dot_dimension_numbers<[1], [0], [0], [1], [0, 0, 1, 1], [], []>} : vector<8x8xbf16>, vector<8x8xbf16>, vector<8x8xf32> -> vector<8x8xf32>
    %72 = vector.extract_strided_slice %1 {offsets = [0, 24], sizes = [8, 8], strides = [1, 1]} : vector<8x32xbf16> to vector<8x8xbf16>
    %73 = vector.extract_strided_slice %4 {offsets = [0, 24], sizes = [8, 8], strides = [1, 1]} : vector<8x32xbf16> to vector<8x8xbf16>
    %cst_26 = arith.constant dense<0.000000e+00> : vector<8x8xf32>
    %74 = tpu.matmul %72, %73, %cst_26 {dimension_numbers = #tpu.dot_dimension_numbers<[1], [1], [0], [0], [0, 0, 1, 0], [], []>} : vector<8x8xbf16>, vector<8x8xbf16>, vector<8x8xf32> -> vector<8x8xf32>
    %cst_27 = arith.constant 0.353553385 : f32
    %75 = vector.broadcast %cst_27 : f32 to vector<8x8xf32>
    %76 = arith.mulf %74, %75 : vector<8x8xf32>
    %cst_28 = arith.constant -1.000000e+09 : f32
    %77 = vector.broadcast %cst_28 : f32 to vector<8x8xf32>
    %78 = arith.select %11, %76, %77 : vector<8x8xi1>, vector<8x8xf32>
    %cst_29 = arith.constant dense<0xFF800000> : vector<8xf32>
    %79 = vector.multi_reduction <maximumf>, %78, %cst_29 [1] : vector<8x8xf32> to vector<8xf32>
    %80 = vector.shape_cast %79 : vector<8xf32> to vector<8x1xf32>
    %81 = vector.broadcast %80 : vector<8x1xf32> to vector<8x8xf32>
    %82 = arith.subf %78, %81 : vector<8x8xf32>
    %83 = math.exp %82 : vector<8x8xf32>
    %cst_30 = arith.constant dense<0.000000e+00> : vector<8xf32>
    %84 = vector.multi_reduction <add>, %83, %cst_30 [1] : vector<8x8xf32> to vector<8xf32>
    %85 = vector.shape_cast %84 : vector<8xf32> to vector<8x1xf32>
    %86 = tpu.reciprocal %85 {approx = true} : vector<8x1xf32> -> vector<8x1xf32>
    %87 = vector.broadcast %86 : vector<8x1xf32> to vector<8x8xf32>
    %88 = arith.mulf %83, %87 : vector<8x8xf32>
    %89 = arith.truncf %88 : vector<8x8xf32> to vector<8x8xbf16>
    %90 = vector.extract_strided_slice %5 {offsets = [0, 24], sizes = [8, 8], strides = [1, 1]} : vector<8x32xbf16> to vector<8x8xbf16>
    %cst_31 = arith.constant dense<0.000000e+00> : vector<8x8xf32>
    %91 = tpu.matmul %89, %90, %cst_31 {dimension_numbers = #tpu.dot_dimension_numbers<[1], [0], [0], [1], [0, 0, 1, 1], [], []>} : vector<8x8xbf16>, vector<8x8xbf16>, vector<8x8xf32> -> vector<8x8xf32>
    %92 = tpu.concatenate %31, %51, %71, %91 in 1 : vector<8x8xf32>, vector<8x8xf32>, vector<8x8xf32>, vector<8x8xf32> -> vector<8x32xf32>
    %93 = arith.truncf %92 : vector<8x32xf32> to vector<8x32xbf16>
    %c0_32 = arith.constant 0 : index
    %c0_33 = arith.constant 0 : index
    %c0_34 = arith.constant 0 : index
    %94 = vector.load %arg4[%c0_32, %c0_33, %c0_34] : memref<1x8x32xbf16, #tpu.memory_space<vmem>>, vector<1x8x32xbf16>
    %95 = vector.shape_cast %94 : vector<1x8x32xbf16> to vector<8x32xbf16>
    %96 = vector.shape_cast %93 : vector<8x32xbf16> to vector<1x8x32xbf16>
    tpu.vector_store %arg4[%c0_32, %c0_33, %c0_34], %96 {strides = array<i32>} : memref<1x8x32xbf16, #tpu.memory_space<vmem>>, vector<1x8x32xbf16>,
    return
  }
  func.func @transform_0(%arg0: i32) -> (i32, i32, i32) {
    %c0_i32 = arith.constant 0 : i32
    %c0_i32_0 = arith.constant 0 : i32
    %c0_i32_1 = arith.constant 0 : i32
    return %arg0, %c0_i32, %c0_i32_0 : i32, i32, i32
  }
  func.func @transform_1(%arg0: i32) -> (i32, i32, i32) {
    %c0_i32 = arith.constant 0 : i32
    %c0_i32_0 = arith.constant 0 : i32
    %c0_i32_1 = arith.constant 0 : i32
    return %arg0, %c0_i32, %c0_i32_0 : i32, i32, i32
  }
  func.func @transform_2(%arg0: i32) -> (i32, i32, i32) {
    %c0_i32 = arith.constant 0 : i32
    %c0_i32_0 = arith.constant 0 : i32
    %c0_i32_1 = arith.constant 0 : i32
    return %arg0, %c0_i32, %c0_i32_0 : i32, i32, i32
  }
  func.func @transform_3(%arg0: i32) -> (i32, i32, i32) {
    %c0_i32 = arith.constant 0 : i32
    %c0_i32_0 = arith.constant 0 : i32
    %c0_i32_1 = arith.constant 0 : i32
    return %arg0, %c0_i32, %c0_i32_0 : i32, i32, i32
  }
}

</mosaic_0001>

<bundles_post_ra>
// kernel: _lambda_.32
= control target key start
LH: loop header
LB: loop body
LE: loop exit
PB: predicated region body
PF: predicated region fallthrough
CT: control target
= control target key end

     0   :  { %vm19_vm0 = vcmask 261120   ;;  %v150_v0 = vmov 0.0   ;;  %vm151_vm1 = vmmov 0   ;;  %vm115_vm2 = vcmask 257024   ;;  %s195_s1 = inlined_call_operand.vmem [shape: bf16[32,32], index: 1, kind: input, shape index: {}]   ;;  %s196_s0 = inlined_call_operand.vmem [shape: bf16[16,32], index: 0, kind: input, shape index: {}]   ;;  %s197_s2 = inlined_call_operand.vmem [shape: bf16[16,32], index: 2, kind: input, shape index: {}]   ;;  %s198_s3 = inlined_call_operand.vmem [shape: bf16[16,32], index: 3, kind: output, shape index: {}]  }
   0x1   :  { %137 = vmatprep.subr.bf16.mxu0 %v150_v0  ;;  %v147_v1 = vld [vmem:[%s195_s1] sm:$0xff]   ;;  %141 = vmatprep.mubr.msk.bf16.mxu0 %vm151_vm1, %v150_v0  ;;  %20 = vst.msk [vmem:[#allocation2] sm:$0xff] %vm19_vm0, %v150_v0  ;;  %21 = vst.msk [vmem:[#allocation2 + $0x8] sm:$0xff] %vm19_vm0, %v150_v0  ;;  %v148_v2 = vld [vmem:[%s195_s1 + $0x8] sm:$0xff]  }
   0x2   :  { %138 = vmatpush3.bf16.msra.mxu0 %v147_v1  ;;  %v149_v3 = vld [vmem:[%s196_s0] sm:$0xff]  }
   0x3   :  { %139 = vmatprep.subr.bf16.mxu0 %v150_v0  ;;  %v131_v12 = vld [vmem:[%s197_s2] sm:$0xff]  }
   0x4   :  { %v132_v13 = vunpack.c.l.bf16 %v131_v12  ;;  %v133_v14 = vunpack.c.h.bf16 %v131_v12 }
   0x6   :  { %140 = vmatpush3.bf16.msra.mxu0 %v148_v2 }
   0x8   :  { %v28_v4 = vld [vmem:[#allocation2] sm:$0xff]  ;;  %v29_v6 = vld [vmem:[#allocation2 + $0x8] sm:$0xff] }
   0x9   :  { %142 = vmatmul.mubr.msk.bf16.vlgmr.msra.gmra.mrb[0].mxu0 %vm19_vm0, %v149_v3 }
  0xdc   :  { %v85_v5 = vpop.f32.mrb[0].mxu0 }
  0xdd   :  { %v92_v7 = vadd.f32 %v85_v5, %v28_v4  ;;  %v143_v8 = vpop.f32.mrb[1].mxu0 }
  0xde   :  { %v88_v9 = vpop.f32.mrb[2].mxu0 }
  0xdf   :  { %94 = vst.msk [vmem:[#allocation2] sm:$0xff] %vm19_vm0, %v92_v7  ;;  %v93_v10 = vadd.f32 %v88_v9, %v29_v6  ;;  %v144_v11 = vpop.f32.mrb[3].mxu0 }
  0xe1   :  { %95 = vst.msk [vmem:[#allocation2 + $0x8] sm:$0xff] %vm19_vm0, %v93_v10 }
  0xe6   :  { %v99_v15 = vld [vmem:[#allocation2] sm:$0xff] }
  0xe7   :  { %v105_v16 = vadd.f32 %v132_v13, %v99_v15 }
  0xe8   :  { %v100_v17 = vld [vmem:[#allocation2 + $0x8] sm:$0xff] }
  0xe9   :  { %v128_v18 = vpack.c.bf16 %v105_v16, %v105_v16  ;;  %v106_v19 = vadd.f32 %v133_v14, %v100_v17 }
  0xeb   :  { %116 = vst.msk [vmem:[%s198_s3] sm:$0xf] %vm115_vm2, %v128_v18  ;;  %v129_v20 = vpack.c.bf16 %v106_v19, %v106_v19 }
  0xed   :  { %117 = vst.msk [vmem:[%s198_s3 + $0x4] sm:$0xf] %vm115_vm2, %v129_v20 }

// kernel: _lambda_.30
= control target key start
LH: loop header
LB: loop body
LE: loop exit
PB: predicated region body
PF: predicated region fallthrough
CT: control target
= control target key end

     0   :  { %vm28_vm0 = vcmask 261120   ;;  %v172_v7 = vmov 0.0   ;;  %vm173_vm1 = vmmov 0   ;;  %vm19_vm2 = vcmask 785408   ;;  %s219_s0 = inlined_call_operand.vmem [shape: bf16[16,32], index: 0, kind: input, shape index: {}]   ;;  %s220_s1 = inlined_call_operand.vmem [shape: bf16[32,96], index: 1, kind: input, shape index: {}]   ;;  %s221_s2 = inlined_call_operand.vmem [shape: f32[1,32], index: 2, kind: input, shape index: {}]   ;;  %s222_s3 = inlined_call_operand.vmem [shape: bf16[16,96], index: 3, kind: output, shape index: {}]  }
   0x1   :  { %v150_v0 = vld [vmem:[%s219_s0] sm:$0xff]   ;;  %156 = vmatprep.subr.bf16.mxu0 %v172_v7  ;;  %160 = vmatprep.mubr.msk.bf16.mxu0 %vm173_vm1, %v172_v7  ;;  %v167_v9 = vld [vmem:[%s220_s1 + $0x8] sm:$0xff]   ;;  %20 = vst.msk [vmem:[#allocation2] sm:$0xff] %vm19_vm2, %v172_v7  ;;  %21 = vst.msk [vmem:[#allocation2 + $0x8] sm:$0xff] %vm19_vm2, %v172_v7  ;;  %vm134_vm3 = vcmask 781312  }
   0x2   :  { %v151_v1 = vunpack.c.l.bf16 %v150_v0  ;;  %v152_v2 = vunpack.c.h.bf16 %v150_v0  ;;  %v166_v8 = vld [vmem:[%s220_s1] sm:$0xff]  }
   0x3   :  { %157 = vmatpush3.bf16.msra.mxu0 %v166_v8  ;;  %v141_v19 = vld [vmem:[%s221_s2] ss:$0 sm:$0xff] }
   0x4   :  { %v26_v3 = vmul.f32 %v151_v1, %v151_v1  ;;  %v27_v4 = vmul.f32 %v152_v2, %v152_v2  ;;  %158 = vmatprep.subr.bf16.mxu0 %v172_v7 }
   0x6   :  { %v29_v5 = vsel %vm28_vm0, %v26_v3, 0.0  ;;  %v32_v6 = vsel %vm28_vm0, %v27_v4, 0.0 }
   0x7   :  { %30 = vadd.xlane.f32.xlu0 %v29_v5  ;;  %159 = vmatpush3.bf16.msra.mxu0 %v167_v9 }
   0x8   :  { %v58_v24 = vld [vmem:[#allocation2] sm:$0xff]  ;;  %v59_v26 = vld [vmem:[#allocation2 + $0x8] sm:$0xff] }
   0xb   :  { %33 = vadd.xlane.f32.xlu0 %v32_v6 }
  0x94   :  { %v31_v10 = vpop.xlane.xlu0 %30 }
  0x95   :  { %v36_v11 = vmul.f32 0.03125, %v31_v10 }
  0x97   :  { %v38_v12 = vadd.f32 1e-06, %v36_v11 }
  0x98   :  { %v34_v13 = vpop.xlane.xlu0 %33 }
  0x99   :  { %168 = vrsqrt.f32 %v38_v12  ;;  %v37_v14 = vmul.f32 0.03125, %v34_v13 }
  0x9b   :  { %v39_v15 = vadd.f32 1e-06, %v37_v14 }
  0x9d   :  { %170 = vrsqrt.f32 %v39_v15 }
  0xa3   :  { %v169_v16 = vpop.eup %168 }
  0xa4   :  { %v42_v17 = vmul.f32 %v169_v16, %v151_v1 }
  0xa6   :  { %v51_v21 = vmul.f32 %v141_v19, %v42_v17 }
  0xa7   :  { %v171_v18 = vpop.eup %170 }
  0xa8   :  { %v43_v20 = vmul.f32 %v171_v18, %v152_v2 }
  0xaa   :  { %v52_v22 = vmul.f32 %v141_v19, %v43_v20 }
  0xac   :  { %v53_v23 = vpack.c.bf16 %v52_v22, %v51_v21 }
  0xae   :  { %161 = vmatmul.mubr.msk.bf16.vlgmr.msra.gmra.mrb[0].mxu0 %vm28_vm0, %v53_v23 }
 0x181   :  { %v109_v25 = vpop.f32.mrb[0].mxu0 }
 0x182   :  { %v116_v27 = vadd.f32 %v109_v25, %v58_v24  ;;  %v162_v28 = vpop.f32.mrb[1].mxu0 }
 0x183   :  { %v112_v29 = vpop.f32.mrb[2].mxu0 }
 0x184   :  { %119 = vst.msk [vmem:[#allocation2] sm:$0xff] %vm19_vm2, %v116_v27  ;;  %v117_v30 = vadd.f32 %v112_v29, %v59_v26  ;;  %v163_v31 = vpop.f32.mrb[3].mxu0 }
 0x186   :  { %120 = vst.msk [vmem:[#allocation2 + $0x8] sm:$0xff] %vm19_vm2, %v117_v30 }
 0x18b   :  { %v124_v32 = vld [vmem:[#allocation2] sm:$0xff] }
 0x18c   :  { %v147_v33 = vpack.c.bf16 %v124_v32, %v124_v32 }
 0x18d   :  { %v125_v34 = vld [vmem:[#allocation2 + $0x8] sm:$0xff] }
 0x18e   :  { %135 = vst.msk [vmem:[%s222_s3] sm:$0xf] %vm134_vm3, %v147_v33  ;;  %v148_v35 = vpack.c.bf16 %v125_v34, %v125_v34 }
 0x190   :  { %136 = vst.msk [vmem:[%s222_s3 + $0x4] sm:$0xf] %vm134_vm3, %v148_v35 }

// kernel: _lambda_.33
= control target key start
LH: loop header
LB: loop body
LE: loop exit
PB: predicated region body
PF: predicated region fallthrough
CT: control target
= control target key end

     0   :  { %vm27_vm0 = vcmask 261120   ;;  %v196_v7 = vmov 0.0   ;;  %vm197_vm1 = vmmov 0   ;;  %s236_s0 = inlined_call_operand.vmem [shape: bf16[16,32], index: 0, kind: input, shape index: {}]   ;;  %s237_s1 = inlined_call_operand.vmem [shape: bf16[32,128], index: 1, kind: input, shape index: {}]   ;;  %s238_s2 = inlined_call_operand.vmem [shape: f32[1,32], index: 2, kind: input, shape index: {}]   ;;  %s239_s3 = inlined_call_operand.vmem [shape: bf16[16,128], index: 3, kind: output, shape index: {}]  }
   0x1   :  { %v165_v0 = vld [vmem:[%s236_s0] sm:$0xff]   ;;  %176 = vmatprep.subr.bf16.mxu0 %v196_v7  ;;  %180 = vmatprep.mubr.msk.bf16.mxu0 %vm197_vm1, %v196_v7  ;;  %v187_v9 = vld [vmem:[%s237_s1 + $0x8] sm:$0xff]  }
   0x2   :  { %v166_v1 = vunpack.c.l.bf16 %v165_v0  ;;  %v167_v2 = vunpack.c.h.bf16 %v165_v0  ;;  %v186_v8 = vld [vmem:[%s237_s1] sm:$0xff]  }
   0x3   :  { %177 = vmatpush3.bf16.msra.mxu0 %v186_v8  ;;  %v156_v19 = vld [vmem:[%s238_s2] ss:$0 sm:$0xff] }
   0x4   :  { %v25_v3 = vmul.f32 %v166_v1, %v166_v1  ;;  %v26_v4 = vmul.f32 %v167_v2, %v167_v2  ;;  %178 = vmatprep.subr.bf16.mxu0 %v196_v7 }
   0x6   :  { %v28_v5 = vsel %vm27_vm0, %v25_v3, 0.0  ;;  %v31_v6 = vsel %vm27_vm0, %v26_v4, 0.0 }
   0x7   :  { %29 = vadd.xlane.f32.xlu0 %v28_v5  ;;  %179 = vmatpush3.bf16.msra.mxu0 %v187_v9 }
   0xb   :  { %32 = vadd.xlane.f32.xlu0 %v31_v6 }
  0x94   :  { %v30_v10 = vpop.xlane.xlu0 %29 }
  0x95   :  { %v35_v11 = vmul.f32 0.03125, %v30_v10 }
  0x97   :  { %v37_v12 = vadd.f32 1e-06, %v35_v11 }
  0x98   :  { %v33_v13 = vpop.xlane.xlu0 %32 }
  0x99   :  { %188 = vrsqrt.f32 %v37_v12  ;;  %v36_v14 = vmul.f32 0.03125, %v33_v13 }
  0x9b   :  { %v38_v15 = vadd.f32 1e-06, %v36_v14 }
  0x9d   :  { %190 = vrsqrt.f32 %v38_v15 }
  0xa3   :  { %v189_v16 = vpop.eup %188 }
  0xa4   :  { %v41_v17 = vmul.f32 %v189_v16, %v166_v1 }
  0xa6   :  { %v50_v21 = vmul.f32 %v156_v19, %v41_v17 }
  0xa7   :  { %v191_v18 = vpop.eup %190 }
  0xa8   :  { %v42_v20 = vmul.f32 %v191_v18, %v167_v2 }
  0xaa   :  { %v51_v22 = vmul.f32 %v156_v19, %v42_v20 }
  0xac   :  { %v52_v23 = vpack.c.bf16 %v51_v22, %v50_v21 }
  0xae   :  { %181 = vmatmul.mubr.msk.bf16.vlgmr.msra.gmra.mrb[0].mxu0 %vm27_vm0, %v52_v23 }
 0x181   :  { %v108_v24 = vpop.f32.mrb[0].mxu0 }
 0x182   :  { %v124_v25 = vmul.f32 %v108_v24, %v108_v24  ;;  %v182_v26 = vpop.f32.mrb[1].mxu0 }
 0x183   :  { %v111_v27 = vpop.f32.mrb[2].mxu0 }
 0x184   :  { %v126_v28 = vmul.f32 %v124_v25, %v108_v24  ;;  %v125_v29 = vmul.f32 %v111_v27, %v111_v27  ;;  %v183_v30 = vpop.f32.mrb[3].mxu0 }
 0x186   :  { %v128_v31 = vmul.f32 0.044715, %v126_v28  ;;  %v127_v32 = vmul.f32 %v125_v29, %v111_v27 }
 0x188   :  { %v130_v33 = vadd.f32 %v128_v31, %v108_v24  ;;  %v129_v34 = vmul.f32 0.044715, %v127_v32 }
 0x18a   :  { %v132_v35 = vmul.f32 0.7978846, %v130_v33  ;;  %v131_v36 = vadd.f32 %v129_v34, %v111_v27 }
 0x18c   :  { %192 = vtanh.f32 %v132_v35  ;;  %v133_v37 = vmul.f32 0.7978846, %v131_v36 }
 0x18e   :  { %194 = vtanh.f32 %v133_v37 }
 0x196   :  { %v193_v38 = vpop.eup %192 }
 0x197   :  { %v136_v39 = vadd.f32 1.0, %v193_v38 }
 0x198   :  { %v195_v40 = vpop.eup %194 }
 0x199   :  { %v138_v41 = vmul.f32 0.5, %v136_v39  ;;  %v137_v42 = vadd.f32 1.0, %v195_v40 }
 0x19b   :  { %v139_v43 = vmul.f32 0.5, %v137_v42  ;;  %v140_v44 = vmul.f32 %v138_v41, %v108_v24 }
 0x19d   :  { %v141_v45 = vmul.f32 %v139_v43, %v111_v27 }
 0x19f   :  { %v171_v46 = vpack.c.bf16 %v141_v45, %v140_v44 }
 0x1a1   :  { %172 = vst [vmem:[%s239_s3] sm:$0xff] %v171_v46  }

// kernel: _lambda_.31
= control target key start
LH: loop header
LB: loop body
LE: loop exit
PB: predicated region body
PF: predicated region fallthrough
CT: control target
= control target key end

     0   :  { %s860_s9 = smov 0   ;;  %s964_s0 = inlined_call_operand.vmem [shape: bf16[2,8,96], index: 0, kind: input, shape index: {}]   ;;  %s965_s1 = inlined_call_operand.vmem [shape: f32[2,1,8], index: 1, kind: input, shape index: {}]   ;;  %s966_s2 = inlined_call_operand.vmem [shape: bf16[2,8,32], index: 2, kind: output, shape index: {}]  }
   0x1 LB: > { %s696_s10 = sadd.s32 4294967295, %s826_s9   ;;  %p700_p0 = scmp.ge.s32.totalorder %s826_s9, 1  ;;  %s826_s9 = sphi %s860_s9, %s12_s9  }
   0x2   : > { %p119_p1 = scmp.lt.s32.totalorder %s826_s9, 3 }
   0x4   : > { %p120_p2 = pnand %p700_p0, %p119_p1 }
   0x5   : > { %p142_p3 = scmp.lt.s32.totalorder (!%p120_p2), %s696_s10, 1  ;;  %v828_v0 = vmov (!%p120_p2), 0.0   ;;  %vm829_vm0 = vmmov (!%p120_p2), 0   ;;  %s830_s15 = smov (!%p120_p2), 96   ;;  %vm168_vm1 = vcmask (!%p120_p2), 64512   ;;  %v158_v5 = vlaneseq (!%p120_p2) }
   0x6   : > { %123 = sbr.rel (%p120_p2) target bundleno = 1604 (0x644), region = 28  ;;  %730 = vmatprep.subr.bf16.mxu0 (!%p120_p2), %v828_v0  ;;  %732 = vmatprep.mubr.msk.bf16.mxu0 (!%p120_p2), %vm829_vm0, %v828_v0  ;;  %s831_s16 = smov (!%p120_p2), 64   ;;  %v833_v9 = vmov (!%p120_p2), 0   ;;  %vm234_vm4 = vcmask (!%p120_p2), 1043456   ;;  %vm627_vm5 = vcmask (!%p120_p2), 130048   ;;  %vm629_vm6 = vcmask (!%p120_p2), 195584  }
   0x7   : > { %736 = vmatprep.subr.bf16.mxu1 (!%p120_p2), %v828_v0  ;;  %738 = vmatprep.mubr.msk.bf16.mxu1 (!%p120_p2), %vm829_vm0, %v828_v0  ;;  %s832_s17 = smov (!%p120_p2), 88   ;;  %v159_v7 = vshrl.u32 (!%p120_p2), %v158_v5, 7  ;;  %s834_s21 = smov (!%p120_p2), 72   ;;  %vm632_vm7 = vcmask (!%p120_p2), 257024  }
   0x8   : > { %s835_s22 = smov (!%p120_p2), 120   ;;  %s836_s23 = smov (!%p120_p2), 80  }
   0x9   : > { %v160_v8 = vsub.s32 (!%p120_p2), 0, %v159_v7  ;;  %s837_s24 = smov (!%p120_p2), 112   ;;  %s838_s25 = smov (!%p120_p2), 104  }
   0xa   : > { %s839_s26 = smov (!%p120_p2), 56   ;;  %s840_s27 = smov (!%p120_p2), 48  }
   0xb   : > { %s841_s28 = smov (!%p120_p2), 40   ;;  %s842_s29 = smov (!%p120_p2), 8  }
   0xc   : > { %s843_s30 = smov (!%p120_p2), 16   ;;  %s844_s3 = smov (!%p120_p2), 24  }
   0xd   : > { %s968_s10 = smov (!%p142_p3, %s696_s10), 1 }
   0xe   : > { %s701_s11 = sshll.u32 %s968_s10, 2  ;;  %s148_s20 = scalar_lea.vmem %s965_s1, %s968_s10 }
   0xf   : > { %s145_s14 = scalar_lea.vmem %s964_s0, %s701_s11  ;;  %v155_v6 = vld [vmem:[%s148_s20] sm:$0x1]  ;;  %s152_s6 = scalar_lea.vmem %s966_s2, %s701_s11 }
  0x10   : > { %v154_v1 = vld [vmem:[%s145_s14] sm:$0xf]  ;;  %vm156_vm2 = vcmp.gt.f32.partialorder %v155_v6, 0.0 }
  0x11   : > { %v882_v2 = vcombine.low %v154_v1, %v154_v1  ;;  %v157_v10 = vsel %vm156_vm2, 1, %v833_v9 }
  0x12   : > { %v896_v11 = vrot.slane %v157_v10, %v160_v8 }
  0x13   : > { %166 = vrot.lane.b32.xlu0 %v882_v2, %s830_s15  ;;  %229 = vrot.lane.b32.xlu1 %v882_v2, %s831_s16 }
  0x14   : > { %vm162_vm3 = vcmp.eq.s32.totalorder %v896_v11, 1 }
  0x17   : > { %280 = vrot.lane.b32.xlu1 %v882_v2, %s832_s17 }
  0x85   : > { %v167_v3 = vpop.permute.xlu0 %166  ;;  %v230_v19 = vpop.permute.xlu1 %229 }
  0x86   : > { %v173_v4 = vsel %vm168_vm1, %v167_v3, 0  ;;  %v236_v20 = vsel %vm234_vm4, %v230_v19, 0 }
  0x87   : > { %731 = vmatpush3.bf16.xpose.msra.mxu0 %v173_v4  ;;  %737 = vmatpush3.bf16.msra.mxu1 %v236_v20 }
  0x88   : > { %748 = vmatprep.subr.bf16.mxu0 %v828_v0  ;;  %742 = vmatprep.subr.bf16.mxu1 %v828_v0 }
  0x89   : > { %v281_v26 = vpop.permute.xlu1 %280 }
  0x8a   : > { %v286_v32 = vsel %vm168_vm1, %v281_v26, 0 }
  0x8e   : > { %733 = vmatmul.mubr.msk.bf16.vlgmr.msra.gmra.mrb[0].mxu0 %vm168_vm1, %v154_v1 }
  0x8f   : > { %750 = vmatprep.mubr.msk.bf16.mxu0 %vm829_vm0, %v828_v0 }
 0x161   : > { %v209_v12 = vpop.f32.mrb[0].mxu0 }
 0x162   : > { %v215_v13 = vmul.f32 0.35355338, %v209_v12  ;;  %v734_v14 = vpop.f32.mrb[1].mxu0 }
 0x163   : > { %v212_v15 = vpop.f32.mrb[2].mxu0 }
 0x164   : > { %v735_v16 = vpop.f32.mrb[3].mxu0  ;;  %v216_v17 = vsel %vm162_vm3, %v215_v13, -1e+09 }
 0x165   : > { %v217_v18 = vsel %vm168_vm1, %v216_v17, -inf }
 0x166   : > { %218 = vmax.xlane.f32.xlu0 %v217_v18 }
 0x17c   : > { %504 = vrot.lane.b32.xlu0 %v882_v2, %s834_s21 }
 0x1f3   : > { %v219_v21 = vpop.xlane.xlu0 %218 }
 0x1f4   : > { %v220_v22 = vsub.f32 %v216_v17, %v219_v21 }
 0x1f6   : > { %v221_v23 = vmul.f32 1.442695, %v220_v22 }
 0x1f7   : > { %v505_v35 = vpop.permute.xlu0 %504 }
 0x1f8   : > { %804 = vpow2.f32 %v221_v23  ;;  %v510_v37 = vsel %vm168_vm1, %v505_v35, 0 }
 0x202   : > { %v805_v24 = vpop.eup %804 }
 0x203   : > { %v223_v25 = vsel %vm168_vm1, %v805_v24, 0.0 }
 0x204   : > { %224 = vadd.xlane.f32.xlu1 %v223_v25 }
 0x215   : > { %278 = vrot.lane.b32.xlu1 %v882_v2, %s835_s22 }
 0x219   : > { %392 = vrot.lane.b32.xlu1 %v882_v2, %s836_s23 }
 0x21d   : > { %390 = vrot.lane.b32.xlu1 %v882_v2, %s837_s24 }
 0x221   : > { %502 = vrot.lane.b32.xlu1 %v882_v2, %s838_s25 }
 0x291   : > { %v225_v27 = vpop.xlane.xlu1 %224 }
 0x292   : > { %806 = vrcp.f32 %v225_v27 }
 0x295   : > { %v279_v30 = vpop.permute.xlu1 %278 }
 0x299   : > { %v393_v33 = vpop.permute.xlu1 %392 }
 0x29a   : > { %v398_v34 = vsel %vm168_vm1, %v393_v33, 0 }
 0x29c   : > { %v807_v28 = vpop.eup %806 }
 0x29d   : > { %v227_v29 = vmul.f32 %v807_v28, %v805_v24  ;;  %v391_v36 = vpop.permute.xlu1 %390 }
 0x29f   : > { %v228_v31 = vpack.c.bf16 %v227_v29, %v227_v29 }
 0x2a1   : > { %739 = vmatmul.mubr.msk.bf16.vlgmr.msra.gmra.mrb[0].mxu1 %vm168_vm1, %v228_v31  ;;  %v503_v38 = vpop.permute.xlu1 %502 }
 0x2a2   : > { %743 = vmatpush3.bf16.xpose.msra.mxu1 %v286_v32  ;;  %744 = vmatprep.mubr.msk.bf16.mxu1 %vm829_vm0, %v828_v0 }
 0x2a3   : > { %754 = vmatprep.subr.bf16.mxu1 %v828_v0 }
 0x2a9   : > { %745 = vmatmul.mubr.msk.bf16.vlgmr.msra.gmra.mrb[4].mxu1 %vm168_vm1, %v279_v30 }
 0x2aa   : > { %755 = vmatpush3.bf16.xpose.msra.mxu1 %v398_v34  ;;  %756 = vmatprep.mubr.msk.bf16.mxu1 %vm829_vm0, %v828_v0 }
 0x2ab   : > { %766 = vmatprep.subr.bf16.mxu1 %v828_v0 }
 0x2b1   : > { %757 = vmatmul.mubr.msk.bf16.vlgmr.msra.gmra.mrb[8].mxu1 %vm168_vm1, %v391_v36 }
 0x2b2   : > { %767 = vmatpush3.bf16.xpose.msra.mxu1 %v510_v37  ;;  %768 = vmatprep.mubr.msk.bf16.mxu1 %vm829_vm0, %v828_v0 }
 0x2b9   : > { %769 = vmatmul.mubr.msk.bf16.vlgmr.msra.gmra.mrb[12].mxu1 %vm168_vm1, %v503_v38 }
 0x374   : > { %v925_v39 = vpop.f32.mrb[0].mxu1 }
 0x375   : > { %v740_v40 = vpop.f32.mrb[1].mxu1 }
 0x376   : > { %v275_v41 = vpop.f32.mrb[2].mxu1 }
 0x377   : > { %v741_v42 = vpop.f32.mrb[3].mxu1 }
 0x37c   : > { %v322_v43 = vpop.f32.mrb[4].mxu1 }
 0x37d   : > { %v328_v44 = vmul.f32 0.35355338, %v322_v43  ;;  %v746_v45 = vpop.f32.mrb[5].mxu1 }
 0x37e   : > { %v325_v46 = vpop.f32.mrb[6].mxu1 }
 0x37f   : > { %v747_v47 = vpop.f32.mrb[7].mxu1  ;;  %v329_v48 = vsel %vm162_vm3, %v328_v44, -1e+09 }
 0x380   : > { %v330_v49 = vsel %vm168_vm1, %v329_v48, -inf }
 0x381   : > { %331 = vmax.xlane.f32.xlu1 %v330_v49 }
 0x384   : > { %v434_v50 = vpop.f32.mrb[8].mxu1 }
 0x385   : > { %v440_v51 = vmul.f32 0.35355338, %v434_v50  ;;  %v758_v52 = vpop.f32.mrb[9].mxu1 }
 0x386   : > { %v437_v53 = vpop.f32.mrb[10].mxu1 }
 0x387   : > { %v441_v54 = vsel %vm162_vm3, %v440_v51, -1e+09  ;;  %v759_v55 = vpop.f32.mrb[11].mxu1 }
 0x388   : > { %v442_v56 = vsel %vm168_vm1, %v441_v54, -inf }
 0x389   : > { %443 = vmax.xlane.f32.xlu0 %v442_v56 }
 0x38c   : > { %v546_v57 = vpop.f32.mrb[12].mxu1 }
 0x38d   : > { %v552_v58 = vmul.f32 0.35355338, %v546_v57  ;;  %v770_v59 = vpop.f32.mrb[13].mxu1 }
 0x38e   : > { %v549_v60 = vpop.f32.mrb[14].mxu1 }
 0x38f   : > { %v553_v61 = vsel %vm162_vm3, %v552_v58, -1e+09  ;;  %v771_v62 = vpop.f32.mrb[15].mxu1 }
 0x390   : > { %v554_v63 = vsel %vm168_vm1, %v553_v61, -inf }
 0x391   : > { %555 = vmax.xlane.f32.xlu1 %v554_v63 }
 0x40e   : > { %v332_v1 = vpop.xlane.xlu1 %331 }
 0x40f   : > { %v333_v3 = vsub.f32 %v329_v48, %v332_v1 }
 0x411   : > { %v334_v4 = vmul.f32 1.442695, %v333_v3 }
 0x413   : > { %808 = vpow2.f32 %v334_v4 }
 0x416   : > { %v444_v12 = vpop.xlane.xlu0 %443 }
 0x417   : > { %v445_v13 = vsub.f32 %v441_v54, %v444_v12 }
 0x419   : > { %v446_v14 = vmul.f32 1.442695, %v445_v13 }
 0x41d   : > { %v809_v5 = vpop.eup %808 }
 0x41e   : > { %v556_v6 = vpop.xlane.xlu1 %555  ;;  %v336_v7 = vsel %vm168_vm1, %v809_v5, 0.0 }
 0x41f   : > { %v557_v8 = vsub.f32 %v553_v61, %v556_v6  ;;  %337 = vadd.xlane.f32.xlu1 %v336_v7 }
 0x421   : > { %v558_v9 = vmul.f32 1.442695, %v557_v8 }
 0x423   : > { %810 = vpow2.f32 %v558_v9 }
 0x424   : > { %812 = vpow2.f32 %v446_v14 }
 0x42d   : > { %v811_v10 = vpop.eup %810 }
 0x42e   : > { %v560_v11 = vsel %vm168_vm1, %v811_v10, 0.0  ;;  %v813_v15 = vpop.eup %812 }
 0x42f   : > { %561 = vadd.xlane.f32.xlu0 %v560_v11  ;;  %v448_v16 = vsel %vm168_vm1, %v813_v15, 0.0 }
 0x430   : > { %342 = vrot.lane.b32.xlu1 %v882_v2, %s839_s26 }
 0x445   : > { %454 = vrot.lane.b32.xlu0 %v882_v2, %s840_s27 }
 0x454   : > { %449 = vadd.xlane.f32.xlu1 %v448_v16 }
 0x465   : > { %566 = vrot.lane.b32.xlu1 %v882_v2, %s841_s28 }
 0x4ac   : > { %v338_v17 = vpop.xlane.xlu1 %337 }
 0x4ad   : > { %814 = vrcp.f32 %v338_v17 }
 0x4b0   : > { %v343_v18 = vpop.permute.xlu1 %342 }
 0x4b1   : > { %v348_v19 = vsel %vm234_vm4, %v343_v18, 0 }
 0x4b2   : > { %749 = vmatpush3.bf16.msra.mxu0 %v348_v19 }
 0x4b3   : > { %760 = vmatprep.subr.bf16.mxu0 %v828_v0 }
 0x4b7   : > { %v815_v20 = vpop.eup %814 }
 0x4b8   : > { %v340_v21 = vmul.f32 %v815_v20, %v809_v5 }
 0x4ba   : > { %v341_v22 = vpack.c.bf16 %v340_v21, %v340_v21 }
 0x4bc   : > { %751 = vmatmul.mubr.msk.bf16.vlgmr.msra.gmra.mrb[4].mxu0 %vm168_vm1, %v341_v22  ;;  %v562_v23 = vpop.xlane.xlu0 %561 }
 0x4bd   : > { %762 = vmatprep.mubr.msk.bf16.mxu0 %vm829_vm0, %v828_v0 }
 0x4c0   : > { %v455_v24 = vpop.permute.xlu0 %454 }
 0x4c1   : > { %v460_v2 = vsel %vm234_vm4, %v455_v24, 0 }
 0x4c2   : > { %761 = vmatpush3.bf16.msra.mxu0 %v460_v2 }
 0x4c3   : > { %772 = vmatprep.subr.bf16.mxu0 %v828_v0 }
 0x4e1   : > { %v450_v25 = vpop.xlane.xlu1 %449 }
 0x4e2   : > { %816 = vrcp.f32 %v450_v25 }
 0x4e3   : > { %818 = vrcp.f32 %v562_v23 }
 0x4e5   : > { %v567_v27 = vpop.permute.xlu1 %566 }
 0x4e6   : > { %v572_v29 = vsel %vm234_vm4, %v567_v27, 0 }
 0x4ec   : > { %v817_v26 = vpop.eup %816 }
 0x4ed   : > { %v452_v28 = vmul.f32 %v817_v26, %v813_v15  ;;  %v819_v31 = vpop.eup %818 }
 0x4ee   : > { %v564_v32 = vmul.f32 %v819_v31, %v811_v10 }
 0x4ef   : > { %v453_v30 = vpack.c.bf16 %v452_v28, %v452_v28 }
 0x4f0   : > { %v565_v33 = vpack.c.bf16 %v564_v32, %v564_v32 }
 0x4f1   : > { %763 = vmatmul.mubr.msk.bf16.vlgmr.msra.gmra.mrb[8].mxu0 %vm168_vm1, %v453_v30 }
 0x4f2   : > { %773 = vmatpush3.bf16.msra.mxu0 %v572_v29  ;;  %774 = vmatprep.mubr.msk.bf16.mxu0 %vm829_vm0, %v828_v0 }
 0x4f9   : > { %775 = vmatmul.mubr.msk.bf16.vlgmr.msra.gmra.mrb[12].mxu0 %vm168_vm1, %v565_v33 }
 0x58f   : > { %v384_v34 = vpop.f32.mrb[4].mxu0 }
 0x590   : > { %615 = vrot.lane.b32.xlu1 %v384_v34, %s842_s29  ;;  %v752_v35 = vpop.f32.mrb[5].mxu0 }
 0x591   : > { %v387_v36 = vpop.f32.mrb[6].mxu0 }
 0x592   : > { %v753_v37 = vpop.f32.mrb[7].mxu0 }
 0x5c4   : > { %v496_v38 = vpop.f32.mrb[8].mxu0 }
 0x5c5   : > { %619 = vrot.lane.b32.xlu0 %v496_v38, %s843_s30  ;;  %v764_v40 = vpop.f32.mrb[9].mxu0 }
 0x5c6   : > { %v499_v41 = vpop.f32.mrb[10].mxu0 }
 0x5c7   : > { %v765_v42 = vpop.f32.mrb[11].mxu0 }
 0x5cc   : > { %v608_v43 = vpop.f32.mrb[12].mxu0 }
 0x5cd   : > { %623 = vrot.lane.b32.xlu1 %v608_v43, %s844_s3  ;;  %v776_v0 = vpop.f32.mrb[13].mxu0 }
 0x5ce   : > { %v611_v44 = vpop.f32.mrb[14].mxu0 }
 0x5cf   : > { %v777_v45 = vpop.f32.mrb[15].mxu0 }
 0x602   : > { %v616_v46 = vpop.permute.xlu1 %615 }
 0x603   : > { %v626_v48 = vsel %vm168_vm1, %v925_v39, %v616_v46 }
 0x637   : > { %v620_v47 = vpop.permute.xlu0 %619 }
 0x638   : > { %v628_v49 = vsel %vm627_vm5, %v626_v48, %v620_v47 }
 0x63f   : > { %v624_v50 = vpop.permute.xlu1 %623 }
 0x640   : > { %v630_v51 = vsel %vm629_vm6, %v628_v49, %v624_v50 }
 0x641   : > { %v631_v52 = vpack.c.bf16 %v630_v51, %v630_v51 }
 0x643   : > { %633 = vst.msk [vmem:[%s152_s6] sm:$0xf] %vm632_vm7, %v631_v52 }
 0x644 PF: > { %s12_s9 = sadd.s32 1, %s826_s9  }
 0x645   : > { %p9_p4 = scmp.ge.s32.totalorder %s12_s9, 4  }
 0x647   :  { %11 = sbr.rel (!%p9_p4) target bundleno = 1 (0x1), region = 61 }

// kernel: _lambda_.40
= control target key start
LH: loop header
LB: loop body
LE: loop exit
PB: predicated region body
PF: predicated region fallthrough
CT: control target
= control target key end

     0   :  { %vm17_vm0 = vcmask 261120   ;;  %vm50_vm1 = vcmask 257024   ;;  %s97_s0 = inlined_call_operand.vmem [shape: bf16[16,32], index: 0, kind: input, shape index: {}]   ;;  %s98_s1 = inlined_call_operand.vmem [shape: f32[1,32], index: 1, kind: input, shape index: {}]   ;;  %s99_s2 = inlined_call_operand.vmem [shape: bf16[16,32], index: 2, kind: output, shape index: {}]  }
   0x1   :  { %v63_v0 = vld [vmem:[%s97_s0] sm:$0xff]  }
   0x2   :  { %v64_v1 = vunpack.c.l.bf16 %v63_v0  ;;  %v65_v2 = vunpack.c.h.bf16 %v63_v0  ;;  %v57_v14 = vld [vmem:[%s98_s1] ss:$0 sm:$0xff] }
   0x4   :  { %v15_v3 = vmul.f32 %v64_v1, %v64_v1  ;;  %v16_v4 = vmul.f32 %v65_v2, %v65_v2 }
   0x6   :  { %v18_v5 = vsel %vm17_vm0, %v15_v3, 0.0  ;;  %v21_v6 = vsel %vm17_vm0, %v16_v4, 0.0 }
   0x7   :  { %19 = vadd.xlane.f32.xlu0 %v18_v5 }
   0xb   :  { %22 = vadd.xlane.f32.xlu0 %v21_v6 }
  0x94   :  { %v20_v7 = vpop.xlane.xlu0 %19 }
  0x95   :  { %v25_v8 = vmul.f32 0.03125, %v20_v7 }
  0x97   :  { %v27_v9 = vadd.f32 1e-06, %v25_v8 }
  0x98   :  { %v23_v10 = vpop.xlane.xlu0 %22 }
  0x99   :  { %66 = vrsqrt.f32 %v27_v9  ;;  %v26_v11 = vmul.f32 0.03125, %v23_v10 }
  0x9b   :  { %v28_v12 = vadd.f32 1e-06, %v26_v11 }
  0x9d   :  { %68 = vrsqrt.f32 %v28_v12 }
  0xa3   :  { %v67_v13 = vpop.eup %66 }
  0xa4   :  { %v31_v15 = vmul.f32 %v67_v13, %v64_v1 }
  0xa6   :  { %v40_v16 = vmul.f32 %v57_v14, %v31_v15 }
  0xa7   :  { %v69_v17 = vpop.eup %68 }
  0xa8   :  { %v60_v18 = vpack.c.bf16 %v40_v16, %v40_v16  ;;  %v32_v19 = vmul.f32 %v69_v17, %v65_v2 }
  0xaa   :  { %51 = vst.msk [vmem:[%s99_s2] sm:$0xf] %vm50_vm1, %v60_v18  ;;  %v41_v20 = vmul.f32 %v57_v14, %v32_v19 }
  0xac   :  { %v61_v21 = vpack.c.bf16 %v41_v20, %v41_v20 }
  0xae   :  { %52 = vst.msk [vmem:[%s99_s2 + $0x4] sm:$0xf] %vm50_vm1, %v61_v21 }

// kernel: _lambda_.45
= control target key start
LH: loop header
LB: loop body
LE: loop exit
PB: predicated region body
PF: predicated region fallthrough
CT: control target
= control target key end

     0   :  { %vm16_vm0 = vcmask 523264   ;;  %v138_v0 = vmov 0.0   ;;  %vm139_vm1 = vmmov 0   ;;  %vm44_vm2 = vcmask 261120   ;;  %s174_s1 = inlined_call_operand.vmem [shape: bf16[32,64], index: 1, kind: input, shape index: {}]   ;;  %s175_s0 = inlined_call_operand.vmem [shape: bf16[16,32], index: 0, kind: input, shape index: {}]   ;;  %s176_s2 = inlined_call_operand.vmem [shape: bf16[16,64], index: 2, kind: output, shape index: {}]  }
   0x1   :  { %125 = vmatprep.subr.bf16.mxu0 %v138_v0  ;;  %v135_v1 = vld [vmem:[%s174_s1] sm:$0xff]   ;;  %129 = vmatprep.mubr.msk.bf16.mxu0 %vm139_vm1, %v138_v0  ;;  %17 = vst.msk [vmem:[#allocation2] sm:$0xff] %vm16_vm0, %v138_v0  ;;  %18 = vst.msk [vmem:[#allocation2 + $0x8] sm:$0xff] %vm16_vm0, %v138_v0  ;;  %v136_v2 = vld [vmem:[%s174_s1 + $0x8] sm:$0xff]   ;;  %vm107_vm3 = vcmask 519168  }
   0x2   :  { %126 = vmatpush3.bf16.msra.mxu0 %v135_v1  ;;  %v137_v3 = vld [vmem:[%s175_s0] sm:$0xff]  }
   0x3   :  { %127 = vmatprep.subr.bf16.mxu0 %v138_v0 }
   0x6   :  { %128 = vmatpush3.bf16.msra.mxu0 %v136_v2 }
   0x8   :  { %v25_v4 = vld [vmem:[#allocation2] sm:$0xff]  ;;  %v26_v6 = vld [vmem:[#allocation2 + $0x8] sm:$0xff] }
   0x9   :  { %130 = vmatmul.mubr.msk.bf16.vlgmr.msra.gmra.mrb[0].mxu0 %vm44_vm2, %v137_v3 }
  0xdc   :  { %v82_v5 = vpop.f32.mrb[0].mxu0 }
  0xdd   :  { %v89_v7 = vadd.f32 %v82_v5, %v25_v4  ;;  %v131_v8 = vpop.f32.mrb[1].mxu0 }
  0xde   :  { %v85_v9 = vpop.f32.mrb[2].mxu0 }
  0xdf   :  { %92 = vst.msk [vmem:[#allocation2] sm:$0xff] %vm16_vm0, %v89_v7  ;;  %v90_v10 = vadd.f32 %v85_v9, %v26_v6  ;;  %v132_v11 = vpop.f32.mrb[3].mxu0 }
  0xe1   :  { %93 = vst.msk [vmem:[#allocation2 + $0x8] sm:$0xff] %vm16_vm0, %v90_v10 }
  0xe6   :  { %v97_v12 = vld [vmem:[#allocation2] sm:$0xff] }
  0xe7   :  { %v120_v13 = vpack.c.bf16 %v97_v12, %v97_v12 }
  0xe8   :  { %v98_v14 = vld [vmem:[#allocation2 + $0x8] sm:$0xff] }
  0xe9   :  { %108 = vst.msk [vmem:[%s176_s2] sm:$0xf] %vm107_vm3, %v120_v13  ;;  %v121_v15 = vpack.c.bf16 %v98_v14, %v98_v14 }
  0xeb   :  { %109 = vst.msk [vmem:[%s176_s2 + $0x4] sm:$0xf] %vm107_vm3, %v121_v15 }

// kernel: _lambda_.34
= control target key start
LH: loop header
LB: loop body
LE: loop exit
PB: predicated region body
PF: predicated region fallthrough
CT: control target
= control target key end

     0   :  { %vm19_vm0 = vcmask 261120   ;;  %v225_v0 = vmov 0.0   ;;  %vm226_vm1 = vmmov 0   ;;  %vm161_vm2 = vcmask 257024   ;;  %s287_s1 = inlined_call_operand.vmem [shape: bf16[128,32], index: 1, kind: input, shape index: {}]   ;;  %s288_s0 = inlined_call_operand.vmem [shape: bf16[16,128], index: 0, kind: input, shape index: {}]   ;;  %s289_s2 = inlined_call_operand.vmem [shape: bf16[16,32], index: 2, kind: input, shape index: {}]   ;;  %s290_s3 = inlined_call_operand.vmem [shape: bf16[16,32], index: 3, kind: output, shape index: {}]  }
   0x1   :  { %194 = vmatprep.subr.bf16.mxu0 %v225_v0  ;;  %v216_v1 = vld [vmem:[%s287_s1] sm:$0xff]   ;;  %210 = vmatprep.mubr.msk.bf16.mxu0 %vm226_vm1, %v225_v0  ;;  %20 = vst.msk [vmem:[#allocation2] sm:$0xff] %vm19_vm0, %v225_v0  ;;  %21 = vst.msk [vmem:[#allocation2 + $0x8] sm:$0xff] %vm19_vm0, %v225_v0  ;;  %v217_v2 = vld [vmem:[%s287_s1 + $0x8] sm:$0xff]  }
   0x2   :  { %195 = vmatpush3.bf16.msra.mxu0 %v216_v1  ;;  %v218_v3 = vld [vmem:[%s287_s1 + $0x10] sm:$0xff]   ;;  %v219_v4 = vld [vmem:[%s287_s1 + $0x18] sm:$0xff]   ;;  %v220_v5 = vld [vmem:[%s287_s1 + $0x20] sm:$0xff]  }
   0x3   :  { %196 = vmatprep.subr.bf16.mxu0 %v225_v0  ;;  %v221_v6 = vld [vmem:[%s287_s1 + $0x28] sm:$0xff]   ;;  %v222_v7 = vld [vmem:[%s287_s1 + $0x30] sm:$0xff]   ;;  %v223_v8 = vld [vmem:[%s287_s1 + $0x38] sm:$0xff]  }
   0x4   :  { %v224_v9 = vld [vmem:[%s288_s0] sm:$0xff]  }
   0x5   :  { %v182_v18 = vld [vmem:[%s289_s2] sm:$0xff]  }
   0x6   :  { %197 = vmatpush3.bf16.msra.mxu0 %v217_v2  ;;  %v183_v19 = vunpack.c.l.bf16 %v182_v18  ;;  %v184_v20 = vunpack.c.h.bf16 %v182_v18 }
   0x7   :  { %198 = vmatprep.subr.bf16.mxu0 %v225_v0 }
   0x8   :  { %v40_v10 = vld [vmem:[#allocation2] sm:$0xff]  ;;  %v41_v12 = vld [vmem:[#allocation2 + $0x8] sm:$0xff] }
   0xa   :  { %199 = vmatpush3.bf16.msra.mxu0 %v218_v3 }
   0xb   :  { %200 = vmatprep.subr.bf16.mxu0 %v225_v0 }
   0xe   :  { %201 = vmatpush3.bf16.msra.mxu0 %v219_v4 }
   0xf   :  { %202 = vmatprep.subr.bf16.mxu0 %v225_v0 }
  0x12   :  { %203 = vmatpush3.bf16.msra.mxu0 %v220_v5 }
  0x13   :  { %204 = vmatprep.subr.bf16.mxu0 %v225_v0 }
  0x16   :  { %205 = vmatpush3.bf16.msra.mxu0 %v221_v6 }
  0x17   :  { %206 = vmatprep.subr.bf16.mxu0 %v225_v0 }
  0x1a   :  { %207 = vmatpush3.bf16.msra.mxu0 %v222_v7 }
  0x1b   :  { %208 = vmatprep.subr.bf16.mxu0 %v225_v0 }
  0x1e   :  { %209 = vmatpush3.bf16.msra.mxu0 %v223_v8 }
  0x21   :  { %211 = vmatmul.mubr.bf16.vlgmr.msra.gmra.mrb[0].mxu0 %v224_v9 }
  0xf4   :  { %v130_v11 = vpop.f32.mrb[0].mxu0 }
  0xf5   :  { %v137_v13 = vadd.f32 %v130_v11, %v40_v10  ;;  %v212_v14 = vpop.f32.mrb[1].mxu0 }
  0xf6   :  { %v133_v15 = vpop.f32.mrb[2].mxu0 }
  0xf7   :  { %140 = vst.msk [vmem:[#allocation2] sm:$0xff] %vm19_vm0, %v137_v13  ;;  %v138_v16 = vadd.f32 %v133_v15, %v41_v12  ;;  %v213_v17 = vpop.f32.mrb[3].mxu0 }
  0xf9   :  { %141 = vst.msk [vmem:[#allocation2 + $0x8] sm:$0xff] %vm19_vm0, %v138_v16 }
  0xfe   :  { %v145_v21 = vld [vmem:[#allocation2] sm:$0xff] }
  0xff   :  { %v151_v22 = vadd.f32 %v183_v19, %v145_v21 }
 0x100   :  { %v146_v23 = vld [vmem:[#allocation2 + $0x8] sm:$0xff] }
 0x101   :  { %v179_v24 = vpack.c.bf16 %v151_v22, %v151_v22  ;;  %v152_v25 = vadd.f32 %v184_v20, %v146_v23 }
 0x103   :  { %162 = vst.msk [vmem:[%s290_s3] sm:$0xf] %vm161_vm2, %v179_v24  ;;  %v180_v26 = vpack.c.bf16 %v152_v25, %v152_v25 }
 0x105   :  { %163 = vst.msk [vmem:[%s290_s3 + $0x4] sm:$0xf] %vm161_vm2, %v180_v26 }

// kernel: _lambda_.42
= control target key start
LH: loop header
LB: loop body
LE: loop exit
PB: predicated region body
PF: predicated region fallthrough
CT: control target
= control target key end

     0   :  { %s866_s9 = smov 0   ;;  %s971_s0 = inlined_call_operand.vmem [shape: bf16[2,8,96], index: 0, kind: input, shape index: {}]   ;;  %s972_s1 = inlined_call_operand.vmem [shape: f32[2,1,8], index: 1, kind: input, shape index: {}]   ;;  %s973_s2 = inlined_call_operand.vmem [shape: bf16[2,8,32], index: 2, kind: output, shape index: {}]  }
   0x1 LB: > { %s702_s10 = sadd.s32 4294967295, %s832_s9   ;;  %p706_p0 = scmp.ge.s32.totalorder %s832_s9, 1  ;;  %s832_s9 = sphi %s866_s9, %s12_s9  }
   0x2   : > { %p119_p1 = scmp.lt.s32.totalorder %s832_s9, 3 }
   0x4   : > { %p120_p2 = pnand %p706_p0, %p119_p1 }
   0x5   : > { %p142_p3 = scmp.lt.s32.totalorder (!%p120_p2), %s702_s10, 1  ;;  %v834_v0 = vmov (!%p120_p2), 0.0   ;;  %vm835_vm0 = vmmov (!%p120_p2), 0   ;;  %s836_s15 = smov (!%p120_p2), 96   ;;  %vm174_vm1 = vcmask (!%p120_p2), 64512   ;;  %v158_v5 = vlaneseq (!%p120_p2) }
   0x6   : > { %123 = sbr.rel (%p120_p2) target bundleno = 1604 (0x644), region = 28  ;;  %736 = vmatprep.subr.bf16.mxu0 (!%p120_p2), %v834_v0  ;;  %738 = vmatprep.mubr.msk.bf16.mxu0 (!%p120_p2), %vm835_vm0, %v834_v0  ;;  %s837_s16 = smov (!%p120_p2), 64   ;;  %v839_v9 = vmov (!%p120_p2), 0   ;;  %vm240_vm6 = vcmask (!%p120_p2), 1043456   ;;  %vm633_vm7 = vcmask (!%p120_p2), 130048   ;;  %vm635_vm8 = vcmask (!%p120_p2), 195584  }
   0x7   : > { %742 = vmatprep.subr.bf16.mxu1 (!%p120_p2), %v834_v0  ;;  %744 = vmatprep.mubr.msk.bf16.mxu1 (!%p120_p2), %vm835_vm0, %v834_v0  ;;  %s838_s17 = smov (!%p120_p2), 88   ;;  %v159_v7 = vshrl.u32 (!%p120_p2), %v158_v5, 7  ;;  %v166_v12 = vand.u32 (!%p120_p2), 127, %v158_v5  ;;  %s840_s21 = smov (!%p120_p2), 72   ;;  %vm638_vm9 = vcmask (!%p120_p2), 257024  }
   0x8   : > { %s841_s22 = smov (!%p120_p2), 120   ;;  %s842_s23 = smov (!%p120_p2), 80  }
   0x9   : > { %v160_v8 = vsub.s32 (!%p120_p2), 0, %v159_v7  ;;  %vm167_vm4 = vcmp.ge.s32.totalorder (!%p120_p2), %v159_v7, %v166_v12  ;;  %s843_s24 = smov (!%p120_p2), 112   ;;  %s844_s25 = smov (!%p120_p2), 104  }
   0xa   : > { %s845_s26 = smov (!%p120_p2), 56   ;;  %s846_s27 = smov (!%p120_p2), 48  }
   0xb   : > { %s847_s28 = smov (!%p120_p2), 40   ;;  %s848_s29 = smov (!%p120_p2), 8  }
   0xc   : > { %s849_s30 = smov (!%p120_p2), 16   ;;  %s850_s3 = smov (!%p120_p2), 24  }
   0xd   : > { %s977_s10 = smov (!%p142_p3, %s702_s10), 1 }
   0xe   : > { %s707_s11 = sshll.u32 %s977_s10, 2  ;;  %s148_s20 = scalar_lea.vmem %s972_s1, %s977_s10 }
   0xf   : > { %s145_s14 = scalar_lea.vmem %s971_s0, %s707_s11  ;;  %v155_v6 = vld [vmem:[%s148_s20] sm:$0x1]  ;;  %s152_s6 = scalar_lea.vmem %s973_s2, %s707_s11 }
  0x10   : > { %v154_v1 = vld [vmem:[%s145_s14] sm:$0xf]  ;;  %vm156_vm2 = vcmp.gt.f32.partialorder %v155_v6, 0.0 }
  0x11   : > { %v888_v2 = vcombine.low %v154_v1, %v154_v1  ;;  %v157_v10 = vsel %vm156_vm2, 1, %v839_v9 }
  0x12   : > { %v161_v11 = vrot.slane %v157_v10, %v160_v8 }
  0x13   : > { %172 = vrot.lane.b32.xlu0 %v888_v2, %s836_s15  ;;  %235 = vrot.lane.b32.xlu1 %v888_v2, %s837_s16 }
  0x14   : > { %vm162_vm3 = vcmp.eq.s32.totalorder %v161_v11, 1 }
  0x15   : > { %vm902_vm5 = vmand %vm162_vm3, %vm167_vm4 }
  0x17   : > { %286 = vrot.lane.b32.xlu1 %v888_v2, %s838_s17 }
  0x85   : > { %v173_v3 = vpop.permute.xlu0 %172  ;;  %v236_v21 = vpop.permute.xlu1 %235 }
  0x86   : > { %v179_v4 = vsel %vm174_vm1, %v173_v3, 0  ;;  %v242_v22 = vsel %vm240_vm6, %v236_v21, 0 }
  0x87   : > { %737 = vmatpush3.bf16.xpose.msra.mxu0 %v179_v4  ;;  %743 = vmatpush3.bf16.msra.mxu1 %v242_v22 }
  0x88   : > { %754 = vmatprep.subr.bf16.mxu0 %v834_v0  ;;  %748 = vmatprep.subr.bf16.mxu1 %v834_v0 }
  0x89   : > { %v287_v28 = vpop.permute.xlu1 %286 }
  0x8a   : > { %v292_v34 = vsel %vm174_vm1, %v287_v28, 0 }
  0x8e   : > { %739 = vmatmul.mubr.msk.bf16.vlgmr.msra.gmra.mrb[0].mxu0 %vm174_vm1, %v154_v1 }
  0x8f   : > { %756 = vmatprep.mubr.msk.bf16.mxu0 %vm835_vm0, %v834_v0 }
 0x161   : > { %v215_v13 = vpop.f32.mrb[0].mxu0 }
 0x162   : > { %v221_v15 = vmul.f32 0.35355338, %v215_v13  ;;  %v740_v16 = vpop.f32.mrb[1].mxu0 }
 0x163   : > { %v218_v17 = vpop.f32.mrb[2].mxu0 }
 0x164   : > { %v741_v18 = vpop.f32.mrb[3].mxu0  ;;  %v222_v19 = vsel %vm902_vm5, %v221_v15, -1e+09 }
 0x165   : > { %v223_v20 = vsel %vm174_vm1, %v222_v19, -inf }
 0x166   : > { %224 = vmax.xlane.f32.xlu0 %v223_v20 }
 0x17c   : > { %510 = vrot.lane.b32.xlu0 %v888_v2, %s840_s21 }
 0x1f3   : > { %v225_v23 = vpop.xlane.xlu0 %224 }
 0x1f4   : > { %v226_v24 = vsub.f32 %v222_v19, %v225_v23 }
 0x1f6   : > { %v227_v25 = vmul.f32 1.442695, %v226_v24 }
 0x1f7   : > { %v511_v37 = vpop.permute.xlu0 %510 }
 0x1f8   : > { %810 = vpow2.f32 %v227_v25  ;;  %v516_v39 = vsel %vm174_vm1, %v511_v37, 0 }
 0x202   : > { %v811_v26 = vpop.eup %810 }
 0x203   : > { %v229_v27 = vsel %vm174_vm1, %v811_v26, 0.0 }
 0x204   : > { %230 = vadd.xlane.f32.xlu1 %v229_v27 }
 0x215   : > { %284 = vrot.lane.b32.xlu1 %v888_v2, %s841_s22 }
 0x219   : > { %398 = vrot.lane.b32.xlu1 %v888_v2, %s842_s23 }
 0x21d   : > { %396 = vrot.lane.b32.xlu1 %v888_v2, %s843_s24 }
 0x221   : > { %508 = vrot.lane.b32.xlu1 %v888_v2, %s844_s25 }
 0x291   : > { %v231_v29 = vpop.xlane.xlu1 %230 }
 0x292   : > { %812 = vrcp.f32 %v231_v29 }
 0x295   : > { %v285_v32 = vpop.permute.xlu1 %284 }
 0x299   : > { %v399_v35 = vpop.permute.xlu1 %398 }
 0x29a   : > { %v404_v36 = vsel %vm174_vm1, %v399_v35, 0 }
 0x29c   : > { %v813_v30 = vpop.eup %812 }
 0x29d   : > { %v233_v31 = vmul.f32 %v813_v30, %v811_v26  ;;  %v397_v38 = vpop.permute.xlu1 %396 }
 0x29f   : > { %v234_v33 = vpack.c.bf16 %v233_v31, %v233_v31 }
 0x2a1   : > { %745 = vmatmul.mubr.msk.bf16.vlgmr.msra.gmra.mrb[0].mxu1 %vm174_vm1, %v234_v33  ;;  %v509_v40 = vpop.permute.xlu1 %508 }
 0x2a2   : > { %749 = vmatpush3.bf16.xpose.msra.mxu1 %v292_v34  ;;  %750 = vmatprep.mubr.msk.bf16.mxu1 %vm835_vm0, %v834_v0 }
 0x2a3   : > { %760 = vmatprep.subr.bf16.mxu1 %v834_v0 }
 0x2a9   : > { %751 = vmatmul.mubr.msk.bf16.vlgmr.msra.gmra.mrb[4].mxu1 %vm174_vm1, %v285_v32 }
 0x2aa   : > { %761 = vmatpush3.bf16.xpose.msra.mxu1 %v404_v36  ;;  %762 = vmatprep.mubr.msk.bf16.mxu1 %vm835_vm0, %v834_v0 }
 0x2ab   : > { %772 = vmatprep.subr.bf16.mxu1 %v834_v0 }
 0x2b1   : > { %763 = vmatmul.mubr.msk.bf16.vlgmr.msra.gmra.mrb[8].mxu1 %vm174_vm1, %v397_v38 }
 0x2b2   : > { %773 = vmatpush3.bf16.xpose.msra.mxu1 %v516_v39  ;;  %774 = vmatprep.mubr.msk.bf16.mxu1 %vm835_vm0, %v834_v0 }
 0x2b9   : > { %775 = vmatmul.mubr.msk.bf16.vlgmr.msra.gmra.mrb[12].mxu1 %vm174_vm1, %v509_v40 }
 0x374   : > { %v932_v41 = vpop.f32.mrb[0].mxu1 }
 0x375   : > { %v746_v42 = vpop.f32.mrb[1].mxu1 }
 0x376   : > { %v281_v43 = vpop.f32.mrb[2].mxu1 }
 0x377   : > { %v747_v44 = vpop.f32.mrb[3].mxu1 }
 0x37c   : > { %v328_v45 = vpop.f32.mrb[4].mxu1 }
 0x37d   : > { %v334_v46 = vmul.f32 0.35355338, %v328_v45  ;;  %v752_v47 = vpop.f32.mrb[5].mxu1 }
 0x37e   : > { %v331_v48 = vpop.f32.mrb[6].mxu1 }
 0x37f   : > { %v753_v49 = vpop.f32.mrb[7].mxu1  ;;  %v335_v50 = vsel %vm902_vm5, %v334_v46, -1e+09 }
 0x380   : > { %v336_v51 = vsel %vm174_vm1, %v335_v50, -inf }
 0x381   : > { %337 = vmax.xlane.f32.xlu1 %v336_v51 }
 0x384   : > { %v440_v52 = vpop.f32.mrb[8].mxu1 }
 0x385   : > { %v446_v53 = vmul.f32 0.35355338, %v440_v52  ;;  %v764_v54 = vpop.f32.mrb[9].mxu1 }
 0x386   : > { %v443_v55 = vpop.f32.mrb[10].mxu1 }
 0x387   : > { %v447_v56 = vsel %vm902_vm5, %v446_v53, -1e+09  ;;  %v765_v57 = vpop.f32.mrb[11].mxu1 }
 0x388   : > { %v448_v58 = vsel %vm174_vm1, %v447_v56, -inf }
 0x389   : > { %449 = vmax.xlane.f32.xlu0 %v448_v58 }
 0x38c   : > { %v552_v59 = vpop.f32.mrb[12].mxu1 }
 0x38d   : > { %v558_v60 = vmul.f32 0.35355338, %v552_v59  ;;  %v776_v61 = vpop.f32.mrb[13].mxu1 }
 0x38e   : > { %v555_v62 = vpop.f32.mrb[14].mxu1 }
 0x38f   : > { %v559_v63 = vsel %vm902_vm5, %v558_v60, -1e+09  ;;  %v777_v1 = vpop.f32.mrb[15].mxu1 }
 0x390   : > { %v560_v3 = vsel %vm174_vm1, %v559_v63, -inf }
 0x391   : > { %561 = vmax.xlane.f32.xlu1 %v560_v3 }
 0x40e   : > { %v338_v4 = vpop.xlane.xlu1 %337 }
 0x40f   : > { %v339_v5 = vsub.f32 %v335_v50, %v338_v4 }
 0x411   : > { %v340_v6 = vmul.f32 1.442695, %v339_v5 }
 0x413   : > { %814 = vpow2.f32 %v340_v6 }
 0x416   : > { %v450_v14 = vpop.xlane.xlu0 %449 }
 0x417   : > { %v451_v15 = vsub.f32 %v447_v56, %v450_v14 }
 0x419   : > { %v452_v16 = vmul.f32 1.442695, %v451_v15 }
 0x41d   : > { %v815_v7 = vpop.eup %814 }
 0x41e   : > { %v562_v8 = vpop.xlane.xlu1 %561  ;;  %v342_v9 = vsel %vm174_vm1, %v815_v7, 0.0 }
 0x41f   : > { %v563_v10 = vsub.f32 %v559_v63, %v562_v8  ;;  %343 = vadd.xlane.f32.xlu1 %v342_v9 }
 0x421   : > { %v564_v11 = vmul.f32 1.442695, %v563_v10 }
 0x423   : > { %816 = vpow2.f32 %v564_v11 }
 0x424   : > { %818 = vpow2.f32 %v452_v16 }
 0x42d   : > { %v817_v12 = vpop.eup %816 }
 0x42e   : > { %v566_v13 = vsel %vm174_vm1, %v817_v12, 0.0  ;;  %v819_v17 = vpop.eup %818 }
 0x42f   : > { %567 = vadd.xlane.f32.xlu0 %v566_v13  ;;  %v454_v18 = vsel %vm174_vm1, %v819_v17, 0.0 }
 0x430   : > { %348 = vrot.lane.b32.xlu1 %v888_v2, %s845_s26 }
 0x445   : > { %460 = vrot.lane.b32.xlu0 %v888_v2, %s846_s27 }
 0x454   : > { %455 = vadd.xlane.f32.xlu1 %v454_v18 }
 0x465   : > { %572 = vrot.lane.b32.xlu1 %v888_v2, %s847_s28 }
 0x4ac   : > { %v344_v19 = vpop.xlane.xlu1 %343 }
 0x4ad   : > { %820 = vrcp.f32 %v344_v19 }
 0x4b0   : > { %v349_v20 = vpop.permute.xlu1 %348 }
 0x4b1   : > { %v354_v21 = vsel %vm240_vm6, %v349_v20, 0 }
 0x4b2   : > { %755 = vmatpush3.bf16.msra.mxu0 %v354_v21 }
 0x4b3   : > { %766 = vmatprep.subr.bf16.mxu0 %v834_v0 }
 0x4b7   : > { %v821_v22 = vpop.eup %820 }
 0x4b8   : > { %v346_v23 = vmul.f32 %v821_v22, %v815_v7 }
 0x4ba   : > { %v347_v24 = vpack.c.bf16 %v346_v23, %v346_v23 }
 0x4bc   : > { %757 = vmatmul.mubr.msk.bf16.vlgmr.msra.gmra.mrb[4].mxu0 %vm174_vm1, %v347_v24  ;;  %v568_v25 = vpop.xlane.xlu0 %567 }
 0x4bd   : > { %768 = vmatprep.mubr.msk.bf16.mxu0 %vm835_vm0, %v834_v0 }
 0x4c0   : > { %v461_v26 = vpop.permute.xlu0 %460 }
 0x4c1   : > { %v466_v2 = vsel %vm240_vm6, %v461_v26, 0 }
 0x4c2   : > { %767 = vmatpush3.bf16.msra.mxu0 %v466_v2 }
 0x4c3   : > { %778 = vmatprep.subr.bf16.mxu0 %v834_v0 }
 0x4e1   : > { %v456_v27 = vpop.xlane.xlu1 %455 }
 0x4e2   : > { %822 = vrcp.f32 %v456_v27 }
 0x4e3   : > { %824 = vrcp.f32 %v568_v25 }
 0x4e5   : > { %v573_v29 = vpop.permute.xlu1 %572 }
 0x4e6   : > { %v578_v31 = vsel %vm240_vm6, %v573_v29, 0 }
 0x4ec   : > { %v823_v28 = vpop.eup %822 }
 0x4ed   : > { %v458_v30 = vmul.f32 %v823_v28, %v819_v17  ;;  %v825_v33 = vpop.eup %824 }
 0x4ee   : > { %v570_v34 = vmul.f32 %v825_v33, %v817_v12 }
 0x4ef   : > { %v459_v32 = vpack.c.bf16 %v458_v30, %v458_v30 }
 0x4f0   : > { %v571_v35 = vpack.c.bf16 %v570_v34, %v570_v34 }
 0x4f1   : > { %769 = vmatmul.mubr.msk.bf16.vlgmr.msra.gmra.mrb[8].mxu0 %vm174_vm1, %v459_v32 }
 0x4f2   : > { %779 = vmatpush3.bf16.msra.mxu0 %v578_v31  ;;  %780 = vmatprep.mubr.msk.bf16.mxu0 %vm835_vm0, %v834_v0 }
 0x4f9   : > { %781 = vmatmul.mubr.msk.bf16.vlgmr.msra.gmra.mrb[12].mxu0 %vm174_vm1, %v571_v35 }
 0x58f   : > { %v390_v36 = vpop.f32.mrb[4].mxu0 }
 0x590   : > { %621 = vrot.lane.b32.xlu1 %v390_v36, %s848_s29  ;;  %v758_v37 = vpop.f32.mrb[5].mxu0 }
 0x591   : > { %v393_v38 = vpop.f32.mrb[6].mxu0 }
 0x592   : > { %v759_v39 = vpop.f32.mrb[7].mxu0 }
 0x5c4   : > { %v502_v40 = vpop.f32.mrb[8].mxu0 }
 0x5c5   : > { %625 = vrot.lane.b32.xlu0 %v502_v40, %s849_s30  ;;  %v770_v42 = vpop.f32.mrb[9].mxu0 }
 0x5c6   : > { %v505_v43 = vpop.f32.mrb[10].mxu0 }
 0x5c7   : > { %v771_v44 = vpop.f32.mrb[11].mxu0 }
 0x5cc   : > { %v614_v45 = vpop.f32.mrb[12].mxu0 }
 0x5cd   : > { %629 = vrot.lane.b32.xlu1 %v614_v45, %s850_s3  ;;  %v782_v0 = vpop.f32.mrb[13].mxu0 }
 0x5ce   : > { %v617_v46 = vpop.f32.mrb[14].mxu0 }
 0x5cf   : > { %v783_v47 = vpop.f32.mrb[15].mxu0 }
 0x602   : > { %v622_v48 = vpop.permute.xlu1 %621 }
 0x603   : > { %v632_v50 = vsel %vm174_vm1, %v932_v41, %v622_v48 }
 0x637   : > { %v626_v49 = vpop.permute.xlu0 %625 }
 0x638   : > { %v634_v51 = vsel %vm633_vm7, %v632_v50, %v626_v49 }
 0x63f   : > { %v630_v52 = vpop.permute.xlu1 %629 }
 0x640   : > { %v636_v53 = vsel %vm635_vm8, %v634_v51, %v630_v52 }
 0x641   : > { %v637_v54 = vpack.c.bf16 %v636_v53, %v636_v53 }
 0x643   : > { %639 = vst.msk [vmem:[%s152_s6] sm:$0xf] %vm638_vm9, %v637_v54 }
 0x644 PF: > { %s12_s9 = sadd.s32 1, %s832_s9  }
 0x645   : > { %p9_p4 = scmp.ge.s32.totalorder %s12_s9, 4  }
 0x647   :  { %11 = sbr.rel (!%p9_p4) target bundleno = 1 (0x1), region = 61 }

// kernel: _lambda_.44
= control target key start
LH: loop header
LB: loop body
LE: loop exit
PB: predicated region body
PF: predicated region fallthrough
CT: control target
= control target key end

     0   :  { %vm19_vm0 = vcmask 261120   ;;  %v171_v7 = vmov 0.0   ;;  %vm172_vm1 = vmmov 0   ;;  %vm133_vm2 = vcmask 257024   ;;  %s218_s0 = inlined_call_operand.vmem [shape: bf16[16,32], index: 0, kind: input, shape index: {}]   ;;  %s219_s1 = inlined_call_operand.vmem [shape: bf16[32,32], index: 1, kind: input, shape index: {}]   ;;  %s220_s2 = inlined_call_operand.vmem [shape: f32[1,32], index: 2, kind: input, shape index: {}]   ;;  %s221_s3 = inlined_call_operand.vmem [shape: bf16[16,32], index: 3, kind: output, shape index: {}]  }
   0x1   :  { %v149_v0 = vld [vmem:[%s218_s0] sm:$0xff]   ;;  %155 = vmatprep.subr.bf16.mxu0 %v171_v7  ;;  %20 = vst.msk [vmem:[#allocation2] sm:$0xff] %vm19_vm0, %v171_v7  ;;  %21 = vst.msk [vmem:[#allocation2 + $0x8] sm:$0xff] %vm19_vm0, %v171_v7  ;;  %159 = vmatprep.mubr.msk.bf16.mxu0 %vm172_vm1, %v171_v7  ;;  %v166_v9 = vld [vmem:[%s219_s1 + $0x8] sm:$0xff]  }
   0x2   :  { %v150_v1 = vunpack.c.l.bf16 %v149_v0  ;;  %v151_v2 = vunpack.c.h.bf16 %v149_v0  ;;  %v165_v8 = vld [vmem:[%s219_s1] sm:$0xff]  }
   0x3   :  { %156 = vmatpush3.bf16.msra.mxu0 %v165_v8  ;;  %v140_v19 = vld [vmem:[%s220_s2] ss:$0 sm:$0xff] }
   0x4   :  { %v26_v3 = vmul.f32 %v150_v1, %v150_v1  ;;  %v27_v4 = vmul.f32 %v151_v2, %v151_v2  ;;  %157 = vmatprep.subr.bf16.mxu0 %v171_v7 }
   0x6   :  { %v29_v5 = vsel %vm19_vm0, %v26_v3, 0.0  ;;  %v32_v6 = vsel %vm19_vm0, %v27_v4, 0.0 }
   0x7   :  { %30 = vadd.xlane.f32.xlu0 %v29_v5  ;;  %158 = vmatpush3.bf16.msra.mxu0 %v166_v9 }
   0x8   :  { %v58_v24 = vld [vmem:[#allocation2] sm:$0xff]  ;;  %v59_v26 = vld [vmem:[#allocation2 + $0x8] sm:$0xff] }
   0xb   :  { %33 = vadd.xlane.f32.xlu0 %v32_v6 }
  0x94   :  { %v31_v10 = vpop.xlane.xlu0 %30 }
  0x95   :  { %v36_v11 = vmul.f32 0.03125, %v31_v10 }
  0x97   :  { %v38_v12 = vadd.f32 1e-06, %v36_v11 }
  0x98   :  { %v34_v13 = vpop.xlane.xlu0 %33 }
  0x99   :  { %167 = vrsqrt.f32 %v38_v12  ;;  %v37_v14 = vmul.f32 0.03125, %v34_v13 }
  0x9b   :  { %v39_v15 = vadd.f32 1e-06, %v37_v14 }
  0x9d   :  { %169 = vrsqrt.f32 %v39_v15 }
  0xa3   :  { %v168_v16 = vpop.eup %167 }
  0xa4   :  { %v42_v17 = vmul.f32 %v168_v16, %v150_v1 }
  0xa6   :  { %v51_v21 = vmul.f32 %v140_v19, %v42_v17 }
  0xa7   :  { %v170_v18 = vpop.eup %169 }
  0xa8   :  { %v43_v20 = vmul.f32 %v170_v18, %v151_v2 }
  0xaa   :  { %v52_v22 = vmul.f32 %v140_v19, %v43_v20 }
  0xac   :  { %v53_v23 = vpack.c.bf16 %v52_v22, %v51_v21 }
  0xae   :  { %160 = vmatmul.mubr.msk.bf16.vlgmr.msra.gmra.mrb[0].mxu0 %vm19_vm0, %v53_v23 }
 0x181   :  { %v109_v25 = vpop.f32.mrb[0].mxu0 }
 0x182   :  { %v116_v27 = vadd.f32 %v109_v25, %v58_v24  ;;  %v161_v28 = vpop.f32.mrb[1].mxu0 }
 0x183   :  { %v112_v29 = vpop.f32.mrb[2].mxu0 }
 0x184   :  { %118 = vst.msk [vmem:[#allocation2] sm:$0xff] %vm19_vm0, %v116_v27  ;;  %v117_v30 = vadd.f32 %v112_v29, %v59_v26  ;;  %v162_v31 = vpop.f32.mrb[3].mxu0 }
 0x186   :  { %119 = vst.msk [vmem:[#allocation2 + $0x8] sm:$0xff] %vm19_vm0, %v117_v30 }
 0x18b   :  { %v123_v32 = vld [vmem:[#allocation2] sm:$0xff] }
 0x18c   :  { %v146_v33 = vpack.c.bf16 %v123_v32, %v123_v32 }
 0x18d   :  { %v124_v34 = vld [vmem:[#allocation2 + $0x8] sm:$0xff] }
 0x18e   :  { %134 = vst.msk [vmem:[%s221_s3] sm:$0xf] %vm133_vm2, %v146_v33  ;;  %v147_v35 = vpack.c.bf16 %v124_v34, %v124_v34 }
 0x190   :  { %135 = vst.msk [vmem:[%s221_s3 + $0x4] sm:$0xf] %vm133_vm2, %v147_v35 }

// kernel: _lambda_.59
= control target key start
LH: loop header
LB: loop body
LE: loop exit
PB: predicated region body
PF: predicated region fallthrough
CT: control target
= control target key end

     0   :  { %vm29_vm0 = vcmask 261120   ;;  %v233_v4 = vmov 0.0   ;;  %s301_s0 = inlined_call_operand.vmem [shape: bf16[16,32], index: 0, kind: input, shape index: {}]   ;;  %s302_s1 = inlined_call_operand.vmem [shape: bf16[64,32], index: 1, kind: input, shape index: {}]   ;;  %s303_s2 = inlined_call_operand.vmem [shape: f32[1,32], index: 2, kind: input, shape index: {}]   ;;  %s304_s3 = inlined_call_operand.hbm [shape: f32[16,64], index: 3, kind: output, shape index: {}]  }
   0x1   :  { %v176_v0 = vld [vmem:[%s301_s0] sm:$0xff]   ;;  %184 = vmatprep.subr.bf16.mxu0 %v233_v4 }
   0x2   :  { %v201_v1 = vld [vmem:[%s302_s1] sm:$0xff]   ;;  %v177_v2 = vunpack.c.l.bf16 %v176_v0  ;;  %v178_v3 = vunpack.c.h.bf16 %v176_v0 }
   0x3   :  { %v89_v5 = vsel %vm29_vm0, %v201_v1, 0 }
   0x4   :  { %v27_v6 = vmul.f32 %v177_v2, %v177_v2  ;;  %v28_v7 = vmul.f32 %v178_v3, %v178_v3  ;;  %185 = vmatpush3.bf16.xpose.msra.mxu0 %v89_v5 }
   0x5   :  { %8 = vsyncpa [#allocation4], 0  ;;  %186 = vmatprep.subr.bf16.mxu0 %v233_v4  ;;  %v202_v10 = vld [vmem:[%s302_s1 + $0x8] sm:$0xff]   ;;  %v203_v12 = vld [vmem:[%s302_s1 + $0x10] sm:$0xff]   ;;  %vm234_vm1 = vmmov 0   ;;  %vm20_vm2 = vcmask 523264  }
   0x6   :  { %v30_v8 = vsel %vm29_vm0, %v27_v6, 0.0  ;;  %v33_v9 = vsel %vm29_vm0, %v28_v7, 0.0  ;;  %v92_v11 = vsel %vm29_vm0, %v202_v10, 0  ;;  %v95_v13 = vsel %vm29_vm0, %v203_v12, 0  ;;  %192 = vmatprep.mubr.msk.bf16.mxu0 %vm234_vm1, %v233_v4  ;;  %v204_v14 = vld [vmem:[%s302_s1 + $0x18] sm:$0xff]   ;;  %21 = vst.msk [vmem:[#allocation2] sm:$0xff] %vm20_vm2, %v233_v4 }
   0x7   :  { %31 = vadd.xlane.f32.xlu0 %v30_v8  ;;  %v98_v15 = vsel %vm29_vm0, %v204_v14, 0  ;;  %22 = vst.msk [vmem:[#allocation2 + $0x8] sm:$0xff] %vm20_vm2, %v233_v4  ;;  %v169_v25 = vld [vmem:[%s303_s2] ss:$0 sm:$0xff]  ;;  %s235_s22 = smov [#allocation3]  }
   0x8   :  { %s158_s2 = sshll.u32 %s235_s22, 4  ;;  %s159_s2 = int_to_ptr.vmem [resolvable:$true] %s158_s2 }
   0x9   :  { %s209_s23 = scalar_lea.vmem %s159_s2, 256  ;;  %p214_p1 = scmp.lt.s32.totalorder %s159_s2, %s159_s2 }
   0xa   :  { %p210_p0 = scmp.ne.s32.totalorder %s159_s2, %s209_s23  ;;  %p215_p2 = scmp.lt.s32.totalorder %s209_s23, %s209_s23 }
   0xb   :  { %34 = vadd.xlane.f32.xlu0 %v33_v9 }
   0xc   :  { %187 = vmatpush3.bf16.xpose.msra.mxu0 %v92_v11  ;;  %p216_p3 = por %p215_p2, %p214_p1 }
   0xd   :  { %188 = vmatprep.subr.bf16.mxu0 %v233_v4  ;;  %v63_v30 = vld [vmem:[#allocation2] sm:$0xff] }
   0xe   :  { %v64_v32 = vld [vmem:[#allocation2 + $0x8] sm:$0xff]  ;;  %p217_p4 = pnand %p216_p3, %p210_p0 }
  0x14   :  { %189 = vmatpush3.bf16.xpose.msra.mxu0 %v95_v13 }
  0x15   :  { %190 = vmatprep.subr.bf16.mxu0 %v233_v4 }
  0x1c   :  { %191 = vmatpush3.bf16.xpose.msra.mxu0 %v98_v15 }
  0x94   :  { %v32_v16 = vpop.xlane.xlu0 %31 }
  0x95   :  { %v37_v17 = vmul.f32 0.03125, %v32_v16 }
  0x97   :  { %v39_v18 = vadd.f32 1e-06, %v37_v17 }
  0x98   :  { %v35_v19 = vpop.xlane.xlu0 %34 }
  0x99   :  { %205 = vrsqrt.f32 %v39_v18  ;;  %v38_v20 = vmul.f32 0.03125, %v35_v19 }
  0x9b   :  { %v40_v21 = vadd.f32 1e-06, %v38_v20 }
  0x9d   :  { %207 = vrsqrt.f32 %v40_v21 }
  0xa3   :  { %v206_v22 = vpop.eup %205 }
  0xa4   :  { %v43_v23 = vmul.f32 %v206_v22, %v177_v2 }
  0xa6   :  { %v52_v27 = vmul.f32 %v169_v25, %v43_v23 }
  0xa7   :  { %v208_v24 = vpop.eup %207 }
  0xa8   :  { %v44_v26 = vmul.f32 %v208_v24, %v178_v3 }
  0xaa   :  { %v53_v28 = vmul.f32 %v169_v25, %v44_v26 }
  0xac   :  { %v54_v29 = vpack.c.bf16 %v53_v28, %v52_v27 }
  0xae   :  { %193 = vmatmul.mubr.msk.bf16.vlgmr.msra.gmra.mrb[0].mxu0 %vm29_vm0, %v54_v29 }
 0x181   :  { %v134_v31 = vpop.f32.mrb[0].mxu0 }
 0x182   :  { %v141_v33 = vadd.f32 %v134_v31, %v63_v30  ;;  %v194_v34 = vpop.f32.mrb[1].mxu0 }
 0x183   :  { %v137_v35 = vpop.f32.mrb[2].mxu0 }
 0x184   :  { %144 = vst.msk [vmem:[#allocation2] sm:$0xff] %vm20_vm2, %v141_v33  ;;  %v142_v36 = vadd.f32 %v137_v35, %v64_v32  ;;  %v195_v37 = vpop.f32.mrb[3].mxu0 }
 0x186   :  { %145 = vst.msk [vmem:[#allocation2 + $0x8] sm:$0xff] %vm20_vm2, %v142_v36 }
 0x18b   :  { %v149_v38 = vld [vmem:[#allocation2] sm:$0xff] }
 0x18c   :  { %151 = vst.msk [vmem:[#allocation3] sm:$0xff] %vm20_vm2, %v149_v38 }
 0x18d   :  { %v150_v39 = vld [vmem:[#allocation2 + $0x8] sm:$0xff] }
 0x18e   :  { %152 = vst.msk [vmem:[#allocation3 + $0x8] sm:$0xff] %vm20_vm2, %v150_v39 }
 0x18f   :  { %220 = shalt.err (!%p217_p4)
}
 0x190   :  { %s221_s26 = scalar_lea.hbm %s304_s3, 256 }
 0x191   :  { %p222_p5 = scmp.ne.s32.totalorder %s304_s3, %s221_s26  ;;  %p225_p6 = scmp.lt.u32.totalorder %s221_s26, %s304_s3 }
 0x193   :  { %p227_p7 = pnand %p225_p6, %p222_p5 }
 0x195   :  { %230 = shalt.err (!%p227_p7)
}
 0x196   :  { %s236_s4 = smov 128   ;;  %s237_s5 = smov 8  }
 0x197   :  { %164 = dma.vmem_to_hbm [thread:$0]  %s159_s2, 256, %s304_s3, [#allocation4], %s236_s4, %s236_s4, %s237_s5  }
 0x198   :  { %231 = dma.done.wait [#allocation4], 256  }
 0x199   :  { %232 = vsyncadd [#allocation4], 4294967040 }
 0x19a   :  { %168 = vsyncpa [#allocation4], 1 }

// kernel: _lambda_.46
= control target key start
LH: loop header
LB: loop body
LE: loop exit
PB: predicated region body
PF: predicated region fallthrough
CT: control target
= control target key end

     0   :  { %s918_s12 = smov 0   ;;  %s1018_s0 = inlined_call_operand.vmem [shape: bf16[2,8,32], index: 0, kind: input, shape index: {}]   ;;  %s1019_s1 = inlined_call_operand.vmem [shape: bf16[2,8,64], index: 1, kind: input, shape index: {}]   ;;  %s1020_s2 = inlined_call_operand.vmem [shape: f32[2,1,8], index: 2, kind: input, shape index: {}]   ;;  %s1021_s3 = inlined_call_operand.vmem [shape: bf16[2,8,32], index: 3, kind: output, shape index: {}]  }
   0x1 LB: > { %s754_s13 = sadd.s32 4294967295, %s883_s12   ;;  %p758_p0 = scmp.ge.s32.totalorder %s883_s12, 1  ;;  %s883_s12 = sphi %s918_s12, %s13_s12  }
   0x2   : > { %p153_p1 = scmp.lt.s32.totalorder %s883_s12, 3 }
   0x4   : > { %p154_p2 = pnand %p758_p0, %p153_p1 }
   0x5   : > { %p182_p3 = scmp.lt.s32.totalorder (!%p154_p2), %s754_s13, 1  ;;  %v885_v0 = vmov (!%p154_p2), 0.0   ;;  %vm886_vm0 = vmmov (!%p154_p2), 0   ;;  %vm208_vm1 = vcmask (!%p154_p2), 64512   ;;  %v203_v4 = vlaneseq (!%p154_p2)  ;;  %s888_s24 = smov (!%p154_p2), 96  }
   0x6   : > { %157 = sbr.rel (%p154_p2) target bundleno = 1443 (0x5a3), region = 32  ;;  %790 = vmatprep.subr.bf16.mxu0 (!%p154_p2), %v885_v0  ;;  %792 = vmatprep.mubr.msk.bf16.mxu0 (!%p154_p2), %vm886_vm0, %v885_v0  ;;  %v887_v8 = vmov (!%p154_p2), 0   ;;  %s889_s25 = smov (!%p154_p2), 120   ;;  %vm277_vm4 = vcmask (!%p154_p2), 1043456   ;;  %vm673_vm5 = vcmask (!%p154_p2), 130048   ;;  %vm675_vm6 = vcmask (!%p154_p2), 195584  }
   0x7   : > { %796 = vmatprep.subr.bf16.mxu1 (!%p154_p2), %v885_v0  ;;  %798 = vmatprep.mubr.msk.bf16.mxu1 (!%p154_p2), %vm886_vm0, %v885_v0  ;;  %v204_v6 = vshrl.u32 (!%p154_p2), %v203_v4, 7  ;;  %s890_s26 = smov (!%p154_p2), 112   ;;  %s891_s27 = smov (!%p154_p2), 104   ;;  %vm678_vm7 = vcmask (!%p154_p2), 257024  }
   0x8   : > { %s892_s28 = smov (!%p154_p2), 88   ;;  %s893_s29 = smov (!%p154_p2), 72  }
   0x9   : > { %v205_v7 = vsub.s32 (!%p154_p2), 0, %v204_v6  ;;  %s894_s30 = smov (!%p154_p2), 80   ;;  %s895_s4 = smov (!%p154_p2), 8  }
   0xa   : > { %s896_s5 = smov (!%p154_p2), 16   ;;  %s897_s6 = smov (!%p154_p2), 24  }
   0xd   : > { %s1023_s13 = smov (!%p182_p3, %s754_s13), 1 }
   0xe   : > { %s932_s14 = sshll.u32 %s1023_s13, 2  ;;  %s192_s23 = scalar_lea.vmem %s1020_s2, %s1023_s13 }
   0xf   : > { %s189_s17 = scalar_lea.vmem %s1019_s1, %s932_s14  ;;  %s185_s20 = scalar_lea.vmem %s1018_s0, %s932_s14  ;;  %v200_v5 = vld [vmem:[%s192_s23] sm:$0x1] }
  0x10   : > { %v199_v1 = vld [vmem:[%s189_s17] sm:$0xf]  ;;  %vm201_vm2 = vcmp.gt.f32.partialorder %v200_v5, 0.0  ;;  %s196_s9 = scalar_lea.vmem %s1021_s3, %s932_s14 }
  0x11   : > { %v213_v2 = vsel %vm208_vm1, %v199_v1, 0  ;;  %v198_v3 = vld [vmem:[%s185_s20] sm:$0xf]  ;;  %v202_v9 = vsel %vm201_vm2, 1, %v887_v8  ;;  %v956_v18 = vcombine.low %v199_v1, %v199_v1 }
  0x12   : > { %791 = vmatpush3.bf16.xpose.msra.mxu0 %v213_v2  ;;  %v950_v10 = vrot.slane %v202_v9, %v205_v7  ;;  %v765_v19 = vcombine.low %v198_v3, %v198_v3 }
  0x13   : > { %808 = vmatprep.subr.bf16.mxu0 %v885_v0  ;;  %272 = vrot.lane.b32.xlu1 %v956_v18, %s888_s24 }
  0x14   : > { %vm207_vm3 = vcmp.eq.s32.totalorder %v950_v10, 1 }
  0x17   : > { %326 = vrot.lane.b32.xlu1 %v956_v18, %s889_s25 }
  0x19   : > { %793 = vmatmul.mubr.msk.bf16.vlgmr.msra.gmra.mrb[0].mxu0 %vm208_vm1, %v198_v3 }
  0x1a   : > { %810 = vmatprep.mubr.msk.bf16.mxu0 %vm886_vm0, %v885_v0 }
  0x1b   : > { %438 = vrot.lane.b32.xlu1 %v956_v18, %s890_s26 }
  0x1f   : > { %436 = vrot.lane.b32.xlu1 %v765_v19, %s890_s26 }
  0x23   : > { %550 = vrot.lane.b32.xlu1 %v956_v18, %s891_s27 }
  0x27   : > { %548 = vrot.lane.b32.xlu1 %v765_v19, %s891_s27 }
  0x85   : > { %v273_v25 = vpop.permute.xlu1 %272 }
  0x86   : > { %v279_v26 = vsel %vm277_vm4, %v273_v25, 0 }
  0x87   : > { %797 = vmatpush3.bf16.msra.mxu1 %v279_v26 }
  0x88   : > { %802 = vmatprep.subr.bf16.mxu1 %v885_v0 }
  0x89   : > { %v327_v29 = vpop.permute.xlu1 %326 }
  0x8a   : > { %v332_v31 = vsel %vm208_vm1, %v327_v29, 0 }
  0x8d   : > { %v439_v33 = vpop.permute.xlu1 %438 }
  0x8e   : > { %v444_v36 = vsel %vm208_vm1, %v439_v33, 0 }
  0x91   : > { %v437_v35 = vpop.permute.xlu1 %436 }
  0x95   : > { %v551_v37 = vpop.permute.xlu1 %550 }
  0x96   : > { %v556_v38 = vsel %vm208_vm1, %v551_v37, 0 }
  0x99   : > { %v549_v39 = vpop.permute.xlu1 %548 }
  0xec   : > { %v249_v11 = vpop.f32.mrb[0].mxu0 }
  0xed   : > { %v255_v12 = vmul.f32 0.35355338, %v249_v11  ;;  %v794_v13 = vpop.f32.mrb[1].mxu0 }
  0xee   : > { %v252_v14 = vpop.f32.mrb[2].mxu0 }
  0xef   : > { %v795_v15 = vpop.f32.mrb[3].mxu0  ;;  %v256_v16 = vsel %vm207_vm3, %v255_v12, -1e+09 }
  0xf0   : > { %v257_v17 = vsel %vm208_vm1, %v256_v16, -inf }
  0xf1   : > { %258 = vmax.xlane.f32.xlu0 %v257_v17 }
 0x17e   : > { %v259_v20 = vpop.xlane.xlu0 %258 }
 0x17f   : > { %v260_v21 = vsub.f32 %v256_v16, %v259_v20 }
 0x181   : > { %v261_v22 = vmul.f32 1.442695, %v260_v21 }
 0x183   : > { %861 = vpow2.f32 %v261_v22 }
 0x18d   : > { %v862_v23 = vpop.eup %861 }
 0x18e   : > { %v263_v24 = vsel %vm208_vm1, %v862_v23, 0.0 }
 0x18f   : > { %264 = vadd.xlane.f32.xlu0 %v263_v24 }
 0x1a5   : > { %324 = vrot.lane.b32.xlu0 %v765_v19, %s889_s25 }
 0x21c   : > { %v265_v27 = vpop.xlane.xlu0 %264 }
 0x21d   : > { %863 = vrcp.f32 %v265_v27 }
 0x220   : > { %v325_v34 = vpop.permute.xlu0 %324 }
 0x227   : > { %v864_v28 = vpop.eup %863 }
 0x228   : > { %v267_v30 = vmul.f32 %v864_v28, %v862_v23 }
 0x22a   : > { %v268_v32 = vpack.c.bf16 %v267_v30, %v267_v30 }
 0x22c   : > { %799 = vmatmul.mubr.msk.bf16.vlgmr.msra.gmra.mrb[0].mxu1 %vm208_vm1, %v268_v32 }
 0x22d   : > { %803 = vmatpush3.bf16.xpose.msra.mxu1 %v332_v31  ;;  %804 = vmatprep.mubr.msk.bf16.mxu1 %vm886_vm0, %v885_v0 }
 0x22e   : > { %814 = vmatprep.subr.bf16.mxu1 %v885_v0 }
 0x234   : > { %805 = vmatmul.mubr.msk.bf16.vlgmr.msra.gmra.mrb[4].mxu1 %vm208_vm1, %v325_v34 }
 0x235   : > { %815 = vmatpush3.bf16.xpose.msra.mxu1 %v444_v36  ;;  %816 = vmatprep.mubr.msk.bf16.mxu1 %vm886_vm0, %v885_v0 }
 0x236   : > { %826 = vmatprep.subr.bf16.mxu1 %v885_v0 }
 0x23c   : > { %817 = vmatmul.mubr.msk.bf16.vlgmr.msra.gmra.mrb[8].mxu1 %vm208_vm1, %v437_v35 }
 0x23d   : > { %827 = vmatpush3.bf16.xpose.msra.mxu1 %v556_v38  ;;  %828 = vmatprep.mubr.msk.bf16.mxu1 %vm886_vm0, %v885_v0 }
 0x244   : > { %829 = vmatmul.mubr.msk.bf16.vlgmr.msra.gmra.mrb[12].mxu1 %vm208_vm1, %v549_v39 }
 0x2ff   : > { %v980_v40 = vpop.f32.mrb[0].mxu1 }
 0x300   : > { %v800_v41 = vpop.f32.mrb[1].mxu1 }
 0x301   : > { %v318_v42 = vpop.f32.mrb[2].mxu1 }
 0x302   : > { %v801_v43 = vpop.f32.mrb[3].mxu1 }
 0x307   : > { %v368_v44 = vpop.f32.mrb[4].mxu1 }
 0x308   : > { %v374_v45 = vmul.f32 0.35355338, %v368_v44  ;;  %v806_v46 = vpop.f32.mrb[5].mxu1 }
 0x309   : > { %v371_v47 = vpop.f32.mrb[6].mxu1 }
 0x30a   : > { %v807_v48 = vpop.f32.mrb[7].mxu1  ;;  %v375_v49 = vsel %vm207_vm3, %v374_v45, -1e+09 }
 0x30b   : > { %v376_v50 = vsel %vm208_vm1, %v375_v49, -inf }
 0x30c   : > { %377 = vmax.xlane.f32.xlu1 %v376_v50 }
 0x30f   : > { %v480_v51 = vpop.f32.mrb[8].mxu1 }
 0x310   : > { %v486_v52 = vmul.f32 0.35355338, %v480_v51  ;;  %v818_v53 = vpop.f32.mrb[9].mxu1 }
 0x311   : > { %v483_v54 = vpop.f32.mrb[10].mxu1 }
 0x312   : > { %v819_v55 = vpop.f32.mrb[11].mxu1  ;;  %v487_v56 = vsel %vm207_vm3, %v486_v52, -1e+09 }
 0x313   : > { %v488_v57 = vsel %vm208_vm1, %v487_v56, -inf }
 0x314   : > { %489 = vmax.xlane.f32.xlu0 %v488_v57 }
 0x317   : > { %v592_v58 = vpop.f32.mrb[12].mxu1 }
 0x318   : > { %v598_v59 = vmul.f32 0.35355338, %v592_v58  ;;  %v830_v60 = vpop.f32.mrb[13].mxu1 }
 0x319   : > { %v595_v61 = vpop.f32.mrb[14].mxu1 }
 0x31a   : > { %v831_v62 = vpop.f32.mrb[15].mxu1  ;;  %v599_v63 = vsel %vm207_vm3, %v598_v59, -1e+09 }
 0x31b   : > { %v600_v1 = vsel %vm208_vm1, %v599_v63, -inf }
 0x31c   : > { %601 = vmax.xlane.f32.xlu1 %v600_v1 }
 0x32d   : > { %388 = vrot.lane.b32.xlu1 %v956_v18, %s892_s28 }
 0x399   : > { %v378_v2 = vpop.xlane.xlu1 %377 }
 0x39a   : > { %v379_v3 = vsub.f32 %v375_v49, %v378_v2 }
 0x39c   : > { %v380_v4 = vmul.f32 1.442695, %v379_v3 }
 0x39e   : > { %865 = vpow2.f32 %v380_v4 }
 0x3a1   : > { %v490_v5 = vpop.xlane.xlu0 %489 }
 0x3a2   : > { %v491_v6 = vsub.f32 %v487_v56, %v490_v5 }
 0x3a4   : > { %v492_v7 = vmul.f32 1.442695, %v491_v6 }
 0x3a6   : > { %867 = vpow2.f32 %v492_v7 }
 0x3a8   : > { %v866_v8 = vpop.eup %865 }
 0x3a9   : > { %v602_v9 = vpop.xlane.xlu1 %601  ;;  %v382_v11 = vsel %vm208_vm1, %v866_v8, 0.0 }
 0x3aa   : > { %v603_v10 = vsub.f32 %v599_v63, %v602_v9  ;;  %383 = vadd.xlane.f32.xlu0 %v382_v11 }
 0x3ac   : > { %v604_v12 = vmul.f32 1.442695, %v603_v10 }
 0x3ad   : > { %v389_v13 = vpop.permute.xlu1 %388 }
 0x3ae   : > { %869 = vpow2.f32 %v604_v12  ;;  %v394_v14 = vsel %vm277_vm4, %v389_v13, 0 }
 0x3af   : > { %809 = vmatpush3.bf16.msra.mxu0 %v394_v14 }
 0x3b0   : > { %v868_v15 = vpop.eup %867  ;;  %820 = vmatprep.subr.bf16.mxu0 %v885_v0 }
 0x3b1   : > { %v494_v16 = vsel %vm208_vm1, %v868_v15, 0.0 }
 0x3b2   : > { %495 = vadd.xlane.f32.xlu1 %v494_v16 }
 0x3b8   : > { %v870_v17 = vpop.eup %869 }
 0x3b9   : > { %v606_v19 = vsel %vm208_vm1, %v870_v17, 0.0 }
 0x3ba   : > { %607 = vadd.xlane.f32.xlu0 %v606_v19 }
 0x3c3   : > { %612 = vrot.lane.b32.xlu1 %v956_v18, %s893_s29 }
 0x3d0   : > { %500 = vrot.lane.b32.xlu0 %v956_v18, %s894_s30 }
 0x437   : > { %v384_v20 = vpop.xlane.xlu0 %383 }
 0x438   : > { %871 = vrcp.f32 %v384_v20 }
 0x43f   : > { %v496_v21 = vpop.xlane.xlu1 %495 }
 0x440   : > { %873 = vrcp.f32 %v496_v21 }
 0x442   : > { %v872_v22 = vpop.eup %871 }
 0x443   : > { %v386_v23 = vmul.f32 %v872_v22, %v866_v8  ;;  %v613_v29 = vpop.permute.xlu1 %612 }
 0x444   : > { %v618_v31 = vsel %vm277_vm4, %v613_v29, 0 }
 0x445   : > { %v387_v24 = vpack.c.bf16 %v386_v23, %v386_v23 }
 0x447   : > { %v608_v25 = vpop.xlane.xlu0 %607  ;;  %811 = vmatmul.mubr.msk.bf16.vlgmr.msra.gmra.mrb[4].mxu0 %vm208_vm1, %v387_v24 }
 0x448   : > { %875 = vrcp.f32 %v608_v25  ;;  %822 = vmatprep.mubr.msk.bf16.mxu0 %vm886_vm0, %v885_v0 }
 0x44a   : > { %v874_v26 = vpop.eup %873 }
 0x44b   : > { %v498_v27 = vmul.f32 %v874_v26, %v868_v15  ;;  %v501_v28 = vpop.permute.xlu0 %500 }
 0x44c   : > { %v506_v18 = vsel %vm277_vm4, %v501_v28, 0 }
 0x44d   : > { %821 = vmatpush3.bf16.msra.mxu0 %v506_v18  ;;  %v499_v30 = vpack.c.bf16 %v498_v27, %v498_v27 }
 0x44e   : > { %832 = vmatprep.subr.bf16.mxu0 %v885_v0 }
 0x450   : > { %823 = vmatmul.mubr.msk.bf16.vlgmr.msra.gmra.mrb[8].mxu0 %vm208_vm1, %v499_v30 }
 0x451   : > { %833 = vmatpush3.bf16.msra.mxu0 %v618_v31  ;;  %834 = vmatprep.mubr.msk.bf16.mxu0 %vm886_vm0, %v885_v0 }
 0x452   : > { %v876_v32 = vpop.eup %875 }
 0x453   : > { %v610_v33 = vmul.f32 %v876_v32, %v870_v17 }
 0x455   : > { %v611_v34 = vpack.c.bf16 %v610_v33, %v610_v33 }
 0x458   : > { %835 = vmatmul.mubr.msk.bf16.vlgmr.msra.gmra.mrb[12].mxu0 %vm208_vm1, %v611_v34 }
 0x51a   : > { %v430_v35 = vpop.f32.mrb[4].mxu0 }
 0x51b   : > { %661 = vrot.lane.b32.xlu1 %v430_v35, %s895_s4  ;;  %v812_v36 = vpop.f32.mrb[5].mxu0 }
 0x51c   : > { %v433_v37 = vpop.f32.mrb[6].mxu0 }
 0x51d   : > { %v813_v38 = vpop.f32.mrb[7].mxu0 }
 0x523   : > { %v542_v39 = vpop.f32.mrb[8].mxu0 }
 0x524   : > { %665 = vrot.lane.b32.xlu0 %v542_v39, %s896_s5  ;;  %v824_v41 = vpop.f32.mrb[9].mxu0 }
 0x525   : > { %v545_v42 = vpop.f32.mrb[10].mxu0 }
 0x526   : > { %v825_v43 = vpop.f32.mrb[11].mxu0 }
 0x52b   : > { %v654_v44 = vpop.f32.mrb[12].mxu0 }
 0x52c   : > { %669 = vrot.lane.b32.xlu1 %v654_v44, %s897_s6  ;;  %v836_v0 = vpop.f32.mrb[13].mxu0 }
 0x52d   : > { %v657_v45 = vpop.f32.mrb[14].mxu0 }
 0x52e   : > { %v837_v46 = vpop.f32.mrb[15].mxu0 }
 0x58d   : > { %v662_v47 = vpop.permute.xlu1 %661 }
 0x58e   : > { %v672_v49 = vsel %vm208_vm1, %v980_v40, %v662_v47 }
 0x596   : > { %v666_v48 = vpop.permute.xlu0 %665 }
 0x597   : > { %v674_v50 = vsel %vm673_vm5, %v672_v49, %v666_v48 }
 0x59e   : > { %v670_v51 = vpop.permute.xlu1 %669 }
 0x59f   : > { %v676_v52 = vsel %vm675_vm6, %v674_v50, %v670_v51 }
 0x5a0   : > { %v677_v53 = vpack.c.bf16 %v676_v52, %v676_v52 }
 0x5a2   : > { %679 = vst.msk [vmem:[%s196_s9] sm:$0xf] %vm678_vm7, %v677_v53 }
 0x5a3 PF: > { %s13_s12 = sadd.s32 1, %s883_s12  }
 0x5a4   : > { %p10_p4 = scmp.ge.s32.totalorder %s13_s12, 4  }
 0x5a6   :  { %12 = sbr.rel (!%p10_p4) target bundleno = 1 (0x1), region = 68 }

</bundles_post_ra>
